<compile_context>
chip_gen: v7x
topology: tpu7x:2x2x1
jax: 0.10.0
libtpu: 0.0.40
codegen_flags: <defaults>
</compile_context>

<pallas_src>
import math

import jax
import jax.numpy as jnp
from jax.experimental import pallas as pl
from jax.experimental.pallas import tpu as pltpu

# ----------------------- model hyper-parameters (small) -----------------------
VOCAB = 64
TYPE_VOCAB = 2
HIDDEN = 32
HEADS = 2
HEAD_DIM = HIDDEN // HEADS
LAYERS = 2
INTERMEDIATE = 64
NUM_LABELS = 2
MAX_REL_POS = 16      # NEZHA functional relative-position clipping distance
LN_EPS = 1e-12
BATCH = 2
SEQ = 8
ROWS = BATCH * SEQ
DTYPE = jnp.float32

EMB_ROWS = ((VOCAB + TYPE_VOCAB + 7) // 8) * 8          # padded embedding-table rows

# slab row layout (one packed (rows, 128) f32 array for all small params)
SLAB_EMB_LN_G = 0
SLAB_EMB_LN_B = 1
SLAB_LAYER0 = 2                                          # 8 rows per layer
SLAB_POOL_B = SLAB_LAYER0 + 8 * LAYERS                   # 18
SLAB_FC_B = SLAB_POOL_B + 1                              # 19
SLAB_HEAD_W = ((SLAB_FC_B + 1 + 7) // 8) * 8             # 24 (pool_w / fc_w rows)
SLAB_ROWS = SLAB_HEAD_W + HIDDEN                         # 56


# ------------------------------ in-kernel helpers ------------------------------
def _layernorm(x, g, b):
    mu = jnp.mean(x, axis=-1, keepdims=True)
    var = jnp.mean((x - mu) ** 2, axis=-1, keepdims=True)
    return (x - mu) * jax.lax.rsqrt(var + LN_EPS) * g + b


def _gelu(x):
    # TODO(synk): exact erf-GELU if bit-parity with HF NEZHA is required (tanh approx used here).
    return 0.5 * x * (1.0 + jnp.tanh(0.7978845608028654 * (x + 0.044715 * x * x * x)))


# ------------------------------ fused Pallas kernel ----------------------------
def _fused_kernel(tok_ref, amask_ref, emb_tab_ref, rel_ref,
                  wqkv_ref, wo_ref, wi_ref, wo2_ref, slab_ref, o_ref):
    # ---- embedding gather: word_emb[id] + type_emb[tt] as one "two-hot" matmul ----
    tok = tok_ref[...]                                              # (ROWS, 2) int32
    iota = jax.lax.broadcasted_iota(jnp.int32, (ROWS, EMB_ROWS), 1)
    two_hot = jnp.logical_or(iota == tok[:, 0:1], iota == tok[:, 1:2]).astype(DTYPE)
    h = jnp.dot(two_hot, emb_tab_ref[...], preferred_element_type=jnp.float32)   # (ROWS, H)

    # embedding LayerNorm
    h = _layernorm(h,
                   slab_ref[SLAB_EMB_LN_G:SLAB_EMB_LN_G + 1, 0:HIDDEN],
                   slab_ref[SLAB_EMB_LN_B:SLAB_EMB_LN_B + 1, 0:HIDDEN])

    # additive attention mask, broadcast once per batch element (hoisted out of loops)
    add_mask = (1.0 - amask_ref[...]) * -10000.0                    # (B, S)
    masks = [jnp.broadcast_to(add_mask[b:b + 1, :], (SEQ, SEQ)) for b in range(BATCH)]

    rel = rel_ref[...]                                              # (S, S, HEAD_DIM)

    for l in range(LAYERS):                                         # statically unrolled
        r = SLAB_LAYER0 + 8 * l
        bqkv = slab_ref[r + 0:r + 1, 0:3 * HIDDEN]
        bo = slab_ref[r + 1:r + 2, 0:HIDDEN]
        g1 = slab_ref[r + 2:r + 3, 0:HIDDEN]
        b1 = slab_ref[r + 3:r + 4, 0:HIDDEN]
        bi = slab_ref[r + 4:r + 5, 0:INTERMEDIATE]
        bo2 = slab_ref[r + 5:r + 6, 0:HIDDEN]
        g2 = slab_ref[r + 6:r + 7, 0:HIDDEN]
        b2 = slab_ref[r + 7:r + 8, 0:HIDDEN]

        # fused QKV projection for ALL batch rows at once (1/sqrt(Dh) pre-folded into Q)
        qkv = jnp.dot(h, wqkv_ref[l], preferred_element_type=jnp.float32) + bqkv   # (ROWS, 3H)

        ctx_rows = []
        for b in range(BATCH):                                      # static, B == 2
            q_b = qkv[b * SEQ:(b + 1) * SEQ, 0:HIDDEN]
            k_b = qkv[b * SEQ:(b + 1) * SEQ, HIDDEN:2 * HIDDEN]
            v_b = qkv[b * SEQ:(b + 1) * SEQ, 2 * HIDDEN:3 * HIDDEN]
            heads = []
            for hd in range(HEADS):                                 # static, 2 heads
                c0 = hd * HEAD_DIM
                qh = q_b[:, c0:c0 + HEAD_DIM]                       # (S, Dh)
                kh = k_b[:, c0:c0 + HEAD_DIM]
                vh = v_b[:, c0:c0 + HEAD_DIM]

                # content scores (MXU) + NEZHA relative-key scores (VPU mul + XLU reduce)
                s = jnp.einsum("qd,kd->qk", qh, kh,
                               preferred_element_type=jnp.float32)  # (S, S)
                s_rel = jnp.sum(qh[:, None, :] * rel, axis=-1)      # (S, S)
                s = s + s_rel + masks[b]

                # softmax over keys; reciprocal on the EUP
                s = s - jnp.max(s, axis=-1, keepdims=True)
                p = jnp.exp(s)
                p = p * pl.reciprocal(jnp.sum(p, axis=-1, keepdims=True), approx=True)

                # context (MXU) + NEZHA relative-value term (VPU mul + XLU reduce)
                ctx = jnp.dot(p, vh, preferred_element_type=jnp.float32)   # (S, Dh)
                ctx_rel = jnp.sum(p[:, :, None] * rel, axis=1)             # (S, Dh)
                heads.append(ctx + ctx_rel)
            ctx_rows.append(jnp.concatenate(heads, axis=-1))        # (S, H)
        ctx_all = jnp.concatenate(ctx_rows, axis=0)                 # (ROWS, H)

        attn_out = jnp.dot(ctx_all, wo_ref[l], preferred_element_type=jnp.float32) + bo
        h = _layernorm(attn_out + h, g1, b1)

        ffn = _gelu(jnp.dot(h, wi_ref[l], preferred_element_type=jnp.float32) + bi)
        ffn_out = jnp.dot(ffn, wo2_ref[l], preferred_element_type=jnp.float32) + bo2
        h = _layernorm(ffn_out + h, g2, b2)

    # pooler (CLS token, tanh) + classifier — both batch rows at once
    pool_w = slab_ref[SLAB_HEAD_W:SLAB_HEAD_W + HIDDEN, 0:HIDDEN]              # (H, H)
    fc_w = slab_ref[SLAB_HEAD_W:SLAB_HEAD_W + HIDDEN, HIDDEN:HIDDEN + NUM_LABELS]
    pool_b = slab_ref[SLAB_POOL_B:SLAB_POOL_B + 1, 0:HIDDEN]
    fc_b = slab_ref[SLAB_FC_B:SLAB_FC_B + 1, 0:NUM_LABELS]

    cls = jnp.concatenate([h[b * SEQ:b * SEQ + 1, :] for b in range(BATCH)], axis=0)  # (B, H)
    pooled = jnp.tanh(jnp.dot(cls, pool_w, preferred_element_type=jnp.float32) + pool_b)
    logits = jnp.dot(pooled, fc_w, preferred_element_type=jnp.float32) + fc_b          # (B, L)
    o_ref[...] = logits.astype(o_ref.dtype)


def _full(shape):
    nd = len(shape)
    return pl.BlockSpec(tuple(shape), lambda i, _nd=nd: (0,) * _nd)


def fused_encoder(tok, amask, rel, packed):
    in_arrays = [tok, amask, packed["emb_table"], rel,
                 packed["wqkv"], packed["wo"], packed["wi"], packed["wo2"], packed["slab"]]
    return pl.pallas_call(
        _fused_kernel,
        out_shape=jax.ShapeDtypeStruct((BATCH, NUM_LABELS), DTYPE),
        grid=(1,),                                       # batch folded into matmul rows
        in_specs=[_full(a.shape) for a in in_arrays],
        out_specs=pl.BlockSpec((BATCH, NUM_LABELS), lambda i: (0, 0)),
        compiler_params=pltpu.CompilerParams(dimension_semantics=("arbitrary",)),
    )(*in_arrays)


# ----------------------------- parameter setup --------------------------------
def init_params(key):
    def dense(key, fan_in, fan_out):
        return (0.02 * jax.random.normal(key, (fan_in, fan_out), DTYPE),
                jnp.zeros((fan_out,), DTYPE))

    keys = jax.random.split(key, 8 + LAYERS * 8)
    p = {
        "word_emb": 0.02 * jax.random.normal(keys[0], (VOCAB, HIDDEN), DTYPE),
        "type_emb": 0.02 * jax.random.normal(keys[1], (TYPE_VOCAB, HIDDEN), DTYPE),
        "emb_ln_g": jnp.ones((HIDDEN,), DTYPE),
        "emb_ln_b": jnp.zeros((HIDDEN,), DTYPE),
        "layers": [],
    }
    ki = 2
    for _ in range(LAYERS):
        lyr = {}
        lyr["wq"], lyr["bq"] = dense(keys[ki + 0], HIDDEN, HIDDEN)
        lyr["wk"], lyr["bk"] = dense(keys[ki + 1], HIDDEN, HIDDEN)
        lyr["wv"], lyr["bv"] = dense(keys[ki + 2], HIDDEN, HIDDEN)
        lyr["wo"], lyr["bo"] = dense(keys[ki + 3], HIDDEN, HIDDEN)
        lyr["ln1_g"], lyr["ln1_b"] = jnp.ones((HIDDEN,), DTYPE), jnp.zeros((HIDDEN,), DTYPE)
        lyr["wi"], lyr["bi"] = dense(keys[ki + 4], HIDDEN, INTERMEDIATE)
        lyr["wo2"], lyr["bo2"] = dense(keys[ki + 5], INTERMEDIATE, HIDDEN)
        lyr["ln2_g"], lyr["ln2_b"] = jnp.ones((HIDDEN,), DTYPE), jnp.zeros((HIDDEN,), DTYPE)
        p["layers"].append(lyr)
        ki += 8
    p["pool_w"], p["pool_b"] = dense(keys[ki - 2], HIDDEN, HIDDEN)
    p["fc_w"], p["fc_b"] = dense(keys[ki - 1], HIDDEN, NUM_LABELS)
    return p


def pack_params(p):
    """Pack once (outside jit): stacked big weights + one (rows,128) bias/LN/head slab."""
    scale = 1.0 / math.sqrt(HEAD_DIM)

    def row(vec):
        v = jnp.asarray(vec, DTYPE).reshape(-1)
        return jnp.pad(v, (0, 128 - v.shape[0]))

    rows = [row(p["emb_ln_g"]), row(p["emb_ln_b"])]
    wqkv, wo, wi, wo2 = [], [], [], []
    for l in p["layers"]:
        # 1/sqrt(head_dim) folded into the Q projection (weights and bias)
        wqkv.append(jnp.concatenate([l["wq"] * scale, l["wk"], l["wv"]], axis=1))   # (H, 3H)
        wo.append(l["wo"])
        wi.append(l["wi"])
        wo2.append(l["wo2"])
        rows.append(row(jnp.concatenate([l["bq"] * scale, l["bk"], l["bv"]])))
        rows.append(row(l["bo"]))
        rows.append(row(l["ln1_g"]))
        rows.append(row(l["ln1_b"]))
        rows.append(row(l["bi"]))
        rows.append(row(l["bo2"]))
        rows.append(row(l["ln2_g"]))
        rows.append(row(l["ln2_b"]))
    rows.append(row(p["pool_b"]))
    rows.append(row(p["fc_b"]))

    bias_rows = jnp.stack(rows)                                                   # (20, 128)
    bias_rows = jnp.pad(bias_rows, ((0, SLAB_HEAD_W - bias_rows.shape[0]), (0, 0)))
    head_w = jnp.concatenate([p["pool_w"], p["fc_w"]], axis=1)                    # (H, H+L)
    head_w = jnp.pad(head_w, ((0, 0), (0, 128 - head_w.shape[1])))                # (H, 128)
    slab = jnp.concatenate([bias_rows, head_w], axis=0)                           # (56, 128)

    emb_table = jnp.concatenate([p["word_emb"], p["type_emb"]], axis=0)           # (66, H)
    emb_table = jnp.pad(emb_table, ((0, EMB_ROWS - emb_table.shape[0]), (0, 0)))  # (72, H)

    return {
        "emb_table": emb_table,
        "wqkv": jnp.stack(wqkv),   # (L, H, 3H)
        "wo": jnp.stack(wo),       # (L, H, H)
        "wi": jnp.stack(wi),       # (L, H, I)
        "wo2": jnp.stack(wo2),     # (L, I, H)
        "slab": slab,              # (56, 128)
    }


def nezha_relative_positions(seq_len, depth, max_rel=MAX_REL_POS):
    # NEZHA functional (fixed sinusoidal) relative position encodings, (S, S, depth).
    r = jnp.arange(seq_len)
    dist = jnp.clip(r[None, :] - r[:, None], -max_rel, max_rel) + max_rel
    vocab = 2 * max_rel + 1
    pos = jnp.arange(vocab, dtype=DTYPE)[:, None]
    i = jnp.arange(depth, dtype=DTYPE)[None, :]
    angle = pos / jnp.power(10000.0, (2.0 * jnp.floor(i / 2.0)) / depth)
    table = jnp.where(jnp.arange(depth)[None, :] % 2 == 0, jnp.sin(angle), jnp.cos(angle))
    return table.astype(DTYPE)[dist]


# --------------------------------- forward ------------------------------------
@jax.jit
def cls_model_forward(packed, rel, input_ids, token_type_ids, attention_mask):
    # Only trivial int/id plumbing stays in XLA glue; gather + mask happen in-kernel.
    tok = jnp.stack(
        [input_ids.reshape(-1).astype(jnp.int32),
         VOCAB + token_type_ids.reshape(-1).astype(jnp.int32)], axis=-1)   # (B*S, 2)
    amask = attention_mask.astype(DTYPE)                                    # (B, S)
    logits = fused_encoder(tok, amask, rel, packed)
    return {"pred": logits}


# ----------------------------------- main --------------------------------------
if __name__ == "__main__":
    key = jax.random.PRNGKey(0)
    k_param, k_ids, k_type = jax.random.split(key, 3)
    params = init_params(k_param)

    packed = pack_params(params)                       # hoisted out of the jitted forward
    rel = nezha_relative_positions(SEQ, HEAD_DIM)      # constant table, computed once

    input_ids = jax.random.randint(k_ids, (BATCH, SEQ), 0, VOCAB, dtype=jnp.int32)
    token_type_ids = jax.random.randint(k_type, (BATCH, SEQ), 0, TYPE_VOCAB, dtype=jnp.int32)
    attention_mask = jnp.ones((BATCH, SEQ), dtype=jnp.int32).at[:, SEQ - 2:].set(0)

    out = cls_model_forward(packed, rel, input_ids, token_type_ids, attention_mask)
    logits = jax.block_until_ready(out["pred"])
    assert logits.shape == (BATCH, NUM_LABELS)
    assert bool(jnp.all(jnp.isfinite(logits)))
    print("KERNEL_OK")
</pallas_src>

<mosaic_0001>
module attributes {stable_mosaic.version = 11 : i64} {
  func.func @_fused_kernel(%arg0: i32, %arg1: memref<16x2xi32, #tpu.memory_space<vmem>>, %arg2: memref<2x8xf32, #tpu.memory_space<vmem>>, %arg3: memref<72x32xf32, #tpu.memory_space<vmem>>, %arg4: memref<8x8x16xf32, #tpu.memory_space<vmem>>, %arg5: memref<2x32x96xf32, #tpu.memory_space<vmem>>, %arg6: memref<2x32x32xf32, #tpu.memory_space<vmem>>, %arg7: memref<2x32x64xf32, #tpu.memory_space<vmem>>, %arg8: memref<2x64x32xf32, #tpu.memory_space<vmem>>, %arg9: memref<56x128xf32, #tpu.memory_space<vmem>>, %arg10: memref<2x2xf32, #tpu.memory_space<vmem>>) attributes {dimension_semantics = [#tpu.dimension_semantics<arbitrary>], iteration_bounds = array<i64: 1>, scalar_prefetch = 0 : i64, scratch_operands = 0 : i64, tpu.core_type = #tpu.core_type<tc>, window_params = [{pipeline_mode = #tpu.pipeline_mode<synchronous>, transform_indices = @transform_0, window_bounds = array<i64: 16, 2>}, {pipeline_mode = #tpu.pipeline_mode<synchronous>, transform_indices = @transform_1, window_bounds = array<i64: 2, 8>}, {pipeline_mode = #tpu.pipeline_mode<synchronous>, transform_indices = @transform_2, window_bounds = array<i64: 72, 32>}, {pipeline_mode = #tpu.pipeline_mode<synchronous>, transform_indices = @transform_3, window_bounds = array<i64: 8, 8, 16>}, {pipeline_mode = #tpu.pipeline_mode<synchronous>, transform_indices = @transform_4, window_bounds = array<i64: 2, 32, 96>}, {pipeline_mode = #tpu.pipeline_mode<synchronous>, transform_indices = @transform_5, window_bounds = array<i64: 2, 32, 32>}, {pipeline_mode = #tpu.pipeline_mode<synchronous>, transform_indices = @transform_6, window_bounds = array<i64: 2, 32, 64>}, {pipeline_mode = #tpu.pipeline_mode<synchronous>, transform_indices = @transform_7, window_bounds = array<i64: 2, 64, 32>}, {pipeline_mode = #tpu.pipeline_mode<synchronous>, transform_indices = @transform_8, window_bounds = array<i64: 56, 128>}, {pipeline_mode = #tpu.pipeline_mode<synchronous>, transform_indices = @transform_9, window_bounds = array<i64: 2, 2>}]} {
    %c0 = arith.constant 0 : index
    %c0_0 = arith.constant 0 : index
    %0 = vector.load %arg1[%c0, %c0_0] : memref<16x2xi32, #tpu.memory_space<vmem>>, vector<16x2xi32>
    %1 = tpu.iota {dimensions = array<i32: 1>} : vector<16x72xi32>
    %2 = vector.extract_strided_slice %0 {offsets = [0, 0], sizes = [16, 1], strides = [1, 1]} : vector<16x2xi32> to vector<16x1xi32>
    %3 = vector.broadcast %2 : vector<16x1xi32> to vector<16x72xi32>
    %4 = arith.cmpi eq, %1, %3 : vector<16x72xi32>
    %5 = vector.extract_strided_slice %0 {offsets = [0, 1], sizes = [16, 1], strides = [1, 1]} : vector<16x2xi32> to vector<16x1xi32>
    %6 = vector.broadcast %5 : vector<16x1xi32> to vector<16x72xi32>
    %7 = arith.cmpi eq, %1, %6 : vector<16x72xi32>
    %8 = arith.ori %4, %7 : vector<16x72xi1>
    %9 = arith.extui %8 : vector<16x72xi1> to vector<16x72xi32>
    %10 = arith.sitofp %9 : vector<16x72xi32> to vector<16x72xf32>
    %c0_1 = arith.constant 0 : index
    %c0_2 = arith.constant 0 : index
    %11 = vector.load %arg3[%c0_1, %c0_2] : memref<72x32xf32, #tpu.memory_space<vmem>>, vector<72x32xf32>
    %cst = arith.constant dense<0.000000e+00> : vector<16x32xf32>
    %12 = tpu.matmul %10, %11, %cst {dimension_numbers = #tpu.dot_dimension_numbers<[1], [0], [0], [1], [0, 0, 1, 1], [], []>} : vector<16x72xf32>, vector<72x32xf32>, vector<16x32xf32> -> vector<16x32xf32>
    %c0_3 = arith.constant 0 : index
    %c0_4 = arith.constant 0 : index
    %13 = vector.load %arg9[%c0_3, %c0_4] : memref<56x128xf32, #tpu.memory_space<vmem>>, vector<1x32xf32>
    %c1 = arith.constant 1 : index
    %c0_5 = arith.constant 0 : index
    %14 = vector.load %arg9[%c1, %c0_5] : memref<56x128xf32, #tpu.memory_space<vmem>>, vector<1x32xf32>
    %cst_6 = arith.constant dense<0.000000e+00> : vector<16xf32>
    %15 = vector.multi_reduction <add>, %12, %cst_6 [1] : vector<16x32xf32> to vector<16xf32>
    %16 = vector.shape_cast %15 : vector<16xf32> to vector<16x1xf32>
    %cst_7 = arith.constant 3.200000e+01 : f32
    %17 = vector.broadcast %cst_7 : f32 to vector<16x1xf32>
    %18 = arith.divf %16, %17 : vector<16x1xf32>
    %19 = vector.broadcast %18 : vector<16x1xf32> to vector<16x32xf32>
    %20 = arith.subf %12, %19 : vector<16x32xf32>
    %21 = arith.mulf %20, %20 : vector<16x32xf32>
    %cst_8 = arith.constant dense<0.000000e+00> : vector<16xf32>
    %22 = vector.multi_reduction <add>, %21, %cst_8 [1] : vector<16x32xf32> to vector<16xf32>
    %23 = vector.shape_cast %22 : vector<16xf32> to vector<16x1xf32>
    %cst_9 = arith.constant 3.200000e+01 : f32
    %24 = vector.broadcast %cst_9 : f32 to vector<16x1xf32>
    %25 = arith.divf %23, %24 : vector<16x1xf32>
    %26 = vector.broadcast %18 : vector<16x1xf32> to vector<16x32xf32>
    %27 = arith.subf %12, %26 : vector<16x32xf32>
    %cst_10 = arith.constant 9.99999996E-13 : f32
    %28 = vector.broadcast %cst_10 : f32 to vector<16x1xf32>
    %29 = arith.addf %25, %28 : vector<16x1xf32>
    %30 = math.rsqrt %29 : vector<16x1xf32>
    %31 = vector.broadcast %30 : vector<16x1xf32> to vector<16x32xf32>
    %32 = arith.mulf %27, %31 : vector<16x32xf32>
    %33 = vector.broadcast %13 : vector<1x32xf32> to vector<16x32xf32>
    %34 = arith.mulf %32, %33 : vector<16x32xf32>
    %35 = vector.broadcast %14 : vector<1x32xf32> to vector<16x32xf32>
    %36 = arith.addf %34, %35 : vector<16x32xf32>
    %c0_11 = arith.constant 0 : index
    %c0_12 = arith.constant 0 : index
    %37 = vector.load %arg2[%c0_11, %c0_12] : memref<2x8xf32, #tpu.memory_space<vmem>>, vector<2x8xf32>
    %cst_13 = arith.constant 1.000000e+00 : f32
    %38 = vector.broadcast %cst_13 : f32 to vector<2x8xf32>
    %39 = arith.subf %38, %37 : vector<2x8xf32>
    %cst_14 = arith.constant -1.000000e+04 : f32
    %40 = vector.broadcast %cst_14 : f32 to vector<2x8xf32>
    %41 = arith.mulf %39, %40 : vector<2x8xf32>
    %42 = vector.extract_strided_slice %41 {offsets = [0, 0], sizes = [1, 8], strides = [1, 1]} : vector<2x8xf32> to vector<1x8xf32>
    %43 = vector.shape_cast %42 : vector<1x8xf32> to vector<1x8xf32>
    %44 = vector.broadcast %43 : vector<1x8xf32> to vector<8x8xf32>
    %45 = vector.extract_strided_slice %41 {offsets = [1, 0], sizes = [1, 8], strides = [1, 1]} : vector<2x8xf32> to vector<1x8xf32>
    %46 = vector.shape_cast %45 : vector<1x8xf32> to vector<1x8xf32>
    %47 = vector.broadcast %46 : vector<1x8xf32> to vector<8x8xf32>
    %c0_15 = arith.constant 0 : index
    %c0_16 = arith.constant 0 : index
    %c0_17 = arith.constant 0 : index
    %48 = vector.load %arg4[%c0_15, %c0_16, %c0_17] : memref<8x8x16xf32, #tpu.memory_space<vmem>>, vector<8x8x16xf32>
    %c2 = arith.constant 2 : index
    %c0_18 = arith.constant 0 : index
    %49 = vector.load %arg9[%c2, %c0_18] : memref<56x128xf32, #tpu.memory_space<vmem>>, vector<1x96xf32>
    %c3 = arith.constant 3 : index
    %c0_19 = arith.constant 0 : index
    %50 = vector.load %arg9[%c3, %c0_19] : memref<56x128xf32, #tpu.memory_space<vmem>>, vector<1x32xf32>
    %c4 = arith.constant 4 : index
    %c0_20 = arith.constant 0 : index
    %51 = vector.load %arg9[%c4, %c0_20] : memref<56x128xf32, #tpu.memory_space<vmem>>, vector<1x32xf32>
    %c5 = arith.constant 5 : index
    %c0_21 = arith.constant 0 : index
    %52 = vector.load %arg9[%c5, %c0_21] : memref<56x128xf32, #tpu.memory_space<vmem>>, vector<1x32xf32>
    %c6 = arith.constant 6 : index
    %c0_22 = arith.constant 0 : index
    %53 = vector.load %arg9[%c6, %c0_22] : memref<56x128xf32, #tpu.memory_space<vmem>>, vector<1x64xf32>
    %c7 = arith.constant 7 : index
    %c0_23 = arith.constant 0 : index
    %54 = vector.load %arg9[%c7, %c0_23] : memref<56x128xf32, #tpu.memory_space<vmem>>, vector<1x32xf32>
    %c8 = arith.constant 8 : index
    %c0_24 = arith.constant 0 : index
    %55 = vector.load %arg9[%c8, %c0_24] : memref<56x128xf32, #tpu.memory_space<vmem>>, vector<1x32xf32>
    %c9 = arith.constant 9 : index
    %c0_25 = arith.constant 0 : index
    %56 = vector.load %arg9[%c9, %c0_25] : memref<56x128xf32, #tpu.memory_space<vmem>>, vector<1x32xf32>
    %c0_26 = arith.constant 0 : index
    %c0_27 = arith.constant 0 : index
    %c0_28 = arith.constant 0 : index
    %57 = vector.load %arg5[%c0_26, %c0_27, %c0_28] : memref<2x32x96xf32, #tpu.memory_space<vmem>>, vector<1x32x96xf32>
    %58 = vector.shape_cast %57 : vector<1x32x96xf32> to vector<32x96xf32>
    %cst_29 = arith.constant dense<0.000000e+00> : vector<16x96xf32>
    %59 = tpu.matmul %36, %58, %cst_29 {dimension_numbers = #tpu.dot_dimension_numbers<[1], [0], [0], [1], [0, 0, 1, 1], [], []>} : vector<16x32xf32>, vector<32x96xf32>, vector<16x96xf32> -> vector<16x96xf32>
    %60 = vector.broadcast %49 : vector<1x96xf32> to vector<16x96xf32>
    %61 = arith.addf %59, %60 : vector<16x96xf32>
    %62 = vector.extract_strided_slice %61 {offsets = [0, 0], sizes = [8, 32], strides = [1, 1]} : vector<16x96xf32> to vector<8x32xf32>
    %63 = vector.extract_strided_slice %61 {offsets = [0, 32], sizes = [8, 32], strides = [1, 1]} : vector<16x96xf32> to vector<8x32xf32>
    %64 = vector.extract_strided_slice %61 {offsets = [0, 64], sizes = [8, 32], strides = [1, 1]} : vector<16x96xf32> to vector<8x32xf32>
    %65 = vector.extract_strided_slice %62 {offsets = [0, 0], sizes = [8, 16], strides = [1, 1]} : vector<8x32xf32> to vector<8x16xf32>
    %66 = vector.extract_strided_slice %63 {offsets = [0, 0], sizes = [8, 16], strides = [1, 1]} : vector<8x32xf32> to vector<8x16xf32>
    %67 = vector.extract_strided_slice %64 {offsets = [0, 0], sizes = [8, 16], strides = [1, 1]} : vector<8x32xf32> to vector<8x16xf32>
    "tpu.trace_start"() <{level = 10 : i32, message = "qd,kd->qk"}> : () -> ()
    %cst_30 = arith.constant dense<0.000000e+00> : vector<8x8xf32>
    %68 = tpu.matmul %65, %66, %cst_30 {dimension_numbers = #tpu.dot_dimension_numbers<[1], [1], [0], [0], [0, 0, 1, 0], [], []>} : vector<8x16xf32>, vector<8x16xf32>, vector<8x8xf32> -> vector<8x8xf32>
    "tpu.trace_stop"() : () -> ()
    %69 = vector.shape_cast %65 : vector<8x16xf32> to vector<8x1x16xf32>
    %70 = vector.broadcast %69 : vector<8x1x16xf32> to vector<8x8x16xf32>
    %71 = arith.mulf %70, %48 : vector<8x8x16xf32>
    %cst_31 = arith.constant dense<0.000000e+00> : vector<8x8xf32>
    %72 = vector.multi_reduction <add>, %71, %cst_31 [2] : vector<8x8x16xf32> to vector<8x8xf32>
    %73 = arith.addf %68, %72 : vector<8x8xf32>
    %74 = arith.addf %73, %44 : vector<8x8xf32>
    %cst_32 = arith.constant dense<0xFF800000> : vector<8xf32>
    %75 = vector.multi_reduction <maximumf>, %74, %cst_32 [1] : vector<8x8xf32> to vector<8xf32>
    %76 = vector.shape_cast %75 : vector<8xf32> to vector<8x1xf32>
    %77 = vector.broadcast %76 : vector<8x1xf32> to vector<8x8xf32>
    %78 = arith.subf %74, %77 : vector<8x8xf32>
    %79 = math.exp %78 : vector<8x8xf32>
    %cst_33 = arith.constant dense<0.000000e+00> : vector<8xf32>
    %80 = vector.multi_reduction <add>, %79, %cst_33 [1] : vector<8x8xf32> to vector<8xf32>
    %81 = vector.shape_cast %80 : vector<8xf32> to vector<8x1xf32>
    %82 = tpu.reciprocal %81 {approx = true} : vector<8x1xf32> -> vector<8x1xf32>
    %83 = vector.broadcast %82 : vector<8x1xf32> to vector<8x8xf32>
    %84 = arith.mulf %79, %83 : vector<8x8xf32>
    %cst_34 = arith.constant dense<0.000000e+00> : vector<8x16xf32>
    %85 = tpu.matmul %84, %67, %cst_34 {dimension_numbers = #tpu.dot_dimension_numbers<[1], [0], [0], [1], [0, 0, 1, 1], [], []>} : vector<8x8xf32>, vector<8x16xf32>, vector<8x16xf32> -> vector<8x16xf32>
    %86 = vector.shape_cast %84 : vector<8x8xf32> to vector<8x8x1xf32>
    %87 = vector.broadcast %86 : vector<8x8x1xf32> to vector<8x8x16xf32>
    %88 = arith.mulf %87, %48 : vector<8x8x16xf32>
    %cst_35 = arith.constant dense<0.000000e+00> : vector<8x16xf32>
    %89 = vector.multi_reduction <add>, %88, %cst_35 [1] : vector<8x8x16xf32> to vector<8x16xf32>
    %90 = arith.addf %85, %89 : vector<8x16xf32>
    %91 = vector.extract_strided_slice %62 {offsets = [0, 16], sizes = [8, 16], strides = [1, 1]} : vector<8x32xf32> to vector<8x16xf32>
    %92 = vector.extract_strided_slice %63 {offsets = [0, 16], sizes = [8, 16], strides = [1, 1]} : vector<8x32xf32> to vector<8x16xf32>
    %93 = vector.extract_strided_slice %64 {offsets = [0, 16], sizes = [8, 16], strides = [1, 1]} : vector<8x32xf32> to vector<8x16xf32>
    "tpu.trace_start"() <{level = 10 : i32, message = "qd,kd->qk"}> : () -> ()
    %cst_36 = arith.constant dense<0.000000e+00> : vector<8x8xf32>
    %94 = tpu.matmul %91, %92, %cst_36 {dimension_numbers = #tpu.dot_dimension_numbers<[1], [1], [0], [0], [0, 0, 1, 0], [], []>} : vector<8x16xf32>, vector<8x16xf32>, vector<8x8xf32> -> vector<8x8xf32>
    "tpu.trace_stop"() : () -> ()
    %95 = vector.shape_cast %91 : vector<8x16xf32> to vector<8x1x16xf32>
    %96 = vector.broadcast %95 : vector<8x1x16xf32> to vector<8x8x16xf32>
    %97 = arith.mulf %96, %48 : vector<8x8x16xf32>
    %cst_37 = arith.constant dense<0.000000e+00> : vector<8x8xf32>
    %98 = vector.multi_reduction <add>, %97, %cst_37 [2] : vector<8x8x16xf32> to vector<8x8xf32>
    %99 = arith.addf %94, %98 : vector<8x8xf32>
    %100 = arith.addf %99, %44 : vector<8x8xf32>
    %cst_38 = arith.constant dense<0xFF800000> : vector<8xf32>
    %101 = vector.multi_reduction <maximumf>, %100, %cst_38 [1] : vector<8x8xf32> to vector<8xf32>
    %102 = vector.shape_cast %101 : vector<8xf32> to vector<8x1xf32>
    %103 = vector.broadcast %102 : vector<8x1xf32> to vector<8x8xf32>
    %104 = arith.subf %100, %103 : vector<8x8xf32>
    %105 = math.exp %104 : vector<8x8xf32>
    %cst_39 = arith.constant dense<0.000000e+00> : vector<8xf32>
    %106 = vector.multi_reduction <add>, %105, %cst_39 [1] : vector<8x8xf32> to vector<8xf32>
    %107 = vector.shape_cast %106 : vector<8xf32> to vector<8x1xf32>
    %108 = tpu.reciprocal %107 {approx = true} : vector<8x1xf32> -> vector<8x1xf32>
    %109 = vector.broadcast %108 : vector<8x1xf32> to vector<8x8xf32>
    %110 = arith.mulf %105, %109 : vector<8x8xf32>
    %cst_40 = arith.constant dense<0.000000e+00> : vector<8x16xf32>
    %111 = tpu.matmul %110, %93, %cst_40 {dimension_numbers = #tpu.dot_dimension_numbers<[1], [0], [0], [1], [0, 0, 1, 1], [], []>} : vector<8x8xf32>, vector<8x16xf32>, vector<8x16xf32> -> vector<8x16xf32>
    %112 = vector.shape_cast %110 : vector<8x8xf32> to vector<8x8x1xf32>
    %113 = vector.broadcast %112 : vector<8x8x1xf32> to vector<8x8x16xf32>
    %114 = arith.mulf %113, %48 : vector<8x8x16xf32>
    %cst_41 = arith.constant dense<0.000000e+00> : vector<8x16xf32>
    %115 = vector.multi_reduction <add>, %114, %cst_41 [1] : vector<8x8x16xf32> to vector<8x16xf32>
    %116 = arith.addf %111, %115 : vector<8x16xf32>
    %117 = tpu.concatenate %90, %116 in 1 : vector<8x16xf32>, vector<8x16xf32> -> vector<8x32xf32>
    %118 = vector.extract_strided_slice %61 {offsets = [8, 0], sizes = [8, 32], strides = [1, 1]} : vector<16x96xf32> to vector<8x32xf32>
    %119 = vector.extract_strided_slice %61 {offsets = [8, 32], sizes = [8, 32], strides = [1, 1]} : vector<16x96xf32> to vector<8x32xf32>
    %120 = vector.extract_strided_slice %61 {offsets = [8, 64], sizes = [8, 32], strides = [1, 1]} : vector<16x96xf32> to vector<8x32xf32>
    %121 = vector.extract_strided_slice %118 {offsets = [0, 0], sizes = [8, 16], strides = [1, 1]} : vector<8x32xf32> to vector<8x16xf32>
    %122 = vector.extract_strided_slice %119 {offsets = [0, 0], sizes = [8, 16], strides = [1, 1]} : vector<8x32xf32> to vector<8x16xf32>
    %123 = vector.extract_strided_slice %120 {offsets = [0, 0], sizes = [8, 16], strides = [1, 1]} : vector<8x32xf32> to vector<8x16xf32>
    "tpu.trace_start"() <{level = 10 : i32, message = "qd,kd->qk"}> : () -> ()
    %cst_42 = arith.constant dense<0.000000e+00> : vector<8x8xf32>
    %124 = tpu.matmul %121, %122, %cst_42 {dimension_numbers = #tpu.dot_dimension_numbers<[1], [1], [0], [0], [0, 0, 1, 0], [], []>} : vector<8x16xf32>, vector<8x16xf32>, vector<8x8xf32> -> vector<8x8xf32>
    "tpu.trace_stop"() : () -> ()
    %125 = vector.shape_cast %121 : vector<8x16xf32> to vector<8x1x16xf32>
    %126 = vector.broadcast %125 : vector<8x1x16xf32> to vector<8x8x16xf32>
    %127 = arith.mulf %126, %48 : vector<8x8x16xf32>
    %cst_43 = arith.constant dense<0.000000e+00> : vector<8x8xf32>
    %128 = vector.multi_reduction <add>, %127, %cst_43 [2] : vector<8x8x16xf32> to vector<8x8xf32>
    %129 = arith.addf %124, %128 : vector<8x8xf32>
    %130 = arith.addf %129, %47 : vector<8x8xf32>
    %cst_44 = arith.constant dense<0xFF800000> : vector<8xf32>
    %131 = vector.multi_reduction <maximumf>, %130, %cst_44 [1] : vector<8x8xf32> to vector<8xf32>
    %132 = vector.shape_cast %131 : vector<8xf32> to vector<8x1xf32>
    %133 = vector.broadcast %132 : vector<8x1xf32> to vector<8x8xf32>
    %134 = arith.subf %130, %133 : vector<8x8xf32>
    %135 = math.exp %134 : vector<8x8xf32>
    %cst_45 = arith.constant dense<0.000000e+00> : vector<8xf32>
    %136 = vector.multi_reduction <add>, %135, %cst_45 [1] : vector<8x8xf32> to vector<8xf32>
    %137 = vector.shape_cast %136 : vector<8xf32> to vector<8x1xf32>
    %138 = tpu.reciprocal %137 {approx = true} : vector<8x1xf32> -> vector<8x1xf32>
    %139 = vector.broadcast %138 : vector<8x1xf32> to vector<8x8xf32>
    %140 = arith.mulf %135, %139 : vector<8x8xf32>
    %cst_46 = arith.constant dense<0.000000e+00> : vector<8x16xf32>
    %141 = tpu.matmul %140, %123, %cst_46 {dimension_numbers = #tpu.dot_dimension_numbers<[1], [0], [0], [1], [0, 0, 1, 1], [], []>} : vector<8x8xf32>, vector<8x16xf32>, vector<8x16xf32> -> vector<8x16xf32>
    %142 = vector.shape_cast %140 : vector<8x8xf32> to vector<8x8x1xf32>
    %143 = vector.broadcast %142 : vector<8x8x1xf32> to vector<8x8x16xf32>
    %144 = arith.mulf %143, %48 : vector<8x8x16xf32>
    %cst_47 = arith.constant dense<0.000000e+00> : vector<8x16xf32>
    %145 = vector.multi_reduction <add>, %144, %cst_47 [1] : vector<8x8x16xf32> to vector<8x16xf32>
    %146 = arith.addf %141, %145 : vector<8x16xf32>
    %147 = vector.extract_strided_slice %118 {offsets = [0, 16], sizes = [8, 16], strides = [1, 1]} : vector<8x32xf32> to vector<8x16xf32>
    %148 = vector.extract_strided_slice %119 {offsets = [0, 16], sizes = [8, 16], strides = [1, 1]} : vector<8x32xf32> to vector<8x16xf32>
    %149 = vector.extract_strided_slice %120 {offsets = [0, 16], sizes = [8, 16], strides = [1, 1]} : vector<8x32xf32> to vector<8x16xf32>
    "tpu.trace_start"() <{level = 10 : i32, message = "qd,kd->qk"}> : () -> ()
    %cst_48 = arith.constant dense<0.000000e+00> : vector<8x8xf32>
    %150 = tpu.matmul %147, %148, %cst_48 {dimension_numbers = #tpu.dot_dimension_numbers<[1], [1], [0], [0], [0, 0, 1, 0], [], []>} : vector<8x16xf32>, vector<8x16xf32>, vector<8x8xf32> -> vector<8x8xf32>
    "tpu.trace_stop"() : () -> ()
    %151 = vector.shape_cast %147 : vector<8x16xf32> to vector<8x1x16xf32>
    %152 = vector.broadcast %151 : vector<8x1x16xf32> to vector<8x8x16xf32>
    %153 = arith.mulf %152, %48 : vector<8x8x16xf32>
    %cst_49 = arith.constant dense<0.000000e+00> : vector<8x8xf32>
    %154 = vector.multi_reduction <add>, %153, %cst_49 [2] : vector<8x8x16xf32> to vector<8x8xf32>
    %155 = arith.addf %150, %154 : vector<8x8xf32>
    %156 = arith.addf %155, %47 : vector<8x8xf32>
    %cst_50 = arith.constant dense<0xFF800000> : vector<8xf32>
    %157 = vector.multi_reduction <maximumf>, %156, %cst_50 [1] : vector<8x8xf32> to vector<8xf32>
    %158 = vector.shape_cast %157 : vector<8xf32> to vector<8x1xf32>
    %159 = vector.broadcast %158 : vector<8x1xf32> to vector<8x8xf32>
    %160 = arith.subf %156, %159 : vector<8x8xf32>
    %161 = math.exp %160 : vector<8x8xf32>
    %cst_51 = arith.constant dense<0.000000e+00> : vector<8xf32>
    %162 = vector.multi_reduction <add>, %161, %cst_51 [1] : vector<8x8xf32> to vector<8xf32>
    %163 = vector.shape_cast %162 : vector<8xf32> to vector<8x1xf32>
    %164 = tpu.reciprocal %163 {approx = true} : vector<8x1xf32> -> vector<8x1xf32>
    %165 = vector.broadcast %164 : vector<8x1xf32> to vector<8x8xf32>
    %166 = arith.mulf %161, %165 : vector<8x8xf32>
    %cst_52 = arith.constant dense<0.000000e+00> : vector<8x16xf32>
    %167 = tpu.matmul %166, %149, %cst_52 {dimension_numbers = #tpu.dot_dimension_numbers<[1], [0], [0], [1], [0, 0, 1, 1], [], []>} : vector<8x8xf32>, vector<8x16xf32>, vector<8x16xf32> -> vector<8x16xf32>
    %168 = vector.shape_cast %166 : vector<8x8xf32> to vector<8x8x1xf32>
    %169 = vector.broadcast %168 : vector<8x8x1xf32> to vector<8x8x16xf32>
    %170 = arith.mulf %169, %48 : vector<8x8x16xf32>
    %cst_53 = arith.constant dense<0.000000e+00> : vector<8x16xf32>
    %171 = vector.multi_reduction <add>, %170, %cst_53 [1] : vector<8x8x16xf32> to vector<8x16xf32>
    %172 = arith.addf %167, %171 : vector<8x16xf32>
    %173 = tpu.concatenate %146, %172 in 1 : vector<8x16xf32>, vector<8x16xf32> -> vector<8x32xf32>
    %174 = tpu.concatenate %117, %173 in 0 : vector<8x32xf32>, vector<8x32xf32> -> vector<16x32xf32>
    %c0_54 = arith.constant 0 : index
    %c0_55 = arith.constant 0 : index
    %c0_56 = arith.constant 0 : index
    %175 = vector.load %arg6[%c0_54, %c0_55, %c0_56] : memref<2x32x32xf32, #tpu.memory_space<vmem>>, vector<1x32x32xf32>
    %176 = vector.shape_cast %175 : vector<1x32x32xf32> to vector<32x32xf32>
    %cst_57 = arith.constant dense<0.000000e+00> : vector<16x32xf32>
    %177 = tpu.matmul %174, %176, %cst_57 {dimension_numbers = #tpu.dot_dimension_numbers<[1], [0], [0], [1], [0, 0, 1, 1], [], []>} : vector<16x32xf32>, vector<32x32xf32>, vector<16x32xf32> -> vector<16x32xf32>
    %178 = vector.broadcast %50 : vector<1x32xf32> to vector<16x32xf32>
    %179 = arith.addf %177, %178 : vector<16x32xf32>
    %180 = arith.addf %179, %36 : vector<16x32xf32>
    %cst_58 = arith.constant dense<0.000000e+00> : vector<16xf32>
    %181 = vector.multi_reduction <add>, %180, %cst_58 [1] : vector<16x32xf32> to vector<16xf32>
    %182 = vector.shape_cast %181 : vector<16xf32> to vector<16x1xf32>
    %cst_59 = arith.constant 3.200000e+01 : f32
    %183 = vector.broadcast %cst_59 : f32 to vector<16x1xf32>
    %184 = arith.divf %182, %183 : vector<16x1xf32>
    %185 = vector.broadcast %184 : vector<16x1xf32> to vector<16x32xf32>
    %186 = arith.subf %180, %185 : vector<16x32xf32>
    %187 = arith.mulf %186, %186 : vector<16x32xf32>
    %cst_60 = arith.constant dense<0.000000e+00> : vector<16xf32>
    %188 = vector.multi_reduction <add>, %187, %cst_60 [1] : vector<16x32xf32> to vector<16xf32>
    %189 = vector.shape_cast %188 : vector<16xf32> to vector<16x1xf32>
    %cst_61 = arith.constant 3.200000e+01 : f32
    %190 = vector.broadcast %cst_61 : f32 to vector<16x1xf32>
    %191 = arith.divf %189, %190 : vector<16x1xf32>
    %192 = vector.broadcast %184 : vector<16x1xf32> to vector<16x32xf32>
    %193 = arith.subf %180, %192 : vector<16x32xf32>
    %cst_62 = arith.constant 9.99999996E-13 : f32
    %194 = vector.broadcast %cst_62 : f32 to vector<16x1xf32>
    %195 = arith.addf %191, %194 : vector<16x1xf32>
    %196 = math.rsqrt %195 : vector<16x1xf32>
    %197 = vector.broadcast %196 : vector<16x1xf32> to vector<16x32xf32>
    %198 = arith.mulf %193, %197 : vector<16x32xf32>
    %199 = vector.broadcast %51 : vector<1x32xf32> to vector<16x32xf32>
    %200 = arith.mulf %198, %199 : vector<16x32xf32>
    %201 = vector.broadcast %52 : vector<1x32xf32> to vector<16x32xf32>
    %202 = arith.addf %200, %201 : vector<16x32xf32>
    %c0_63 = arith.constant 0 : index
    %c0_64 = arith.constant 0 : index
    %c0_65 = arith.constant 0 : index
    %203 = vector.load %arg7[%c0_63, %c0_64, %c0_65] : memref<2x32x64xf32, #tpu.memory_space<vmem>>, vector<1x32x64xf32>
    %204 = vector.shape_cast %203 : vector<1x32x64xf32> to vector<32x64xf32>
    %cst_66 = arith.constant dense<0.000000e+00> : vector<16x64xf32>
    %205 = tpu.matmul %202, %204, %cst_66 {dimension_numbers = #tpu.dot_dimension_numbers<[1], [0], [0], [1], [0, 0, 1, 1], [], []>} : vector<16x32xf32>, vector<32x64xf32>, vector<16x64xf32> -> vector<16x64xf32>
    %206 = vector.broadcast %53 : vector<1x64xf32> to vector<16x64xf32>
    %207 = arith.addf %205, %206 : vector<16x64xf32>
    %cst_67 = arith.constant 5.000000e-01 : f32
    %208 = vector.broadcast %cst_67 : f32 to vector<16x64xf32>
    %209 = arith.mulf %208, %207 : vector<16x64xf32>
    %cst_68 = arith.constant 4.471500e-02 : f32
    %210 = vector.broadcast %cst_68 : f32 to vector<16x64xf32>
    %211 = arith.mulf %210, %207 : vector<16x64xf32>
    %212 = arith.mulf %211, %207 : vector<16x64xf32>
    %213 = arith.mulf %212, %207 : vector<16x64xf32>
    %214 = arith.addf %207, %213 : vector<16x64xf32>
    %cst_69 = arith.constant 0.797884583 : f32
    %215 = vector.broadcast %cst_69 : f32 to vector<16x64xf32>
    %216 = arith.mulf %215, %214 : vector<16x64xf32>
    %217 = math.tanh %216 : vector<16x64xf32>
    %cst_70 = arith.constant 1.000000e+00 : f32
    %218 = vector.broadcast %cst_70 : f32 to vector<16x64xf32>
    %219 = arith.addf %218, %217 : vector<16x64xf32>
    %220 = arith.mulf %209, %219 : vector<16x64xf32>
    %c0_71 = arith.constant 0 : index
    %c0_72 = arith.constant 0 : index
    %c0_73 = arith.constant 0 : index
    %221 = vector.load %arg8[%c0_71, %c0_72, %c0_73] : memref<2x64x32xf32, #tpu.memory_space<vmem>>, vector<1x64x32xf32>
    %222 = vector.shape_cast %221 : vector<1x64x32xf32> to vector<64x32xf32>
    %cst_74 = arith.constant dense<0.000000e+00> : vector<16x32xf32>
    %223 = tpu.matmul %220, %222, %cst_74 {dimension_numbers = #tpu.dot_dimension_numbers<[1], [0], [0], [1], [0, 0, 1, 1], [], []>} : vector<16x64xf32>, vector<64x32xf32>, vector<16x32xf32> -> vector<16x32xf32>
    %224 = vector.broadcast %54 : vector<1x32xf32> to vector<16x32xf32>
    %225 = arith.addf %223, %224 : vector<16x32xf32>
    %226 = arith.addf %225, %202 : vector<16x32xf32>
    %cst_75 = arith.constant dense<0.000000e+00> : vector<16xf32>
    %227 = vector.multi_reduction <add>, %226, %cst_75 [1] : vector<16x32xf32> to vector<16xf32>
    %228 = vector.shape_cast %227 : vector<16xf32> to vector<16x1xf32>
    %cst_76 = arith.constant 3.200000e+01 : f32
    %229 = vector.broadcast %cst_76 : f32 to vector<16x1xf32>
    %230 = arith.divf %228, %229 : vector<16x1xf32>
    %231 = vector.broadcast %230 : vector<16x1xf32> to vector<16x32xf32>
    %232 = arith.subf %226, %231 : vector<16x32xf32>
    %233 = arith.mulf %232, %232 : vector<16x32xf32>
    %cst_77 = arith.constant dense<0.000000e+00> : vector<16xf32>
    %234 = vector.multi_reduction <add>, %233, %cst_77 [1] : vector<16x32xf32> to vector<16xf32>
    %235 = vector.shape_cast %234 : vector<16xf32> to vector<16x1xf32>
    %cst_78 = arith.constant 3.200000e+01 : f32
    %236 = vector.broadcast %cst_78 : f32 to vector<16x1xf32>
    %237 = arith.divf %235, %236 : vector<16x1xf32>
    %238 = vector.broadcast %230 : vector<16x1xf32> to vector<16x32xf32>
    %239 = arith.subf %226, %238 : vector<16x32xf32>
    %cst_79 = arith.constant 9.99999996E-13 : f32
    %240 = vector.broadcast %cst_79 : f32 to vector<16x1xf32>
    %241 = arith.addf %237, %240 : vector<16x1xf32>
    %242 = math.rsqrt %241 : vector<16x1xf32>
    %243 = vector.broadcast %242 : vector<16x1xf32> to vector<16x32xf32>
    %244 = arith.mulf %239, %243 : vector<16x32xf32>
    %245 = vector.broadcast %55 : vector<1x32xf32> to vector<16x32xf32>
    %246 = arith.mulf %244, %245 : vector<16x32xf32>
    %247 = vector.broadcast %56 : vector<1x32xf32> to vector<16x32xf32>
    %248 = arith.addf %246, %247 : vector<16x32xf32>
    %c10 = arith.constant 10 : index
    %c0_80 = arith.constant 0 : index
    %249 = vector.load %arg9[%c10, %c0_80] : memref<56x128xf32, #tpu.memory_space<vmem>>, vector<1x96xf32>
    %c11 = arith.constant 11 : index
    %c0_81 = arith.constant 0 : index
    %250 = vector.load %arg9[%c11, %c0_81] : memref<56x128xf32, #tpu.memory_space<vmem>>, vector<1x32xf32>
    %c12 = arith.constant 12 : index
    %c0_82 = arith.constant 0 : index
    %251 = vector.load %arg9[%c12, %c0_82] : memref<56x128xf32, #tpu.memory_space<vmem>>, vector<1x32xf32>
    %c13 = arith.constant 13 : index
    %c0_83 = arith.constant 0 : index
    %252 = vector.load %arg9[%c13, %c0_83] : memref<56x128xf32, #tpu.memory_space<vmem>>, vector<1x32xf32>
    %c14 = arith.constant 14 : index
    %c0_84 = arith.constant 0 : index
    %253 = vector.load %arg9[%c14, %c0_84] : memref<56x128xf32, #tpu.memory_space<vmem>>, vector<1x64xf32>
    %c15 = arith.constant 15 : index
    %c0_85 = arith.constant 0 : index
    %254 = vector.load %arg9[%c15, %c0_85] : memref<56x128xf32, #tpu.memory_space<vmem>>, vector<1x32xf32>
    %c16 = arith.constant 16 : index
    %c0_86 = arith.constant 0 : index
    %255 = vector.load %arg9[%c16, %c0_86] : memref<56x128xf32, #tpu.memory_space<vmem>>, vector<1x32xf32>
    %c17 = arith.constant 17 : index
    %c0_87 = arith.constant 0 : index
    %256 = vector.load %arg9[%c17, %c0_87] : memref<56x128xf32, #tpu.memory_space<vmem>>, vector<1x32xf32>
    %c1_88 = arith.constant 1 : index
    %c0_89 = arith.constant 0 : index
    %c0_90 = arith.constant 0 : index
    %257 = vector.load %arg5[%c1_88, %c0_89, %c0_90] : memref<2x32x96xf32, #tpu.memory_space<vmem>>, vector<1x32x96xf32>
    %258 = vector.shape_cast %257 : vector<1x32x96xf32> to vector<32x96xf32>
    %cst_91 = arith.constant dense<0.000000e+00> : vector<16x96xf32>
    %259 = tpu.matmul %248, %258, %cst_91 {dimension_numbers = #tpu.dot_dimension_numbers<[1], [0], [0], [1], [0, 0, 1, 1], [], []>} : vector<16x32xf32>, vector<32x96xf32>, vector<16x96xf32> -> vector<16x96xf32>
    %260 = vector.broadcast %249 : vector<1x96xf32> to vector<16x96xf32>
    %261 = arith.addf %259, %260 : vector<16x96xf32>
    %262 = vector.extract_strided_slice %261 {offsets = [0, 0], sizes = [8, 32], strides = [1, 1]} : vector<16x96xf32> to vector<8x32xf32>
    %263 = vector.extract_strided_slice %261 {offsets = [0, 32], sizes = [8, 32], strides = [1, 1]} : vector<16x96xf32> to vector<8x32xf32>
    %264 = vector.extract_strided_slice %261 {offsets = [0, 64], sizes = [8, 32], strides = [1, 1]} : vector<16x96xf32> to vector<8x32xf32>
    %265 = vector.extract_strided_slice %262 {offsets = [0, 0], sizes = [8, 16], strides = [1, 1]} : vector<8x32xf32> to vector<8x16xf32>
    %266 = vector.extract_strided_slice %263 {offsets = [0, 0], sizes = [8, 16], strides = [1, 1]} : vector<8x32xf32> to vector<8x16xf32>
    %267 = vector.extract_strided_slice %264 {offsets = [0, 0], sizes = [8, 16], strides = [1, 1]} : vector<8x32xf32> to vector<8x16xf32>
    "tpu.trace_start"() <{level = 10 : i32, message = "qd,kd->qk"}> : () -> ()
    %cst_92 = arith.constant dense<0.000000e+00> : vector<8x8xf32>
    %268 = tpu.matmul %265, %266, %cst_92 {dimension_numbers = #tpu.dot_dimension_numbers<[1], [1], [0], [0], [0, 0, 1, 0], [], []>} : vector<8x16xf32>, vector<8x16xf32>, vector<8x8xf32> -> vector<8x8xf32>
    "tpu.trace_stop"() : () -> ()
    %269 = vector.shape_cast %265 : vector<8x16xf32> to vector<8x1x16xf32>
    %270 = vector.broadcast %269 : vector<8x1x16xf32> to vector<8x8x16xf32>
    %271 = arith.mulf %270, %48 : vector<8x8x16xf32>
    %cst_93 = arith.constant dense<0.000000e+00> : vector<8x8xf32>
    %272 = vector.multi_reduction <add>, %271, %cst_93 [2] : vector<8x8x16xf32> to vector<8x8xf32>
    %273 = arith.addf %268, %272 : vector<8x8xf32>
    %274 = arith.addf %273, %44 : vector<8x8xf32>
    %cst_94 = arith.constant dense<0xFF800000> : vector<8xf32>
    %275 = vector.multi_reduction <maximumf>, %274, %cst_94 [1] : vector<8x8xf32> to vector<8xf32>
    %276 = vector.shape_cast %275 : vector<8xf32> to vector<8x1xf32>
    %277 = vector.broadcast %276 : vector<8x1xf32> to vector<8x8xf32>
    %278 = arith.subf %274, %277 : vector<8x8xf32>
    %279 = math.exp %278 : vector<8x8xf32>
    %cst_95 = arith.constant dense<0.000000e+00> : vector<8xf32>
    %280 = vector.multi_reduction <add>, %279, %cst_95 [1] : vector<8x8xf32> to vector<8xf32>
    %281 = vector.shape_cast %280 : vector<8xf32> to vector<8x1xf32>
    %282 = tpu.reciprocal %281 {approx = true} : vector<8x1xf32> -> vector<8x1xf32>
    %283 = vector.broadcast %282 : vector<8x1xf32> to vector<8x8xf32>
    %284 = arith.mulf %279, %283 : vector<8x8xf32>
    %cst_96 = arith.constant dense<0.000000e+00> : vector<8x16xf32>
    %285 = tpu.matmul %284, %267, %cst_96 {dimension_numbers = #tpu.dot_dimension_numbers<[1], [0], [0], [1], [0, 0, 1, 1], [], []>} : vector<8x8xf32>, vector<8x16xf32>, vector<8x16xf32> -> vector<8x16xf32>
    %286 = vector.shape_cast %284 : vector<8x8xf32> to vector<8x8x1xf32>
    %287 = vector.broadcast %286 : vector<8x8x1xf32> to vector<8x8x16xf32>
    %288 = arith.mulf %287, %48 : vector<8x8x16xf32>
    %cst_97 = arith.constant dense<0.000000e+00> : vector<8x16xf32>
    %289 = vector.multi_reduction <add>, %288, %cst_97 [1] : vector<8x8x16xf32> to vector<8x16xf32>
    %290 = arith.addf %285, %289 : vector<8x16xf32>
    %291 = vector.extract_strided_slice %262 {offsets = [0, 16], sizes = [8, 16], strides = [1, 1]} : vector<8x32xf32> to vector<8x16xf32>
    %292 = vector.extract_strided_slice %263 {offsets = [0, 16], sizes = [8, 16], strides = [1, 1]} : vector<8x32xf32> to vector<8x16xf32>
    %293 = vector.extract_strided_slice %264 {offsets = [0, 16], sizes = [8, 16], strides = [1, 1]} : vector<8x32xf32> to vector<8x16xf32>
    "tpu.trace_start"() <{level = 10 : i32, message = "qd,kd->qk"}> : () -> ()
    %cst_98 = arith.constant dense<0.000000e+00> : vector<8x8xf32>
    %294 = tpu.matmul %291, %292, %cst_98 {dimension_numbers = #tpu.dot_dimension_numbers<[1], [1], [0], [0], [0, 0, 1, 0], [], []>} : vector<8x16xf32>, vector<8x16xf32>, vector<8x8xf32> -> vector<8x8xf32>
    "tpu.trace_stop"() : () -> ()
    %295 = vector.shape_cast %291 : vector<8x16xf32> to vector<8x1x16xf32>
    %296 = vector.broadcast %295 : vector<8x1x16xf32> to vector<8x8x16xf32>
    %297 = arith.mulf %296, %48 : vector<8x8x16xf32>
    %cst_99 = arith.constant dense<0.000000e+00> : vector<8x8xf32>
    %298 = vector.multi_reduction <add>, %297, %cst_99 [2] : vector<8x8x16xf32> to vector<8x8xf32>
    %299 = arith.addf %294, %298 : vector<8x8xf32>
    %300 = arith.addf %299, %44 : vector<8x8xf32>
    %cst_100 = arith.constant dense<0xFF800000> : vector<8xf32>
    %301 = vector.multi_reduction <maximumf>, %300, %cst_100 [1] : vector<8x8xf32> to vector<8xf32>
    %302 = vector.shape_cast %301 : vector<8xf32> to vector<8x1xf32>
    %303 = vector.broadcast %302 : vector<8x1xf32> to vector<8x8xf32>
    %304 = arith.subf %300, %303 : vector<8x8xf32>
    %305 = math.exp %304 : vector<8x8xf32>
    %cst_101 = arith.constant dense<0.000000e+00> : vector<8xf32>
    %306 = vector.multi_reduction <add>, %305, %cst_101 [1] : vector<8x8xf32> to vector<8xf32>
    %307 = vector.shape_cast %306 : vector<8xf32> to vector<8x1xf32>
    %308 = tpu.reciprocal %307 {approx = true} : vector<8x1xf32> -> vector<8x1xf32>
    %309 = vector.broadcast %308 : vector<8x1xf32> to vector<8x8xf32>
    %310 = arith.mulf %305, %309 : vector<8x8xf32>
    %cst_102 = arith.constant dense<0.000000e+00> : vector<8x16xf32>
    %311 = tpu.matmul %310, %293, %cst_102 {dimension_numbers = #tpu.dot_dimension_numbers<[1], [0], [0], [1], [0, 0, 1, 1], [], []>} : vector<8x8xf32>, vector<8x16xf32>, vector<8x16xf32> -> vector<8x16xf32>
    %312 = vector.shape_cast %310 : vector<8x8xf32> to vector<8x8x1xf32>
    %313 = vector.broadcast %312 : vector<8x8x1xf32> to vector<8x8x16xf32>
    %314 = arith.mulf %313, %48 : vector<8x8x16xf32>
    %cst_103 = arith.constant dense<0.000000e+00> : vector<8x16xf32>
    %315 = vector.multi_reduction <add>, %314, %cst_103 [1] : vector<8x8x16xf32> to vector<8x16xf32>
    %316 = arith.addf %311, %315 : vector<8x16xf32>
    %317 = tpu.concatenate %290, %316 in 1 : vector<8x16xf32>, vector<8x16xf32> -> vector<8x32xf32>
    %318 = vector.extract_strided_slice %261 {offsets = [8, 0], sizes = [8, 32], strides = [1, 1]} : vector<16x96xf32> to vector<8x32xf32>
    %319 = vector.extract_strided_slice %261 {offsets = [8, 32], sizes = [8, 32], strides = [1, 1]} : vector<16x96xf32> to vector<8x32xf32>
    %320 = vector.extract_strided_slice %261 {offsets = [8, 64], sizes = [8, 32], strides = [1, 1]} : vector<16x96xf32> to vector<8x32xf32>
    %321 = vector.extract_strided_slice %318 {offsets = [0, 0], sizes = [8, 16], strides = [1, 1]} : vector<8x32xf32> to vector<8x16xf32>
    %322 = vector.extract_strided_slice %319 {offsets = [0, 0], sizes = [8, 16], strides = [1, 1]} : vector<8x32xf32> to vector<8x16xf32>
    %323 = vector.extract_strided_slice %320 {offsets = [0, 0], sizes = [8, 16], strides = [1, 1]} : vector<8x32xf32> to vector<8x16xf32>
    "tpu.trace_start"() <{level = 10 : i32, message = "qd,kd->qk"}> : () -> ()
    %cst_104 = arith.constant dense<0.000000e+00> : vector<8x8xf32>
    %324 = tpu.matmul %321, %322, %cst_104 {dimension_numbers = #tpu.dot_dimension_numbers<[1], [1], [0], [0], [0, 0, 1, 0], [], []>} : vector<8x16xf32>, vector<8x16xf32>, vector<8x8xf32> -> vector<8x8xf32>
    "tpu.trace_stop"() : () -> ()
    %325 = vector.shape_cast %321 : vector<8x16xf32> to vector<8x1x16xf32>
    %326 = vector.broadcast %325 : vector<8x1x16xf32> to vector<8x8x16xf32>
    %327 = arith.mulf %326, %48 : vector<8x8x16xf32>
    %cst_105 = arith.constant dense<0.000000e+00> : vector<8x8xf32>
    %328 = vector.multi_reduction <add>, %327, %cst_105 [2] : vector<8x8x16xf32> to vector<8x8xf32>
    %329 = arith.addf %324, %328 : vector<8x8xf32>
    %330 = arith.addf %329, %47 : vector<8x8xf32>
    %cst_106 = arith.constant dense<0xFF800000> : vector<8xf32>
    %331 = vector.multi_reduction <maximumf>, %330, %cst_106 [1] : vector<8x8xf32> to vector<8xf32>
    %332 = vector.shape_cast %331 : vector<8xf32> to vector<8x1xf32>
    %333 = vector.broadcast %332 : vector<8x1xf32> to vector<8x8xf32>
    %334 = arith.subf %330, %333 : vector<8x8xf32>
    %335 = math.exp %334 : vector<8x8xf32>
    %cst_107 = arith.constant dense<0.000000e+00> : vector<8xf32>
    %336 = vector.multi_reduction <add>, %335, %cst_107 [1] : vector<8x8xf32> to vector<8xf32>
    %337 = vector.shape_cast %336 : vector<8xf32> to vector<8x1xf32>
    %338 = tpu.reciprocal %337 {approx = true} : vector<8x1xf32> -> vector<8x1xf32>
    %339 = vector.broadcast %338 : vector<8x1xf32> to vector<8x8xf32>
    %340 = arith.mulf %335, %339 : vector<8x8xf32>
    %cst_108 = arith.constant dense<0.000000e+00> : vector<8x16xf32>
    %341 = tpu.matmul %340, %323, %cst_108 {dimension_numbers = #tpu.dot_dimension_numbers<[1], [0], [0], [1], [0, 0, 1, 1], [], []>} : vector<8x8xf32>, vector<8x16xf32>, vector<8x16xf32> -> vector<8x16xf32>
    %342 = vector.shape_cast %340 : vector<8x8xf32> to vector<8x8x1xf32>
    %343 = vector.broadcast %342 : vector<8x8x1xf32> to vector<8x8x16xf32>
    %344 = arith.mulf %343, %48 : vector<8x8x16xf32>
    %cst_109 = arith.constant dense<0.000000e+00> : vector<8x16xf32>
    %345 = vector.multi_reduction <add>, %344, %cst_109 [1] : vector<8x8x16xf32> to vector<8x16xf32>
    %346 = arith.addf %341, %345 : vector<8x16xf32>
    %347 = vector.extract_strided_slice %318 {offsets = [0, 16], sizes = [8, 16], strides = [1, 1]} : vector<8x32xf32> to vector<8x16xf32>
    %348 = vector.extract_strided_slice %319 {offsets = [0, 16], sizes = [8, 16], strides = [1, 1]} : vector<8x32xf32> to vector<8x16xf32>
    %349 = vector.extract_strided_slice %320 {offsets = [0, 16], sizes = [8, 16], strides = [1, 1]} : vector<8x32xf32> to vector<8x16xf32>
    "tpu.trace_start"() <{level = 10 : i32, message = "qd,kd->qk"}> : () -> ()
    %cst_110 = arith.constant dense<0.000000e+00> : vector<8x8xf32>
    %350 = tpu.matmul %347, %348, %cst_110 {dimension_numbers = #tpu.dot_dimension_numbers<[1], [1], [0], [0], [0, 0, 1, 0], [], []>} : vector<8x16xf32>, vector<8x16xf32>, vector<8x8xf32> -> vector<8x8xf32>
    "tpu.trace_stop"() : () -> ()
    %351 = vector.shape_cast %347 : vector<8x16xf32> to vector<8x1x16xf32>
    %352 = vector.broadcast %351 : vector<8x1x16xf32> to vector<8x8x16xf32>
    %353 = arith.mulf %352, %48 : vector<8x8x16xf32>
    %cst_111 = arith.constant dense<0.000000e+00> : vector<8x8xf32>
    %354 = vector.multi_reduction <add>, %353, %cst_111 [2] : vector<8x8x16xf32> to vector<8x8xf32>
    %355 = arith.addf %350, %354 : vector<8x8xf32>
    %356 = arith.addf %355, %47 : vector<8x8xf32>
    %cst_112 = arith.constant dense<0xFF800000> : vector<8xf32>
    %357 = vector.multi_reduction <maximumf>, %356, %cst_112 [1] : vector<8x8xf32> to vector<8xf32>
    %358 = vector.shape_cast %357 : vector<8xf32> to vector<8x1xf32>
    %359 = vector.broadcast %358 : vector<8x1xf32> to vector<8x8xf32>
    %360 = arith.subf %356, %359 : vector<8x8xf32>
    %361 = math.exp %360 : vector<8x8xf32>
    %cst_113 = arith.constant dense<0.000000e+00> : vector<8xf32>
    %362 = vector.multi_reduction <add>, %361, %cst_113 [1] : vector<8x8xf32> to vector<8xf32>
    %363 = vector.shape_cast %362 : vector<8xf32> to vector<8x1xf32>
    %364 = tpu.reciprocal %363 {approx = true} : vector<8x1xf32> -> vector<8x1xf32>
    %365 = vector.broadcast %364 : vector<8x1xf32> to vector<8x8xf32>
    %366 = arith.mulf %361, %365 : vector<8x8xf32>
    %cst_114 = arith.constant dense<0.000000e+00> : vector<8x16xf32>
    %367 = tpu.matmul %366, %349, %cst_114 {dimension_numbers = #tpu.dot_dimension_numbers<[1], [0], [0], [1], [0, 0, 1, 1], [], []>} : vector<8x8xf32>, vector<8x16xf32>, vector<8x16xf32> -> vector<8x16xf32>
    %368 = vector.shape_cast %366 : vector<8x8xf32> to vector<8x8x1xf32>
    %369 = vector.broadcast %368 : vector<8x8x1xf32> to vector<8x8x16xf32>
    %370 = arith.mulf %369, %48 : vector<8x8x16xf32>
    %cst_115 = arith.constant dense<0.000000e+00> : vector<8x16xf32>
    %371 = vector.multi_reduction <add>, %370, %cst_115 [1] : vector<8x8x16xf32> to vector<8x16xf32>
    %372 = arith.addf %367, %371 : vector<8x16xf32>
    %373 = tpu.concatenate %346, %372 in 1 : vector<8x16xf32>, vector<8x16xf32> -> vector<8x32xf32>
    %374 = tpu.concatenate %317, %373 in 0 : vector<8x32xf32>, vector<8x32xf32> -> vector<16x32xf32>
    %c1_116 = arith.constant 1 : index
    %c0_117 = arith.constant 0 : index
    %c0_118 = arith.constant 0 : index
    %375 = vector.load %arg6[%c1_116, %c0_117, %c0_118] : memref<2x32x32xf32, #tpu.memory_space<vmem>>, vector<1x32x32xf32>
    %376 = vector.shape_cast %375 : vector<1x32x32xf32> to vector<32x32xf32>
    %cst_119 = arith.constant dense<0.000000e+00> : vector<16x32xf32>
    %377 = tpu.matmul %374, %376, %cst_119 {dimension_numbers = #tpu.dot_dimension_numbers<[1], [0], [0], [1], [0, 0, 1, 1], [], []>} : vector<16x32xf32>, vector<32x32xf32>, vector<16x32xf32> -> vector<16x32xf32>
    %378 = vector.broadcast %250 : vector<1x32xf32> to vector<16x32xf32>
    %379 = arith.addf %377, %378 : vector<16x32xf32>
    %380 = arith.addf %379, %248 : vector<16x32xf32>
    %cst_120 = arith.constant dense<0.000000e+00> : vector<16xf32>
    %381 = vector.multi_reduction <add>, %380, %cst_120 [1] : vector<16x32xf32> to vector<16xf32>
    %382 = vector.shape_cast %381 : vector<16xf32> to vector<16x1xf32>
    %cst_121 = arith.constant 3.200000e+01 : f32
    %383 = vector.broadcast %cst_121 : f32 to vector<16x1xf32>
    %384 = arith.divf %382, %383 : vector<16x1xf32>
    %385 = vector.broadcast %384 : vector<16x1xf32> to vector<16x32xf32>
    %386 = arith.subf %380, %385 : vector<16x32xf32>
    %387 = arith.mulf %386, %386 : vector<16x32xf32>
    %cst_122 = arith.constant dense<0.000000e+00> : vector<16xf32>
    %388 = vector.multi_reduction <add>, %387, %cst_122 [1] : vector<16x32xf32> to vector<16xf32>
    %389 = vector.shape_cast %388 : vector<16xf32> to vector<16x1xf32>
    %cst_123 = arith.constant 3.200000e+01 : f32
    %390 = vector.broadcast %cst_123 : f32 to vector<16x1xf32>
    %391 = arith.divf %389, %390 : vector<16x1xf32>
    %392 = vector.broadcast %384 : vector<16x1xf32> to vector<16x32xf32>
    %393 = arith.subf %380, %392 : vector<16x32xf32>
    %cst_124 = arith.constant 9.99999996E-13 : f32
    %394 = vector.broadcast %cst_124 : f32 to vector<16x1xf32>
    %395 = arith.addf %391, %394 : vector<16x1xf32>
    %396 = math.rsqrt %395 : vector<16x1xf32>
    %397 = vector.broadcast %396 : vector<16x1xf32> to vector<16x32xf32>
    %398 = arith.mulf %393, %397 : vector<16x32xf32>
    %399 = vector.broadcast %251 : vector<1x32xf32> to vector<16x32xf32>
    %400 = arith.mulf %398, %399 : vector<16x32xf32>
    %401 = vector.broadcast %252 : vector<1x32xf32> to vector<16x32xf32>
    %402 = arith.addf %400, %401 : vector<16x32xf32>
    %c1_125 = arith.constant 1 : index
    %c0_126 = arith.constant 0 : index
    %c0_127 = arith.constant 0 : index
    %403 = vector.load %arg7[%c1_125, %c0_126, %c0_127] : memref<2x32x64xf32, #tpu.memory_space<vmem>>, vector<1x32x64xf32>
    %404 = vector.shape_cast %403 : vector<1x32x64xf32> to vector<32x64xf32>
    %cst_128 = arith.constant dense<0.000000e+00> : vector<16x64xf32>
    %405 = tpu.matmul %402, %404, %cst_128 {dimension_numbers = #tpu.dot_dimension_numbers<[1], [0], [0], [1], [0, 0, 1, 1], [], []>} : vector<16x32xf32>, vector<32x64xf32>, vector<16x64xf32> -> vector<16x64xf32>
    %406 = vector.broadcast %253 : vector<1x64xf32> to vector<16x64xf32>
    %407 = arith.addf %405, %406 : vector<16x64xf32>
    %cst_129 = arith.constant 5.000000e-01 : f32
    %408 = vector.broadcast %cst_129 : f32 to vector<16x64xf32>
    %409 = arith.mulf %408, %407 : vector<16x64xf32>
    %cst_130 = arith.constant 4.471500e-02 : f32
    %410 = vector.broadcast %cst_130 : f32 to vector<16x64xf32>
    %411 = arith.mulf %410, %407 : vector<16x64xf32>
    %412 = arith.mulf %411, %407 : vector<16x64xf32>
    %413 = arith.mulf %412, %407 : vector<16x64xf32>
    %414 = arith.addf %407, %413 : vector<16x64xf32>
    %cst_131 = arith.constant 0.797884583 : f32
    %415 = vector.broadcast %cst_131 : f32 to vector<16x64xf32>
    %416 = arith.mulf %415, %414 : vector<16x64xf32>
    %417 = math.tanh %416 : vector<16x64xf32>
    %cst_132 = arith.constant 1.000000e+00 : f32
    %418 = vector.broadcast %cst_132 : f32 to vector<16x64xf32>
    %419 = arith.addf %418, %417 : vector<16x64xf32>
    %420 = arith.mulf %409, %419 : vector<16x64xf32>
    %c1_133 = arith.constant 1 : index
    %c0_134 = arith.constant 0 : index
    %c0_135 = arith.constant 0 : index
    %421 = vector.load %arg8[%c1_133, %c0_134, %c0_135] : memref<2x64x32xf32, #tpu.memory_space<vmem>>, vector<1x64x32xf32>
    %422 = vector.shape_cast %421 : vector<1x64x32xf32> to vector<64x32xf32>
    %cst_136 = arith.constant dense<0.000000e+00> : vector<16x32xf32>
    %423 = tpu.matmul %420, %422, %cst_136 {dimension_numbers = #tpu.dot_dimension_numbers<[1], [0], [0], [1], [0, 0, 1, 1], [], []>} : vector<16x64xf32>, vector<64x32xf32>, vector<16x32xf32> -> vector<16x32xf32>
    %424 = vector.broadcast %254 : vector<1x32xf32> to vector<16x32xf32>
    %425 = arith.addf %423, %424 : vector<16x32xf32>
    %426 = arith.addf %425, %402 : vector<16x32xf32>
    %cst_137 = arith.constant dense<0.000000e+00> : vector<16xf32>
    %427 = vector.multi_reduction <add>, %426, %cst_137 [1] : vector<16x32xf32> to vector<16xf32>
    %428 = vector.shape_cast %427 : vector<16xf32> to vector<16x1xf32>
    %cst_138 = arith.constant 3.200000e+01 : f32
    %429 = vector.broadcast %cst_138 : f32 to vector<16x1xf32>
    %430 = arith.divf %428, %429 : vector<16x1xf32>
    %431 = vector.broadcast %430 : vector<16x1xf32> to vector<16x32xf32>
    %432 = arith.subf %426, %431 : vector<16x32xf32>
    %433 = arith.mulf %432, %432 : vector<16x32xf32>
    %cst_139 = arith.constant dense<0.000000e+00> : vector<16xf32>
    %434 = vector.multi_reduction <add>, %433, %cst_139 [1] : vector<16x32xf32> to vector<16xf32>
    %435 = vector.shape_cast %434 : vector<16xf32> to vector<16x1xf32>
    %cst_140 = arith.constant 3.200000e+01 : f32
    %436 = vector.broadcast %cst_140 : f32 to vector<16x1xf32>
    %437 = arith.divf %435, %436 : vector<16x1xf32>
    %438 = vector.broadcast %430 : vector<16x1xf32> to vector<16x32xf32>
    %439 = arith.subf %426, %438 : vector<16x32xf32>
    %cst_141 = arith.constant 9.99999996E-13 : f32
    %440 = vector.broadcast %cst_141 : f32 to vector<16x1xf32>
    %441 = arith.addf %437, %440 : vector<16x1xf32>
    %442 = math.rsqrt %441 : vector<16x1xf32>
    %443 = vector.broadcast %442 : vector<16x1xf32> to vector<16x32xf32>
    %444 = arith.mulf %439, %443 : vector<16x32xf32>
    %445 = vector.broadcast %255 : vector<1x32xf32> to vector<16x32xf32>
    %446 = arith.mulf %444, %445 : vector<16x32xf32>
    %447 = vector.broadcast %256 : vector<1x32xf32> to vector<16x32xf32>
    %448 = arith.addf %446, %447 : vector<16x32xf32>
    %c24 = arith.constant 24 : index
    %c0_142 = arith.constant 0 : index
    %449 = vector.load %arg9[%c24, %c0_142] : memref<56x128xf32, #tpu.memory_space<vmem>>, vector<32x32xf32>
    %c24_143 = arith.constant 24 : index
    %c32 = arith.constant 32 : index
    %450 = vector.load %arg9[%c24_143, %c32] : memref<56x128xf32, #tpu.memory_space<vmem>>, vector<32x2xf32>
    %c18 = arith.constant 18 : index
    %c0_144 = arith.constant 0 : index
    %451 = vector.load %arg9[%c18, %c0_144] : memref<56x128xf32, #tpu.memory_space<vmem>>, vector<1x32xf32>
    %c19 = arith.constant 19 : index
    %c0_145 = arith.constant 0 : index
    %452 = vector.load %arg9[%c19, %c0_145] : memref<56x128xf32, #tpu.memory_space<vmem>>, vector<1x2xf32>
    %453 = vector.extract_strided_slice %448 {offsets = [0, 0], sizes = [1, 32], strides = [1, 1]} : vector<16x32xf32> to vector<1x32xf32>
    %454 = vector.extract_strided_slice %448 {offsets = [8, 0], sizes = [1, 32], strides = [1, 1]} : vector<16x32xf32> to vector<1x32xf32>
    %455 = tpu.concatenate %453, %454 in 0 : vector<1x32xf32>, vector<1x32xf32> -> vector<2x32xf32>
    %cst_146 = arith.constant dense<0.000000e+00> : vector<2x32xf32>
    %456 = tpu.matmul %455, %449, %cst_146 {dimension_numbers = #tpu.dot_dimension_numbers<[1], [0], [0], [1], [0, 0, 1, 1], [], []>} : vector<2x32xf32>, vector<32x32xf32>, vector<2x32xf32> -> vector<2x32xf32>
    %457 = vector.broadcast %451 : vector<1x32xf32> to vector<2x32xf32>
    %458 = arith.addf %456, %457 : vector<2x32xf32>
    %459 = math.tanh %458 : vector<2x32xf32>
    %cst_147 = arith.constant dense<0.000000e+00> : vector<2x2xf32>
    %460 = tpu.matmul %459, %450, %cst_147 {dimension_numbers = #tpu.dot_dimension_numbers<[1], [0], [0], [1], [0, 0, 1, 1], [], []>} : vector<2x32xf32>, vector<32x2xf32>, vector<2x2xf32> -> vector<2x2xf32>
    %461 = vector.broadcast %452 : vector<1x2xf32> to vector<2x2xf32>
    %462 = arith.addf %460, %461 : vector<2x2xf32>
    %c0_148 = arith.constant 0 : index
    %c0_149 = arith.constant 0 : index
    %463 = vector.load %arg10[%c0_148, %c0_149] : memref<2x2xf32, #tpu.memory_space<vmem>>, vector<2x2xf32>
    tpu.vector_store %arg10[%c0_148, %c0_149], %462 {strides = array<i32>} : memref<2x2xf32, #tpu.memory_space<vmem>>, vector<2x2xf32>,
    return
  }
  func.func @transform_0(%arg0: i32) -> (i32, i32) {
    %c0_i32 = arith.constant 0 : i32
    %c0_i32_0 = arith.constant 0 : i32
    %c0_i32_1 = arith.constant 0 : i32
    return %c0_i32, %c0_i32_0 : i32, i32
  }
  func.func @transform_1(%arg0: i32) -> (i32, i32) {
    %c0_i32 = arith.constant 0 : i32
    %c0_i32_0 = arith.constant 0 : i32
    %c0_i32_1 = arith.constant 0 : i32
    return %c0_i32, %c0_i32_0 : i32, i32
  }
  func.func @transform_2(%arg0: i32) -> (i32, i32) {
    %c0_i32 = arith.constant 0 : i32
    %c0_i32_0 = arith.constant 0 : i32
    %c0_i32_1 = arith.constant 0 : i32
    return %c0_i32, %c0_i32_0 : i32, i32
  }
  func.func @transform_3(%arg0: i32) -> (i32, i32, i32) {
    %c0_i32 = arith.constant 0 : i32
    %c0_i32_0 = arith.constant 0 : i32
    %c0_i32_1 = arith.constant 0 : i32
    %c0_i32_2 = arith.constant 0 : i32
    return %c0_i32, %c0_i32_0, %c0_i32_1 : i32, i32, i32
  }
  func.func @transform_4(%arg0: i32) -> (i32, i32, i32) {
    %c0_i32 = arith.constant 0 : i32
    %c0_i32_0 = arith.constant 0 : i32
    %c0_i32_1 = arith.constant 0 : i32
    %c0_i32_2 = arith.constant 0 : i32
    return %c0_i32, %c0_i32_0, %c0_i32_1 : i32, i32, i32
  }
  func.func @transform_5(%arg0: i32) -> (i32, i32, i32) {
    %c0_i32 = arith.constant 0 : i32
    %c0_i32_0 = arith.constant 0 : i32
    %c0_i32_1 = arith.constant 0 : i32
    %c0_i32_2 = arith.constant 0 : i32
    return %c0_i32, %c0_i32_0, %c0_i32_1 : i32, i32, i32
  }
  func.func @transform_6(%arg0: i32) -> (i32, i32, i32) {
    %c0_i32 = arith.constant 0 : i32
    %c0_i32_0 = arith.constant 0 : i32
    %c0_i32_1 = arith.constant 0 : i32
    %c0_i32_2 = arith.constant 0 : i32
    return %c0_i32, %c0_i32_0, %c0_i32_1 : i32, i32, i32
  }
  func.func @transform_7(%arg0: i32) -> (i32, i32, i32) {
    %c0_i32 = arith.constant 0 : i32
    %c0_i32_0 = arith.constant 0 : i32
    %c0_i32_1 = arith.constant 0 : i32
    %c0_i32_2 = arith.constant 0 : i32
    return %c0_i32, %c0_i32_0, %c0_i32_1 : i32, i32, i32
  }
  func.func @transform_8(%arg0: i32) -> (i32, i32) {
    %c0_i32 = arith.constant 0 : i32
    %c0_i32_0 = arith.constant 0 : i32
    %c0_i32_1 = arith.constant 0 : i32
    return %c0_i32, %c0_i32_0 : i32, i32
  }
  func.func @transform_9(%arg0: i32) -> (i32, i32) {
    %c0_i32 = arith.constant 0 : i32
    %c0_i32_0 = arith.constant 0 : i32
    %c0_i32_1 = arith.constant 0 : i32
    return %c0_i32, %c0_i32_0 : i32, i32
  }
}

</mosaic_0001>

<bundles_post_ra>
// kernel: cls_model_forward.1
= control target key start
LH: loop header
LB: loop body
LE: loop exit
PB: predicated region body
PF: predicated region fallthrough
CT: control target
= control target key end

     0   :  { %14 = vsyncpa [#allocation3], 0  ;;  %s7064_s0 = inlined_call_operand.vmem [shape: s32[16,2], index: 0, kind: input, shape index: {}]   ;;  %s7065_s1 = inlined_call_operand.vmem [shape: f32[2,8], index: 1, kind: input, shape index: {}]   ;;  %s7066_s2 = inlined_call_operand.vmem [shape: f32[72,32], index: 2, kind: input, shape index: {}]   ;;  %s7067_s3 = inlined_call_operand.vmem [shape: f32[8,8,16], index: 3, kind: input, shape index: {}]   ;;  %s7068_s4 = inlined_call_operand.vmem [shape: f32[2,32,96], index: 4, kind: input, shape index: {}]   ;;  %s7069_s5 = inlined_call_operand.vmem [shape: f32[2,32,32], index: 5, kind: input, shape index: {}]   ;;  %s7070_s6 = inlined_call_operand.vmem [shape: f32[2,32,64], index: 6, kind: input, shape index: {}]   ;;  %s7071_s7 = inlined_call_operand.vmem [shape: f32[2,64,32], index: 7, kind: input, shape index: {}]   ;;  %s7072_s8 = inlined_call_operand.hbm [shape: f32[56,128], index: 8, kind: input, shape index: {}]   ;;  %s7073_s9 = inlined_call_operand.hbm [shape: f32[2,2], index: 9, kind: output, shape index: {}]  }
   0x1   :  { %15 = vsyncpa [#allocation4], 0  ;;  %s5652_s30 = smov [#allocation2]   ;;  %s5604_s13 = scalar_lea.hbm %s7072_s8, 896 }
   0x2   :  { %s37_s10 = sshll.u32 %s5652_s30, 4  ;;  %p5605_p0 = scmp.ne.s32.totalorder %s7072_s8, %s5604_s13  ;;  %s38_s10 = int_to_ptr.vmem [resolvable:$true] %s37_s10 }
   0x3   :  { %p5608_p1 = scmp.lt.u32.totalorder %s5604_s13, %s7072_s8 }
   0x5   :  { %p5610_p2 = pnand %p5608_p1, %p5605_p0 }
   0x7   :  { %5613 = shalt.err (!%p5610_p2)
}
   0x8   :  { %s5614_s18 = scalar_lea.vmem %s38_s10, 896  ;;  %p5619_p4 = scmp.lt.s32.totalorder %s38_s10, %s38_s10 }
   0x9   :  { %p5615_p3 = scmp.ne.s32.totalorder %s38_s10, %s5614_s18  ;;  %p5620_p5 = scmp.lt.s32.totalorder %s5614_s18, %s5614_s18 }
   0xb   :  { %p5621_p6 = por %p5620_p5, %p5619_p4 }
   0xd   :  { %p5622_p7 = pnand %p5621_p6, %p5615_p3 }
   0xf   :  { %5625 = shalt.err (!%p5622_p7)
}
  0x10   :  { %s5653_s19 = smov 128   ;;  %s5654_s20 = smov 8  }
  0x11   :  { %43 = dma.hbm_to_vmem [thread:$0]  %s7072_s8, 896, %s38_s10, [#allocation3], %s5653_s19, %s5653_s19, %s5654_s20  }
  0x12   :  { %5648 = dma.done.wait [#allocation3], 896  }
  0x13   :  { %5649 = vsyncadd [#allocation3], 4294966400  ;;  %v5655_v0 = vmov 0   ;;  %v48_v1 = vld [vmem:[%s7064_s0 + $0x8] sm:$0xff]  ;;  %v47_v2 = vld [vmem:[%s7064_s0] sm:$0xff]  ;;  %v5656_v9 = vmov 1   ;;  %v49_v18 = vlaneseq }
  0x14   :  { %5506 = vset.pattern.permute.xlu1 %v5655_v0  ;;  %5504 = vset.pattern.permute.xlu0 %v5655_v0  ;;  %v73_v3 = vld [vmem:[%s7066_s2] sm:$0xff]  ;;  %v74_v4 = vld [vmem:[%s7066_s2 + $0x8] sm:$0xff]  ;;  %v75_v5 = vld [vmem:[%s7066_s2 + $0x10] sm:$0xff]  ;;  %v7074_v17 = vmov 0.0   ;;  %vm82_vm5 = vcmask 588800   ;;  %vm166_vm7 = vcmask 261120  }
  0x15   :  { %55 = vperm.xlu1 %5506, %v48_v1   ;;  %52 = vperm.xlu0 %5504, %v47_v2   ;;  %v76_v6 = vld [vmem:[%s7066_s2 + $0x18] sm:$0xff]  ;;  %v5380_v7 = vpack.c.bf16 %v74_v4, %v73_v3  ;;  %v77_v10 = vld [vmem:[%s7066_s2 + $0x20] sm:$0xff]  ;;  %v78_v11 = vld [vmem:[%s7066_s2 + $0x28] sm:$0xff]  ;;  %v5765_v21 = vand.u32 127, %v49_v18  ;;  %v5658_v62 = vmov 1966171168  }
  0x16   :  { %v5384_v8 = vpack.c.bf16 %v76_v6, %v75_v5  ;;  %v5388_v12 = vpack.c.bf16 %v78_v11, %v77_v10  ;;  %v79_v13 = vld [vmem:[%s7066_s2 + $0x30] sm:$0xff]  ;;  %v80_v14 = vld [vmem:[%s7066_s2 + $0x38] sm:$0xff]  ;;  %v81_v16 = vld [vmem:[%s7066_s2 + $0x40] sm:$0xff]  ;;  %v325_v63 = vunpack.c.l.s4 %v5658_v62  ;;  %vm5659_vm8 = vmmov 0   ;;  %s5660_s8 = smov 96   ;;  %s5661_s22 = smov 80  }
  0x17   :  { %5381 = vmatprep.subr.bf16.mxu0 %v5380_v7  ;;  %v5392_v15 = vpack.c.bf16 %v80_v14, %v79_v13  ;;  %v233_v40 = vld [vmem:[%s7068_s4] sm:$0xff]  ;;  %v234_v41 = vld [vmem:[%s7068_s4 + $0x8] sm:$0xff]  ;;  %v235_v42 = vld [vmem:[%s7068_s4 + $0x10] sm:$0xff]  ;;  %v5803_v0 = vshrl.u32 %v49_v18, 7  ;;  %vm420_vm9 = vcmask 130048   ;;  %s5662_s23 = smov 16  }
  0x18   :  { %5383 = vmatpush3.bf16.msra.mxu0 %v5380_v7  ;;  %v5396_v43 = vpack.c.bf16 %v234_v41, %v233_v40  ;;  %v236_v44 = vld [vmem:[%s7068_s4 + $0x18] sm:$0xff]  ;;  %v4962_v53 = vld [vmem:[#allocation2] ss:$0 sm:$0xff]  ;;  %v4963_v57 = vld [vmem:[#allocation2 + $0x1] ss:$0 sm:$0xff]  ;;  %vm487_vm10 = vcmask 1041409  }
  0x19   :  { %5507 = vset.pattern.permute.xlu1 %v5656_v9  ;;  %5505 = vset.pattern.permute.xlu0 %v5656_v9  ;;  %v5400_v45 = vpack.c.bf16 %v236_v44, %v235_v42  ;;  %v5825_v13 = vld [vmem:[%s7067_s3] sm:$0xff]  ;;  %v5886_v44 = vld [vmem:[%s7067_s3 + $0x28] sm:$0xff]  ;;  %vm489_vm11 = vcmask 1042434   ;;  %vm491_vm12 = vcmask 1043459   ;;  %vm493_vm13 = vcmask 1044484   ;;  %s5664_s26 = smov 112  }
  0x1a   :  { %63 = vperm.xlu1 %5507, %v48_v1   ;;  %60 = vperm.xlu0 %5505, %v47_v2   ;;  %v326_v1 = vunpack.c.0.s8 %v325_v63  ;;  %v4964_v2 = vld [vmem:[#allocation2 + $0x2] ss:$0 sm:$0xff]  ;;  %vm495_vm14 = vcmask 1045509   ;;  %vm497_vm15 = vcmask 1046534   ;;  %s5665_s27 = smov 48  }
  0x1b   :  { %5385 = vmatprep.subr.bf16.mxu0 %v5384_v8  ;;  %5397 = vmatprep.subr.bf16.mxu1 %v5396_v43 }
  0x1c   :  { %5387 = vmatpush3.bf16.msra.mxu0 %v5384_v8  ;;  %5399 = vmatpush3.bf16.msra.mxu1 %v5396_v43  ;;  %v5806_v3 = vsub.s32 %v326_v1, %v5803_v0  ;;  %v5813_v8 = vsub.s32 0, %v5803_v0  ;;  %v5930_v1 = vsub.s32 %v5765_v21, %v5803_v0 }
  0x1d   :  { %5389 = vmatprep.subr.bf16.mxu0 %v5388_v12  ;;  %5401 = vmatprep.subr.bf16.mxu1 %v5400_v45 }
  0x20   :  { %5391 = vmatpush3.bf16.msra.mxu0 %v5388_v12  ;;  %5403 = vmatpush3.bf16.msra.mxu1 %v5400_v45 }
  0x21   :  { %5393 = vmatprep.subr.bf16.mxu0 %v5392_v15  ;;  %5185 = vmatprep.subr.mxu1 %v7074_v17 }
  0x24   :  { %5395 = vmatpush3.bf16.msra.mxu0 %v5392_v15 }
  0x25   :  { %5169 = vmatprep.subr.mxu0 %v81_v16 }
  0x28   :  { %5170 = vmatpush3.msra.mxu0 %v81_v16 }
  0x29   :  { %5200 = vmatprep.subr.mxu0 %v7074_v17 }
  0x94   :  { %v53_v19 = vpop.permute.xlu0 %52  ;;  %v56_v20 = vpop.permute.xlu1 %55 }
  0x95   :  { %vm58_vm0 = vcmp.eq.s32.totalorder %v5765_v21, %v56_v20  ;;  %vm57_vm3 = vcmp.eq.s32.totalorder %v5765_v21, %v53_v19  ;;  %v5835_v19 = vld [vmem:[%s7067_s3 + $0x8] sm:$0xff] }
  0x99   :  { %v64_v22 = vpop.permute.xlu1 %63  ;;  %v61_v23 = vpop.permute.xlu0 %60 }
  0x9a   :  { %vm66_vm1 = vcmp.eq.s32.totalorder %v5765_v21, %v64_v22  ;;  %vm65_vm2 = vcmp.eq.s32.totalorder %v5765_v21, %v61_v23 }
  0x9b   :  { %vm68_vm4 = vmor %vm58_vm0, %vm66_vm1  ;;  %vm499_vm0 = vcmask 1047559   ;;  %vm577_vm1 = vcmask 64512  }
  0x9c   :  { %vm67_vm6 = vmor %vm57_vm3, %vm65_vm2  ;;  %v4959_v24 = vsel %vm68_vm4, 1.0, %v7074_v17  ;;  %vm2389_vm2 = vcmask 523264   ;;  %vm4768_vm3 = vcmask 1040384   ;;  %vm4941_vm4 = vcmask 9216  }
  0x9d   :  { %v4958_v25 = vsel %vm67_vm6, 1.0, %v7074_v17 }
  0x9e   :  { %5171 = vmatprep.mubr.msk.f32.mxu0 %vm82_vm5, %v4958_v25 }
  0x9f   :  { %5172 = vmatmul.mubr.msk.f32.vlgmr.msra.gmra.mrb[0].mxu0 %vm82_vm5, %v4959_v24 }
  0xa0   :  { %5202 = vmatprep.mubr.msk.f32.mxu0 %vm5659_vm8, %v7074_v17 }
 0x172   :  { %v5173_v26 = vpop.f32.mrb[0].mxu0 }
 0x173   :  { %v155_v27 = vpop.f32.mrb[1].mxu0  ;;  %v170_v28 = vsel %vm166_vm7, %v5173_v26, 0.0 }
 0x174   :  { %171 = vadd.xlane.f32.xlu0 %v170_v28  ;;  %v167_v29 = vsel %vm166_vm7, %v155_v27, 0.0 }
 0x175   :  { %168 = vadd.xlane.f32.xlu1 %v167_v29 }
 0x201   :  { %v172_v30 = vpop.xlane.xlu0 %171 }
 0x202   :  { %v175_v31 = vmul.f32 0.03125, %v172_v30  ;;  %v169_v32 = vpop.xlane.xlu1 %168 }
 0x203   :  { %v174_v33 = vmul.f32 0.03125, %v169_v32 }
 0x204   :  { %v177_v34 = vsub.f32 %v5173_v26, %v175_v31 }
 0x205   :  { %v176_v35 = vsub.f32 %v155_v27, %v174_v33  ;;  %v5852_v27 = vld [vmem:[%s7067_s3 + $0x10] sm:$0xff]  ;;  %v5863_v33 = vld [vmem:[%s7067_s3 + $0x20] sm:$0xff] }
 0x206   :  { %v179_v36 = vmul.f32 %v177_v34, %v177_v34 }
 0x207   :  { %v178_v37 = vmul.f32 %v176_v35, %v176_v35 }
 0x208   :  { %v183_v38 = vsel %vm166_vm7, %v179_v36, 0.0 }
 0x209   :  { %184 = vadd.xlane.f32.xlu1 %v183_v38  ;;  %v180_v39 = vsel %vm166_vm7, %v178_v37, 0.0  ;;  %v5875_v38 = vld [vmem:[%s7067_s3 + $0x18] sm:$0xff] }
 0x20a   :  { %181 = vadd.xlane.f32.xlu0 %v180_v39 }
 0x296   :  { %v185_v46 = vpop.xlane.xlu1 %184 }
 0x297   :  { %v187_v47 = vmul.f32 0.03125, %v185_v46  ;;  %v182_v48 = vpop.xlane.xlu0 %181  ;;  %v5894_v46 = vld [vmem:[%s7067_s3 + $0x30] sm:$0xff] }
 0x298   :  { %v186_v49 = vmul.f32 0.03125, %v182_v48 }
 0x299   :  { %v189_v50 = vadd.f32 1e-12, %v187_v47 }
 0x29a   :  { %v188_v51 = vadd.f32 1e-12, %v186_v49 }
 0x29b   :  { %5518 = vrsqrt.f32 %v189_v50  ;;  %v5905_v50 = vld [vmem:[%s7067_s3 + $0x38] sm:$0xff] }
 0x29c   :  { %5520 = vrsqrt.f32 %v188_v51 }
 0x2a5   :  { %v5519_v52 = vpop.eup %5518 }
 0x2a6   :  { %v5521_v54 = vpop.eup %5520  ;;  %v193_v55 = vmul.f32 %v5519_v52, %v177_v34 }
 0x2a7   :  { %v192_v56 = vmul.f32 %v5521_v54, %v176_v35 }
 0x2a8   :  { %v199_v58 = vmul.f32 %v4962_v53, %v193_v55 }
 0x2a9   :  { %v198_v59 = vmul.f32 %v4962_v53, %v192_v56 }
 0x2aa   :  { %v5792_v61 = vadd.f32 %v4963_v57, %v199_v58 }
 0x2ab   :  { %v5790_v60 = vadd.f32 %v4963_v57, %v198_v59 }
 0x2ad   :  { %5182 = vmatprep.mubr.msk.f32.mxu1 %vm166_vm7, %v5790_v60 }
 0x2ae   :  { %5183 = vmatmul.mubr.msk.f32.vlgmr.msra.gmra.mrb[0].mxu1 %vm166_vm7, %v5792_v61 }
 0x2af   :  { %5187 = vmatprep.mubr.msk.f32.mxu1 %vm5659_vm8, %v7074_v17 }
 0x381   :  { %v5184_v4 = vpop.f32.mrb[0].mxu1 }
 0x382   :  { %v5808_v5 = vadd.f32 %v5184_v4, %v4964_v2  ;;  %v313_v6 = vpop.f32.mrb[1].mxu1 }
 0x383   :  { %v5810_v7 = vadd.f32 %v4964_v2, %v313_v6 }
 0x385   :  { %445 = vrot.lane.b32.xlu0 %v5810_v7, %s5660_s8  ;;  %v330_v9 = vrot.slane %v5810_v7, %v5806_v3  ;;  %v323_v10 = vcombine.high %v5810_v7, %v5810_v7 }
 0x387   :  { %v346_v11 = vrot.slane %v330_v9, %v5806_v3  ;;  %v338_v12 = vcombine.high %v330_v9, %v330_v9  ;;  %v337_v18 = vrot.slane %v323_v10, %v5806_v3 }
 0x389   :  { %v5828_v14 = vrot.slane %v346_v11, %v5813_v8  ;;  %v360_v15 = vrot.slane %v338_v12, %v5806_v3  ;;  %v368_v16 = vcombine.high %v346_v11, %v346_v11  ;;  %v353_v26 = vrot.slane %v337_v18, %v5806_v3  ;;  %v206_v12 = vld [vmem:[%s7065_s1] sm:$0x3]  ;;  %s5663_s1 = smov 64  }
 0x38a   :  { %v339_v28 = vcombine.high %v337_v18, %v337_v18 }
 0x38b   :  { %v412_v20 = vmul.f32 %v5828_v14, %v5825_v13  ;;  %v5840_v22 = vrot.slane %v360_v15, %v5813_v8  ;;  %v5846_v25 = vrot.slane %v368_v16, %v5813_v8  ;;  %v5858_v31 = vrot.slane %v353_v26, %v5813_v8 }
 0x38c   :  { %v370_v32 = vcombine.high %v360_v15, %v360_v15  ;;  %v367_v37 = vrot.slane %v339_v28, %v5806_v3  ;;  %v369_v39 = vcombine.high %v353_v26, %v353_v26 }
 0x38d   :  { %v421_v23 = vsel %vm420_vm9, %v412_v20, 0.0  ;;  %v413_v24 = vmul.f32 %v5840_v22, %v5835_v19  ;;  %v414_v30 = vmul.f32 %v5846_v25, %v5852_v27  ;;  %v416_v35 = vmul.f32 %v5858_v31, %v5863_v33 }
 0x38e   :  { %422 = vadd.xlane.f32.xlu1 %v421_v23  ;;  %v5869_v36 = vrot.slane %v370_v32, %v5813_v8  ;;  %v5881_v42 = vrot.slane %v367_v37, %v5813_v8  ;;  %v371_v43 = vcombine.high %v367_v37, %v367_v37  ;;  %v5889_v45 = vrot.slane %v369_v39, %v5813_v8 }
 0x38f   :  { %v424_v29 = vsel %vm420_vm9, %v413_v24, 0.0  ;;  %v427_v34 = vsel %vm420_vm9, %v414_v30, 0.0  ;;  %v433_v40 = vsel %vm420_vm9, %v416_v35, 0.0  ;;  %v207_v23 = vsub.f32 1.0, %v206_v12 }
 0x390   :  { %v415_v41 = vmul.f32 %v5869_v36, %v5875_v38  ;;  %v417_v48 = vmul.f32 %v5881_v42, %v5886_v44  ;;  %v5900_v49 = vrot.slane %v371_v43, %v5813_v8  ;;  %v418_v51 = vmul.f32 %v5889_v45, %v5894_v46 }
 0x391   :  { %v5947_v30 = vmul.f32 -10000.0, %v207_v23  ;;  %v1253_v23 = vcombine.high %v5808_v5, %v5808_v5 }
 0x392   :  { %425 = vadd.xlane.f32.xlu1 %v424_v29  ;;  %v430_v47 = vsel %vm420_vm9, %v415_v41, 0.0  ;;  %v436_v52 = vsel %vm420_vm9, %v417_v48, 0.0  ;;  %v419_v53 = vmul.f32 %v5900_v49, %v5905_v50  ;;  %v439_v54 = vsel %vm420_vm9, %v418_v51, 0.0 }
 0x393   :  { %v5953_v35 = vrot.slane %v5947_v30, %v5813_v8 }
 0x394   :  { %v442_v55 = vsel %vm420_vm9, %v419_v53, 0.0 }
 0x396   :  { %428 = vadd.xlane.f32.xlu1 %v427_v34 }
 0x39a   :  { %434 = vadd.xlane.f32.xlu1 %v433_v40 }
 0x39e   :  { %431 = vadd.xlane.f32.xlu1 %v430_v47 }
 0x3a2   :  { %437 = vadd.xlane.f32.xlu1 %v436_v52 }
 0x3a4   :  { %440 = vadd.xlane.f32.xlu0 %v439_v54 }
 0x3a6   :  { %443 = vadd.xlane.f32.xlu1 %v442_v55 }
 0x3ba   :  { %899 = vrot.lane.b32.xlu0 %v5810_v7, %s5661_s22 }
 0x3be   :  { %813 = vrot.lane.b32.xlu0 %v5852_v27, %s5662_s23 }
 0x3c2   :  { %817 = vrot.lane.b32.xlu0 %v5863_v33, %s5662_s23 }
 0x3c6   :  { %821 = vrot.lane.b32.xlu0 %v5894_v46, %s5662_s23 }
 0x3f7   :  { %v446_v56 = vpop.permute.xlu0 %445 }
 0x3f8   :  { %5186 = vmatpush3.xpose.msk.msra.mxu1 %vm420_vm9, %v446_v56 }
 0x3f9   :  { %5190 = vmatprep.subr.mxu1 %v7074_v17 }
 0x3fb   :  { %5188 = vmatmul.mubr.msk.f32.vlgmr.msra.gmra.mrb[2].mxu1 %vm420_vm9, %v5810_v7 }
 0x3fc   :  { %5192 = vmatprep.mubr.msk.f32.mxu1 %vm5659_vm8, %v7074_v17 }
 0x41b   :  { %v423_v57 = vpop.xlane.xlu1 %422 }
 0x41c   :  { %v458_v6 = vrot.slane %v423_v57, %v5930_v1 }
 0x41f   :  { %v426_v58 = vpop.xlane.xlu1 %425 }
 0x420   :  { %v462_v2 = vrot.slane %v426_v58, %v5930_v1 }
 0x422   :  { %v488_v11 = vsel %vm487_vm10, %v462_v2, %v458_v6 }
 0x423   :  { %v429_v59 = vpop.xlane.xlu1 %428 }
 0x424   :  { %v466_v4 = vrot.slane %v429_v59, %v5930_v1 }
 0x426   :  { %v490_v21 = vsel %vm489_vm11, %v466_v4, %v488_v11 }
 0x427   :  { %v435_v62 = vpop.xlane.xlu1 %434 }
 0x428   :  { %v474_v20 = vrot.slane %v435_v62, %v5930_v1 }
 0x42b   :  { %v432_v63 = vpop.xlane.xlu1 %431 }
 0x42c   :  { %v470_v9 = vrot.slane %v432_v63, %v5930_v1 }
 0x42e   :  { %v492_v15 = vsel %vm491_vm12, %v470_v9, %v490_v21 }
 0x42f   :  { %v438_v10 = vpop.xlane.xlu1 %437  ;;  %v494_v28 = vsel %vm493_vm13, %v474_v20, %v492_v15  ;;  %v1260_v15 = vrot.slane %v5808_v5, %v5806_v3 }
 0x430   :  { %v478_v16 = vrot.slane %v438_v10, %v5930_v1 }
 0x431   :  { %v441_v18 = vpop.xlane.xlu0 %440  ;;  %v1276_v20 = vrot.slane %v1260_v15, %v5806_v3 }
 0x432   :  { %v482_v24 = vrot.slane %v441_v18, %v5930_v1  ;;  %v496_v29 = vsel %vm495_vm14, %v478_v16, %v494_v28 }
 0x433   :  { %v444_v26 = vpop.xlane.xlu1 %443  ;;  %v1305_v28 = vrot.slane %v1276_v20, %v5813_v8 }
 0x434   :  { %v486_v32 = vrot.slane %v444_v26, %v5930_v1  ;;  %v498_v34 = vsel %vm497_vm15, %v482_v24, %v496_v29  ;;  %v1298_v29 = vcombine.high %v1276_v20, %v1276_v20 }
 0x435   :  { %v900_v59 = vpop.permute.xlu0 %899 }
 0x436   :  { %v500_v37 = vsel %vm499_vm0, %v486_v32, %v498_v34  ;;  %v1267_v32 = vrot.slane %v1253_v23, %v5806_v3 }
 0x439   :  { %v5980_v2 = vpop.permute.xlu0 %813 }
 0x43a   :  { %v835_v21 = vmul.f32 %v5980_v2, %v5846_v25 }
 0x43d   :  { %v5992_v11 = vpop.permute.xlu0 %817 }
 0x441   :  { %v6018_v18 = vpop.permute.xlu0 %821 }
 0x442   :  { %v839_v24 = vmul.f32 %v6018_v18, %v5889_v45 }
 0x4ce   :  { %v572_v39 = vpop.f32.mrb[2].mxu1 }
 0x4cf   :  { %v573_v40 = vadd.f32 %v572_v39, %v500_v37  ;;  %v5189_v41 = vpop.f32.mrb[3].mxu1  ;;  %v1313_v39 = vrot.slane %v1298_v29, %v5813_v8 }
 0x4d1   :  { %v576_v43 = vadd.f32 %v573_v40, %v5953_v35  ;;  %v1283_v40 = vrot.slane %v1267_v32, %v5806_v3 }
 0x4d3   :  { %v578_v47 = vsel %vm577_vm1, %v576_v43, -inf }
 0x4d4   :  { %579 = vmax.xlane.f32.xlu1 %v578_v47  ;;  %v1269_v47 = vcombine.high %v1267_v32, %v1267_v32 }
 0x4e5   :  { %709 = vrot.lane.b32.xlu1 %v5810_v7, %s5663_s1 }
 0x4e9   :  { %897 = vrot.lane.b32.xlu1 %v5810_v7, %s5664_s26 }
 0x4ed   :  { %1374 = vrot.lane.b32.xlu1 %v5808_v5, %s5660_s8 }
 0x561   :  { %v580_v48 = vpop.xlane.xlu1 %579 }
 0x562   :  { %v581_v51 = vsub.f32 %v576_v43, %v580_v48  ;;  %v1724_v48 = vmul.f32 %v1313_v39, %v5980_v2 }
 0x564   :  { %v582_v52 = vmul.f32 1.442695, %v581_v51 }
 0x565   :  { %v710_v53 = vpop.permute.xlu1 %709 }
 0x566   :  { %5522 = vpow2.f32 %v582_v52  ;;  %5191 = vmatpush3.msra.mxu1 %v710_v53  ;;  %v1299_v52 = vcombine.high %v1283_v40, %v1283_v40 }
 0x567   :  { %5195 = vmatprep.subr.mxu1 %v7074_v17 }
 0x569   :  { %v898_v56 = vpop.permute.xlu1 %897 }
 0x56d   :  { %v1375_v57 = vpop.permute.xlu1 %1374 }
 0x570   :  { %v5523_v54 = vpop.eup %5522 }
 0x571   :  { %v584_v55 = vsel %vm577_vm1, %v5523_v54, 0.0 }
 0x572   :  { %585 = vadd.xlane.f32.xlu1 %v584_v55 }
 0x583   :  { %1788 = vrot.lane.b32.xlu1 %v5808_v5, %s5661_s22 }
 0x587   :  { %1786 = vrot.lane.b32.xlu1 %v5808_v5, %s5664_s26 }
 0x58b   :  { %809 = vrot.lane.b32.xlu1 %v5825_v13, %s5662_s23 }
 0x58f   :  { %811 = vrot.lane.b32.xlu1 %v5835_v19, %s5662_s23 }
 0x593   :  { %815 = vrot.lane.b32.xlu1 %v5875_v38, %s5662_s23 }
 0x597   :  { %819 = vrot.lane.b32.xlu1 %v5886_v44, %s5662_s23 }
 0x59b   :  { %823 = vrot.lane.b32.xlu1 %v5905_v50, %s5662_s23 }
 0x5ff   :  { %v586_v58 = vpop.xlane.xlu1 %585 }
 0x600   :  { %5524 = vrcp.f32 %v586_v58 }
 0x603   :  { %v1789_v62 = vpop.permute.xlu1 %1788 }
 0x607   :  { %v1787_v63 = vpop.permute.xlu1 %1786 }
 0x60a   :  { %v5525_v4 = vpop.eup %5524 }
 0x60b   :  { %v5982_v6 = vmul.f32 %v5525_v4, %v5523_v54  ;;  %v5984_v9 = vpop.permute.xlu1 %809  ;;  %v1297_v54 = vrot.slane %v1269_v47, %v5806_v3 }
 0x60c   :  { %v833_v10 = vmul.f32 %v5984_v9, %v5828_v14  ;;  %v1722_v45 = vmul.f32 %v1305_v28, %v5984_v9 }
 0x60d   :  { %5193 = vmatmul.mubr.msk.f32.vlgmr.msra.gmra.mrb[4].mxu1 %vm577_vm1, %v5982_v6  ;;  %v1325_v58 = vrot.slane %v1297_v54, %v5813_v8 }
 0x60e   :  { %5196 = vmatpush3.xpose.msk.msra.mxu1 %vm420_vm9, %v900_v59  ;;  %849 = vrot.lane.b32.xlu0 %v833_v10, %s5664_s26  ;;  %v1301_v59 = vcombine.high %v1297_v54, %v1297_v54 }
 0x60f   :  { %v5994_v12 = vpop.permute.xlu1 %811  ;;  %5197 = vmatprep.mubr.msk.f32.mxu1 %vm5659_vm8, %v7074_v17  ;;  %5205 = vmatprep.subr.mxu1 %v7074_v17 }
 0x610   :  { %v834_v14 = vmul.f32 %v5994_v12, %v5840_v22  ;;  %v837_v22 = vmul.f32 %v5992_v11, %v5858_v31  ;;  %v1333_v4 = vrot.slane %v1301_v59, %v5813_v8 }
 0x611   :  { %5198 = vmatmul.mubr.msk.f32.vlgmr.msra.gmra.mrb[6].mxu1 %vm420_vm9, %v898_v56 }
 0x612   :  { %5206 = vmatpush3.xpose.msk.msra.mxu1 %vm420_vm9, %v1375_v57  ;;  %853 = vrot.lane.b32.xlu0 %v835_v21, %s5664_s26  ;;  %v1329_v57 = vrot.slane %v1299_v52, %v5813_v8 }
 0x613   :  { %851 = vrot.lane.b32.xlu1 %v834_v14, %s5664_s26  ;;  %v6009_v16 = vpop.permute.xlu1 %815  ;;  %5207 = vmatprep.mubr.msk.f32.mxu1 %vm5659_vm8, %v7074_v17 }
 0x614   :  { %5215 = vmatprep.subr.mxu1 %v7074_v17  ;;  %v836_v25 = vmul.f32 %v6009_v16, %v5869_v36  ;;  %v1268_v36 = vcombine.high %v1260_v15, %v1260_v15 }
 0x615   :  { %5208 = vmatmul.mubr.msk.f32.vlgmr.msra.gmra.mrb[8].mxu1 %vm420_vm9, %v5808_v5 }
 0x616   :  { %5216 = vmatpush3.xpose.msk.msra.mxu1 %vm420_vm9, %v1789_v62  ;;  %857 = vrot.lane.b32.xlu0 %v837_v22, %s5664_s26  ;;  %v1290_v37 = vrot.slane %v1268_v36, %v5806_v3  ;;  %v1728_v62 = vmul.f32 %v1329_v57, %v6018_v18 }
 0x617   :  { %855 = vrot.lane.b32.xlu1 %v836_v25, %s5664_s26  ;;  %v6028_v31 = vpop.permute.xlu1 %819  ;;  %5217 = vmatprep.mubr.msk.f32.mxu1 %vm5659_vm8, %v7074_v17 }
 0x618   :  { %v838_v26 = vmul.f32 %v6028_v31, %v5881_v42  ;;  %v1309_v41 = vrot.slane %v1290_v37, %v5813_v8  ;;  %v1300_v43 = vcombine.high %v1290_v37, %v1290_v37  ;;  %v1342_v37 = vmul.f32 %v1305_v28, %v5825_v13 }
 0x619   :  { %5218 = vmatmul.mubr.msk.f32.vlgmr.msra.gmra.mrb[10].mxu1 %vm420_vm9, %v1787_v63  ;;  %v1727_v63 = vmul.f32 %v1325_v58, %v6028_v31 }
 0x61a   :  { %861 = vrot.lane.b32.xlu0 %v839_v24, %s5664_s26  ;;  %v1723_v51 = vmul.f32 %v1309_v41, %v5994_v12  ;;  %v1317_v53 = vrot.slane %v1300_v43, %v5813_v8  ;;  %v1344_v43 = vmul.f32 %v1313_v39, %v5852_v27 }
 0x61b   :  { %859 = vrot.lane.b32.xlu1 %v838_v26, %s5664_s26  ;;  %v6041_v34 = vpop.permute.xlu1 %823 }
 0x61c   :  { %v840_v42 = vmul.f32 %v6041_v34, %v5900_v49  ;;  %v1321_v49 = vrot.slane %v1283_v40, %v5813_v8  ;;  %v1725_v56 = vmul.f32 %v1317_v53, %v6009_v16  ;;  %v1729_v10 = vmul.f32 %v1333_v4, %v6041_v34 }
 0x61d   :  { %v1345_v52 = vmul.f32 %v1317_v53, %v5875_v38 }
 0x61e   :  { %1738 = vrot.lane.b32.xlu0 %v1722_v45, %s5664_s26  ;;  %v1726_v55 = vmul.f32 %v1321_v49, %v5992_v11  ;;  %v1343_v45 = vmul.f32 %v1309_v41, %v5835_v19  ;;  %v1346_v39 = vmul.f32 %v1321_v49, %v5863_v33 }
 0x61f   :  { %863 = vrot.lane.b32.xlu1 %v840_v42, %s5664_s26  ;;  %v1350_v42 = vsel %vm420_vm9, %v1342_v37, 0.0  ;;  %v1359_v41 = vsel %vm420_vm9, %v1345_v52, 0.0 }
 0x620   :  { %v1353_v40 = vsel %vm420_vm9, %v1343_v45, 0.0 }
 0x622   :  { %1742 = vrot.lane.b32.xlu0 %v1724_v48, %s5664_s26 }
 0x623   :  { %1740 = vrot.lane.b32.xlu1 %v1723_v51, %s5664_s26  ;;  %v1356_v51 = vsel %vm420_vm9, %v1344_v43, 0.0 }
 0x626   :  { %1746 = vrot.lane.b32.xlu0 %v1726_v55, %s5664_s26  ;;  %v1347_v55 = vmul.f32 %v1325_v58, %v5886_v44 }
 0x627   :  { %1744 = vrot.lane.b32.xlu1 %v1725_v56, %s5664_s26 }
 0x62a   :  { %1750 = vrot.lane.b32.xlu0 %v1728_v62, %s5664_s26  ;;  %v1365_v62 = vsel %vm420_vm9, %v1347_v55, 0.0 }
 0x62b   :  { %1748 = vrot.lane.b32.xlu1 %v1727_v63, %s5664_s26  ;;  %v1362_v63 = vsel %vm420_vm9, %v1346_v39, 0.0 }
 0x62f   :  { %1752 = vrot.lane.b32.xlu1 %v1729_v10, %s5664_s26 }
 0x680   :  { %v850_v21 = vpop.permute.xlu0 %849 }
 0x681   :  { %v873_v14 = vsel %vm420_vm9, %v850_v21, 0.0  ;;  %v1348_v21 = vmul.f32 %v1329_v57, %v5894_v46 }
 0x682   :  { %874 = vadd.xlane.f32.xlu0 %v873_v14 }
 0x683   :  { %v1368_v49 = vsel %vm420_vm9, %v1348_v21, 0.0 }
 0x684   :  { %v854_v15 = vpop.permute.xlu0 %853 }
 0x685   :  { %v852_v22 = vpop.permute.xlu1 %851  ;;  %v879_v25 = vsel %vm420_vm9, %v854_v15, 0.0 }
 0x686   :  { %880 = vadd.xlane.f32.xlu0 %v879_v25  ;;  %v876_v20 = vsel %vm420_vm9, %v852_v22, 0.0  ;;  %v1349_v22 = vmul.f32 %v1333_v4, %v5905_v50 }
 0x687   :  { %877 = vadd.xlane.f32.xlu1 %v876_v20 }
 0x688   :  { %v858_v24 = vpop.permute.xlu0 %857 }
 0x689   :  { %v856_v23 = vpop.permute.xlu1 %855  ;;  %v885_v29 = vsel %vm420_vm9, %v858_v24, 0.0 }
 0x68a   :  { %v882_v36 = vsel %vm420_vm9, %v856_v23, 0.0  ;;  %v1371_v23 = vsel %vm420_vm9, %v1349_v22, 0.0 }
 0x68b   :  { %883 = vadd.xlane.f32.xlu0 %v882_v36 }
 0x68c   :  { %v862_v47 = vpop.permute.xlu0 %861 }
 0x68d   :  { %v860_v26 = vpop.permute.xlu1 %859  ;;  %v891_v48 = vsel %vm420_vm9, %v862_v47, 0.0 }
 0x68e   :  { %v888_v32 = vsel %vm420_vm9, %v860_v26, 0.0 }
 0x68f   :  { %886 = vadd.xlane.f32.xlu0 %v885_v29  ;;  %889 = vadd.xlane.f32.xlu1 %v888_v32 }
 0x690   :  { %v1739_v56 = vpop.permute.xlu0 %1738 }
 0x691   :  { %v864_v28 = vpop.permute.xlu1 %863  ;;  %v1762_v53 = vsel %vm420_vm9, %v1739_v56, 0.0 }
 0x692   :  { %v894_v54 = vsel %vm420_vm9, %v864_v28, 0.0 }
 0x693   :  { %1351 = vadd.xlane.f32.xlu0 %v1350_v42  ;;  %1354 = vadd.xlane.f32.xlu1 %v1353_v40 }
 0x694   :  { %v1743_v14 = vpop.permute.xlu0 %1742 }
 0x695   :  { %v1741_v59 = vpop.permute.xlu1 %1740  ;;  %v1768_v15 = vsel %vm420_vm9, %v1743_v14, 0.0 }
 0x696   :  { %v1765_v10 = vsel %vm420_vm9, %v1741_v59, 0.0 }
 0x697   :  { %892 = vadd.xlane.f32.xlu0 %v891_v48  ;;  %1357 = vadd.xlane.f32.xlu1 %v1356_v51 }
 0x698   :  { %v1747_v25 = vpop.permute.xlu0 %1746 }
 0x699   :  { %v1745_v58 = vpop.permute.xlu1 %1744  ;;  %v1774_v57 = vsel %vm420_vm9, %v1747_v25, 0.0 }
 0x69a   :  { %v1771_v36 = vsel %vm420_vm9, %v1745_v58, 0.0 }
 0x69b   :  { %1360 = vadd.xlane.f32.xlu1 %v1359_v41  ;;  %895 = vadd.xlane.f32.xlu0 %v894_v54 }
 0x69c   :  { %v1751_v26 = vpop.permute.xlu0 %1750 }
 0x69d   :  { %v1749_v20 = vpop.permute.xlu1 %1748  ;;  %v1780_v4 = vsel %vm420_vm9, %v1751_v26, 0.0 }
 0x69e   :  { %v1777_v24 = vsel %vm420_vm9, %v1749_v20, 0.0 }
 0x69f   :  { %1366 = vadd.xlane.f32.xlu1 %v1365_v62  ;;  %1363 = vadd.xlane.f32.xlu0 %v1362_v63 }
 0x6a1   :  { %v1753_v29 = vpop.permute.xlu1 %1752 }
 0x6a2   :  { %v1783_v32 = vsel %vm420_vm9, %v1753_v29, 0.0 }
 0x6a3   :  { %1763 = vadd.xlane.f32.xlu0 %v1762_v53  ;;  %1766 = vadd.xlane.f32.xlu1 %v1765_v10 }
 0x6a7   :  { %1369 = vadd.xlane.f32.xlu0 %v1368_v49  ;;  %1769 = vadd.xlane.f32.xlu1 %v1768_v15 }
 0x6ab   :  { %1372 = vadd.xlane.f32.xlu0 %v1371_v23  ;;  %1772 = vadd.xlane.f32.xlu1 %v1771_v36 }
 0x6af   :  { %1775 = vadd.xlane.f32.xlu0 %v1774_v57  ;;  %1778 = vadd.xlane.f32.xlu1 %v1777_v24 }
 0x6b3   :  { %1781 = vadd.xlane.f32.xlu0 %v1780_v4  ;;  %1784 = vadd.xlane.f32.xlu1 %v1783_v32 }
 0x6e0   :  { %v6104_v37 = vpop.f32.mrb[4].mxu1 }
 0x6e1   :  { %v5194_v45 = vpop.f32.mrb[5].mxu1 }
 0x6e4   :  { %v1019_v42 = vpop.f32.mrb[6].mxu1 }
 0x6e5   :  { %v5199_v40 = vpop.f32.mrb[7].mxu1 }
 0x6e8   :  { %v6106_v43 = vpop.f32.mrb[8].mxu1 }
 0x6e9   :  { %v5209_v47 = vpop.f32.mrb[9].mxu1 }
 0x6ec   :  { %v6108_v48 = vpop.f32.mrb[10].mxu1 }
 0x6ed   :  { %v5219_v51 = vpop.f32.mrb[11].mxu1 }
 0x70f   :  { %v875_v52 = vpop.xlane.xlu0 %874 }
 0x710   :  { %v912_v59 = vrot.slane %v875_v52, %v5930_v1 }
 0x713   :  { %v881_v28 = vpop.xlane.xlu0 %880 }
 0x714   :  { %v878_v41 = vpop.xlane.xlu1 %877  ;;  %v920_v62 = vrot.slane %v881_v28, %v5930_v1 }
 0x715   :  { %v916_v56 = vrot.slane %v878_v41, %v5930_v1 }
 0x717   :  { %v941_v10 = vsel %vm487_vm10, %v916_v56, %v912_v59 }
 0x718   :  { %v884_v54 = vpop.xlane.xlu0 %883  ;;  %v942_v58 = vsel %vm489_vm11, %v920_v62, %v941_v10 }
 0x719   :  { %v924_v21 = vrot.slane %v884_v54, %v5930_v1 }
 0x71b   :  { %v943_v22 = vsel %vm491_vm12, %v924_v21, %v942_v58 }
 0x71c   :  { %v887_v55 = vpop.xlane.xlu0 %886  ;;  %v890_v39 = vpop.xlane.xlu1 %889 }
 0x71d   :  { %v928_v14 = vrot.slane %v887_v55, %v5930_v1  ;;  %v932_v25 = vrot.slane %v890_v39, %v5930_v1 }
 0x71f   :  { %v944_v20 = vsel %vm493_vm13, %v928_v14, %v943_v22 }
 0x720   :  { %v1352_v63 = vpop.xlane.xlu0 %1351  ;;  %v1355_v53 = vpop.xlane.xlu1 %1354  ;;  %v945_v24 = vsel %vm495_vm14, %v932_v25, %v944_v20  ;;  %v6141_v25 = vsub.s32 1, %v5803_v0 }
 0x721   :  { %v1387_v51 = vrot.slane %v1352_v63, %v5930_v1  ;;  %v1391_v52 = vrot.slane %v1355_v53, %v5930_v1 }
 0x723   :  { %v1416_v59 = vsel %vm487_vm10, %v1391_v52, %v1387_v51 }
 0x724   :  { %v893_v49 = vpop.xlane.xlu0 %892  ;;  %v1358_v15 = vpop.xlane.xlu1 %1357 }
 0x725   :  { %v936_v23 = vrot.slane %v893_v49, %v5930_v1  ;;  %v1395_v28 = vrot.slane %v1358_v15, %v5930_v1 }
 0x727   :  { %v946_v29 = vsel %vm497_vm15, %v936_v23, %v945_v24 }
 0x728   :  { %v896_v36 = vpop.xlane.xlu0 %895  ;;  %v1361_v57 = vpop.xlane.xlu1 %1360 }
 0x729   :  { %v940_v26 = vrot.slane %v896_v36, %v5930_v1  ;;  %v1399_v39 = vrot.slane %v1361_v57, %v5930_v1 }
 0x72b   :  { %v947_v4 = vsel %vm499_vm0, %v940_v26, %v946_v29  ;;  %v6150_v26 = vrot.slane %v5947_v30, %v6141_v25 }
 0x72c   :  { %v1364_v32 = vpop.xlane.xlu0 %1363  ;;  %v1367_v45 = vpop.xlane.xlu1 %1366  ;;  %v1020_v40 = vadd.f32 %v1019_v42, %v947_v4  ;;  %v1417_v42 = vsel %vm489_vm11, %v1395_v28, %v1416_v59 }
 0x72d   :  { %v1403_v56 = vrot.slane %v1364_v32, %v5930_v1  ;;  %v1418_v63 = vsel %vm491_vm12, %v1399_v39, %v1417_v42  ;;  %v1407_v53 = vrot.slane %v1367_v45, %v5930_v1 }
 0x72e   :  { %v1023_v47 = vadd.f32 %v1020_v40, %v5953_v35 }
 0x72f   :  { %v1419_v21 = vsel %vm493_vm13, %v1403_v56, %v1418_v63 }
 0x730   :  { %v1764_v41 = vpop.xlane.xlu0 %1763  ;;  %v1767_v54 = vpop.xlane.xlu1 %1766  ;;  %v1024_v55 = vsel %vm577_vm1, %v1023_v47, -inf  ;;  %v1420_v20 = vsel %vm495_vm14, %v1407_v53, %v1419_v21 }
 0x731   :  { %1025 = vmax.xlane.f32.xlu0 %v1024_v55  ;;  %v1801_v58 = vrot.slane %v1764_v41, %v5930_v1  ;;  %v1805_v49 = vrot.slane %v1767_v54, %v5930_v1 }
 0x733   :  { %v1830_v4 = vsel %vm487_vm10, %v1805_v49, %v1801_v58 }
 0x734   :  { %v1370_v62 = vpop.xlane.xlu0 %1369  ;;  %v1770_v10 = vpop.xlane.xlu1 %1769 }
 0x735   :  { %v1411_v14 = vrot.slane %v1370_v62, %v5930_v1  ;;  %v1809_v23 = vrot.slane %v1770_v10, %v5930_v1 }
 0x737   :  { %v1421_v57 = vsel %vm497_vm15, %v1411_v14, %v1420_v20  ;;  %v1831_v51 = vsel %vm489_vm11, %v1809_v23, %v1830_v4 }
 0x738   :  { %v1373_v15 = vpop.xlane.xlu0 %1372  ;;  %v1773_v22 = vpop.xlane.xlu1 %1772 }
 0x739   :  { %v1415_v36 = vrot.slane %v1373_v15, %v5930_v1  ;;  %v1813_v24 = vrot.slane %v1773_v22, %v5930_v1 }
 0x73b   :  { %v1422_v29 = vsel %vm499_vm0, %v1415_v36, %v1421_v57  ;;  %v1832_v28 = vsel %vm491_vm12, %v1813_v24, %v1831_v51 }
 0x73c   :  { %v1776_v32 = vpop.xlane.xlu0 %1775  ;;  %v1779_v45 = vpop.xlane.xlu1 %1778  ;;  %v1495_v40 = vadd.f32 %v6106_v43, %v1422_v29 }
 0x73d   :  { %v1817_v52 = vrot.slane %v1776_v32, %v5930_v1  ;;  %v1821_v41 = vrot.slane %v1779_v45, %v5930_v1 }
 0x73e   :  { %v1498_v54 = vadd.f32 %v1495_v40, %v6150_v26 }
 0x73f   :  { %v1833_v30 = vsel %vm493_vm13, %v1817_v52, %v1832_v28 }
 0x740   :  { %v1782_v55 = vpop.xlane.xlu0 %1781  ;;  %v1785_v39 = vpop.xlane.xlu1 %1784  ;;  %v1499_v56 = vsel %vm577_vm1, %v1498_v54, -inf  ;;  %v1834_v42 = vsel %vm495_vm14, %v1821_v41, %v1833_v30 }
 0x741   :  { %v1825_v59 = vrot.slane %v1782_v55, %v5930_v1  ;;  %v1829_v43 = vrot.slane %v1785_v39, %v5930_v1  ;;  %1500 = vmax.xlane.f32.xlu1 %v1499_v56  ;;  %v6190_v39 = vsub.s32 4, %v5803_v0 }
 0x743   :  { %v1835_v62 = vsel %vm497_vm15, %v1825_v59, %v1834_v42 }
 0x744   :  { %v1836_v10 = vsel %vm499_vm0, %v1829_v43, %v1835_v62  ;;  %v6198_v43 = vsub.s32 5, %v5803_v0 }
 0x745   :  { %v1909_v63 = vadd.f32 %v6108_v48, %v1836_v10 }
 0x746   :  { %7082 = vst [vmem:[#allocation8_spill] sm:$0xff] %v6198_v43 }
 0x747   :  { %v1912_v53 = vadd.f32 %v1909_v63, %v6150_v26  ;;  %v6205_v63 = vsub.s32 6, %v5803_v0 }
 0x749   :  { %v1913_v21 = vsel %vm577_vm1, %v1912_v53, -inf  ;;  %7083 = vst [vmem:[#allocation9_spill] sm:$0xff] %v6205_v63 }
 0x74a   :  { %1914 = vmax.xlane.f32.xlu0 %v1913_v21 }
 0x7be   :  { %v1026_v14 = vpop.xlane.xlu0 %1025 }
 0x7bf   :  { %v1027_v58 = vsub.f32 %v1023_v47, %v1026_v14 }
 0x7c1   :  { %v1028_v49 = vmul.f32 1.442695, %v1027_v58 }
 0x7c3   :  { %5526 = vpow2.f32 %v1028_v49 }
 0x7cd   :  { %v5527_v15 = vpop.eup %5526 }
 0x7ce   :  { %v1501_v22 = vpop.xlane.xlu1 %1500  ;;  %v1030_v20 = vsel %vm577_vm1, %v5527_v15, 0.0 }
 0x7cf   :  { %v1502_v23 = vsub.f32 %v1498_v54, %v1501_v22  ;;  %1031 = vadd.xlane.f32.xlu1 %v1030_v20  ;;  %v6185_v54 = vsub.s32 2, %v5803_v0  ;;  %v6216_v20 = vsub.s32 7, %v5803_v0 }
 0x7d1   :  { %v1503_v36 = vmul.f32 1.442695, %v1502_v23  ;;  %7084 = vst [vmem:[#allocation10_spill] sm:$0xff] %v6216_v20 }
 0x7d3   :  { %5528 = vpow2.f32 %v1503_v36 }
 0x7d7   :  { %v1915_v24 = vpop.xlane.xlu0 %1914 }
 0x7d8   :  { %v1916_v29 = vsub.f32 %v1912_v53, %v1915_v24 }
 0x7da   :  { %v1917_v47 = vmul.f32 1.442695, %v1916_v29  ;;  %v599_v29 = vrot.slane %v5982_v6, %v6141_v25 }
 0x7dc   :  { %5530 = vpow2.f32 %v1917_v47 }
 0x7dd   :  { %v5529_v57 = vpop.eup %5528 }
 0x7de   :  { %v1505_v48 = vsel %vm577_vm1, %v5529_v57, 0.0 }
 0x7df   :  { %1506 = vadd.xlane.f32.xlu0 %v1505_v48 }
 0x7e0   :  { %1630 = vrot.lane.b32.xlu1 %v5808_v5, %s5663_s1 }
 0x7e6   :  { %v5531_v4 = vpop.eup %5530 }
 0x7e7   :  { %v1919_v32 = vsel %vm577_vm1, %v5531_v4, 0.0 }
 0x7f5   :  { %1155 = vrot.lane.b32.xlu0 %v5810_v7, %s5665_s27  ;;  %v6182_v7 = vsub.s32 3, %v5803_v0 }
 0x804   :  { %1920 = vadd.xlane.f32.xlu1 %v1919_v32  ;;  %v613_v32 = vrot.slane %v5982_v6, %v6182_v7 }
 0x815   :  { %2044 = vrot.lane.b32.xlu1 %v5808_v5, %s5665_s27 }
 0x85c   :  { %v1032_v45 = vpop.xlane.xlu1 %1031 }
 0x85d   :  { %5532 = vrcp.f32 %v1032_v45  ;;  %v592_v45 = vrot.slane %v5982_v6, %v5813_v8 }
 0x860   :  { %v1631_v56 = vpop.permute.xlu1 %1630 }
 0x867   :  { %v5533_v40 = vpop.eup %5532 }
 0x868   :  { %v1034_v51 = vmul.f32 %v5533_v40, %v5527_v15  ;;  %v620_v40 = vrot.slane %v5982_v6, %v6190_v39 }
 0x86a   :  { %v1045_v52 = vrot.slane %v1034_v51, %v6141_v25  ;;  %v1038_v28 = vrot.slane %v1034_v51, %v5813_v8  ;;  %v1059_v5 = vrot.slane %v1034_v51, %v6182_v7  ;;  %v1052_v30 = vrot.slane %v1034_v51, %v6185_v54 }
 0x86b   :  { %v1066_v59 = vrot.slane %v1034_v51, %v6190_v39  ;;  %v1073_v42 = vrot.slane %v1034_v51, %v6198_v43  ;;  %v1080_v53 = vrot.slane %v1034_v51, %v6205_v63  ;;  %v1087_v36 = vrot.slane %v1034_v51, %v6216_v20 }
 0x86c   :  { %v1507_v41 = vpop.xlane.xlu0 %1506  ;;  %1047 = vbcast.lane.b32.xlu0 %v1045_v52, 256  ;;  %1040 = vbcast.lane.b32.xlu1 %v1038_v28, 256  ;;  %v627_v52 = vrot.slane %v5982_v6, %v6198_v43 }
 0x86d   :  { %5534 = vrcp.f32 %v1507_v41  ;;  %v634_v41 = vrot.slane %v5982_v6, %v6205_v63 }
 0x870   :  { %v1156_v55 = vpop.permute.xlu0 %1155  ;;  %1061 = vbcast.lane.b32.xlu0 %v1059_v5, 256  ;;  %1054 = vbcast.lane.b32.xlu1 %v1052_v30, 256  ;;  %v641_v30 = vrot.slane %v5982_v6, %v6216_v20 }
 0x871   :  { %5201 = vmatpush3.msra.mxu0 %v1156_v55 }
 0x872   :  { %5203 = vmatmul.mubr.msk.f32.vlgmr.msra.gmra.mrb[2].mxu0 %vm577_vm1, %v1034_v51  ;;  %5210 = vmatprep.subr.mxu0 %v7074_v17  ;;  %v606_v51 = vrot.slane %v5982_v6, %v6185_v54 }
 0x873   :  { %5211 = vmatpush3.msra.mxu0 %v1631_v56  ;;  %5212 = vmatprep.mubr.msk.f32.mxu0 %vm5659_vm8, %v7074_v17 }
 0x874   :  { %1068 = vbcast.lane.b32.xlu0 %v1066_v59, 256  ;;  %5220 = vmatprep.subr.mxu0 %v7074_v17 }
 0x877   :  { %v5535_v62 = vpop.eup %5534 }
 0x878   :  { %v6202_v10 = vmul.f32 %v5535_v62, %v5529_v57  ;;  %1075 = vbcast.lane.b32.xlu0 %v1073_v42, 256 }
 0x87a   :  { %5213 = vmatmul.mubr.msk.f32.vlgmr.msra.gmra.mrb[4].mxu0 %vm577_vm1, %v6202_v10  ;;  %v1513_v47 = vrot.slane %v6202_v10, %v5813_v8  ;;  %v1520_v28 = vrot.slane %v6202_v10, %v6141_v25  ;;  %v1527_v5 = vrot.slane %v6202_v10, %v6185_v54  ;;  %v1534_v55 = vrot.slane %v6202_v10, %v6182_v7 }
 0x87b   :  { %5222 = vmatprep.mubr.msk.f32.mxu0 %vm5659_vm8, %v7074_v17  ;;  %v1562_v56 = vrot.slane %v6202_v10, %v6216_v20  ;;  %v1541_v59 = vrot.slane %v6202_v10, %v6190_v39  ;;  %v1548_v42 = vrot.slane %v6202_v10, %v6198_v43  ;;  %v1555_v6 = vrot.slane %v6202_v10, %v6205_v63 }
 0x87c   :  { %1082 = vbcast.lane.b32.xlu0 %v1080_v53, 256 }
 0x891   :  { %v1921_v21 = vpop.xlane.xlu1 %1920 }
 0x892   :  { %5536 = vrcp.f32 %v1921_v21 }
 0x895   :  { %v2045_v14 = vpop.permute.xlu1 %2044 }
 0x896   :  { %5221 = vmatpush3.msra.mxu0 %v2045_v14 }
 0x89c   :  { %v5537_v58 = vpop.eup %5536 }
 0x89d   :  { %v1923_v49 = vmul.f32 %v5537_v58, %v5531_v4 }
 0x89f   :  { %5223 = vmatmul.mubr.msk.f32.vlgmr.msra.gmra.mrb[6].mxu0 %vm577_vm1, %v1923_v49  ;;  %v1934_v15 = vrot.slane %v1923_v49, %v6141_v25  ;;  %v1927_v22 = vrot.slane %v1923_v49, %v5813_v8  ;;  %v1941_v23 = vrot.slane %v1923_v49, %v6185_v54  ;;  %v1948_v57 = vrot.slane %v1923_v49, %v6182_v7 }
 0x8a0   :  { %v1976_v48 = vrot.slane %v1923_v49, %v6216_v20  ;;  %v1955_v24 = vrot.slane %v1923_v49, %v6190_v39  ;;  %v1962_v0 = vrot.slane %v1923_v49, %v6198_v43  ;;  %v1969_v4 = vrot.slane %v1923_v49, %v6205_v63 }
 0x8a1   :  { %1936 = vbcast.lane.b32.xlu1 %v1934_v15, 256  ;;  %1929 = vbcast.lane.b32.xlu0 %v1927_v22, 256 }
 0x8a5   :  { %1943 = vbcast.lane.b32.xlu1 %v1941_v23, 256  ;;  %1089 = vbcast.lane.b32.xlu0 %v1087_v36, 256 }
 0x8a9   :  { %1950 = vbcast.lane.b32.xlu1 %v1948_v57, 256  ;;  %1978 = vbcast.lane.b32.xlu0 %v1976_v48, 256 }
 0x8ad   :  { %1957 = vbcast.lane.b32.xlu1 %v1955_v24, 256  ;;  %601 = vbcast.lane.b32.xlu0 %v599_v29, 256 }
 0x8b1   :  { %1964 = vbcast.lane.b32.xlu1 %v1962_v0, 256  ;;  %1515 = vbcast.lane.b32.xlu0 %v1513_v47, 256 }
 0x8b5   :  { %1971 = vbcast.lane.b32.xlu1 %v1969_v4, 256  ;;  %615 = vbcast.lane.b32.xlu0 %v613_v32, 256 }
 0x8b9   :  { %594 = vbcast.lane.b32.xlu1 %v592_v45, 256  ;;  %622 = vbcast.lane.b32.xlu0 %v620_v40, 256 }
 0x8bd   :  { %608 = vbcast.lane.b32.xlu1 %v606_v51, 256  ;;  %629 = vbcast.lane.b32.xlu0 %v627_v52, 256 }
 0x8c1   :  { %1522 = vbcast.lane.b32.xlu1 %v1520_v28, 256  ;;  %636 = vbcast.lane.b32.xlu0 %v634_v41, 256 }
 0x8c5   :  { %1529 = vbcast.lane.b32.xlu1 %v1527_v5, 256  ;;  %643 = vbcast.lane.b32.xlu0 %v641_v30, 256 }
 0x8c9   :  { %1536 = vbcast.lane.b32.xlu1 %v1534_v55, 256  ;;  %1564 = vbcast.lane.b32.xlu0 %v1562_v56, 256 }
 0x8cd   :  { %1543 = vbcast.lane.b32.xlu1 %v1541_v59, 256 }
 0x8d1   :  { %1550 = vbcast.lane.b32.xlu1 %v1548_v42, 256 }
 0x8d5   :  { %1557 = vbcast.lane.b32.xlu1 %v1555_v6, 256 }
 0x8de   :  { %v1048_v62 = vpop.permute.xlu0 %1047  ;;  %v1041_v58 = vpop.permute.xlu1 %1040 }
 0x8df   :  { %v1092_v23 = vmul.f32 %v1048_v62, %v5835_v19  ;;  %v1091_v36 = vmul.f32 %v1041_v58, %v5825_v13 }
 0x8e1   :  { %v1106_v48 = vsel %vm420_vm9, %v1092_v23, 0.0  ;;  %v1099_v10 = vsel %vm420_vm9, %v1091_v36, 0.0 }
 0x8e2   :  { %v1062_v53 = vpop.permute.xlu0 %1061  ;;  %v1055_v15 = vpop.permute.xlu1 %1054  ;;  %v1107_v32 = vrot.slane %v1106_v48, 4  ;;  %v1100_v45 = vrot.slane %v1099_v10, 4 }
 0x8e3   :  { %v1093_v57 = vmul.f32 %v1055_v15, %v5852_v27  ;;  %v1094_v24 = vmul.f32 %v1062_v53, %v5875_v38 }
 0x8e4   :  { %v1108_v52 = vadd.f32 %v1107_v32, %v1106_v48  ;;  %v1101_v28 = vadd.f32 %v1100_v45, %v1099_v10 }
 0x8e5   :  { %v1113_v29 = vsel %vm420_vm9, %v1093_v57, 0.0  ;;  %v1120_v13 = vsel %vm420_vm9, %v1094_v24, 0.0 }
 0x8e6   :  { %v1069_v21 = vpop.permute.xlu0 %1068  ;;  %v1114_v27 = vrot.slane %v1113_v29, 4  ;;  %v1121_v41 = vrot.slane %v1120_v13, 4  ;;  %v1109_v56 = vrot.slane %v1108_v52, 2  ;;  %v1102_v59 = vrot.slane %v1101_v28, 2 }
 0x8e7   :  { %v1095_v0 = vmul.f32 %v1069_v21, %v5863_v33 }
 0x8e8   :  { %v1115_v5 = vadd.f32 %v1114_v27, %v1113_v29  ;;  %v1122_v42 = vadd.f32 %v1121_v41, %v1120_v13  ;;  %v1110_v58 = vadd.f32 %v1109_v56, %v1108_v52 }
 0x8e9   :  { %v1127_v51 = vsel %vm420_vm9, %v1095_v0, 0.0 }
 0x8ea   :  { %v1076_v14 = vpop.permute.xlu0 %1075  ;;  %v1123_v15 = vrot.slane %v1122_v42, 2  ;;  %v1111_v24 = vrot.slane %v1110_v58, 1 }
 0x8eb   :  { %v1096_v4 = vmul.f32 %v1076_v14, %v5886_v44  ;;  %v1128_v44 = vrot.slane %v1127_v51, 4 }
 0x8ec   :  { %v1124_v0 = vadd.f32 %v1123_v15, %v1122_v42  ;;  %v1112_v27 = vadd.f32 %v1111_v24, %v1110_v58  ;;  %v6292_v24 = vld [vmem:[%s7067_s3] sm:$0xff] }
 0x8ed   :  { %v1134_v38 = vsel %vm420_vm9, %v1096_v4, 0.0  ;;  %v1129_v62 = vadd.f32 %v1128_v44, %v1127_v51 }
 0x8ee   :  { %v1083_v49 = vpop.permute.xlu0 %1082  ;;  %v1135_v55 = vrot.slane %v1134_v38, 4  ;;  %v1125_v51 = vrot.slane %v1124_v0, 1 }
 0x8ef   :  { %v1097_v19 = vmul.f32 %v1083_v49, %v5894_v46  ;;  %v1103_v49 = vadd.f32 %v1102_v59, %v1101_v28  ;;  %v1130_v57 = vrot.slane %v1129_v62, 2 }
 0x8f0   :  { %v1136_v53 = vadd.f32 %v1135_v55, %v1134_v38 }
 0x8f1   :  { %v1141_v33 = vsel %vm420_vm9, %v1097_v19, 0.0  ;;  %v1104_v29 = vrot.slane %v1103_v49, 1  ;;  %v1131_v45 = vadd.f32 %v1130_v57, %v1129_v62 }
 0x8f2   :  { %v1142_v46 = vrot.slane %v1141_v33, 4  ;;  %v1137_v48 = vrot.slane %v1136_v53, 2 }
 0x8f3   :  { %v1132_v28 = vrot.slane %v1131_v45, 1 }
 0x8f4   :  { %v1143_v14 = vadd.f32 %v1142_v46, %v1141_v33  ;;  %v1138_v19 = vadd.f32 %v1137_v48, %v1136_v53  ;;  %v2141_v48 = vld [vmem:[%s7069_s5] sm:$0xff] }
 0x8f5   :  { %v1133_v46 = vadd.f32 %v1132_v28, %v1131_v45  ;;  %v2144_v45 = vld [vmem:[%s7069_s5 + $0x18] sm:$0xff] }
 0x8f6   :  { %v1144_v10 = vrot.slane %v1143_v14, 2  ;;  %v1139_v41 = vrot.slane %v1138_v19, 1 }
 0x8f8   :  { %v1145_v13 = vadd.f32 %v1144_v10, %v1143_v14  ;;  %v1140_v59 = vadd.f32 %v1139_v41, %v1138_v19  ;;  %v2142_v10 = vld [vmem:[%s7069_s5 + $0x8] sm:$0xff]  ;;  %v6311_v19 = vld [vmem:[%s7067_s3 + $0x10] sm:$0xff] }
 0x913   :  { %v6257_v22 = vpop.permute.xlu0 %1929  ;;  %v1937_v21 = vpop.permute.xlu1 %1936 }
 0x917   :  { %v1090_v47 = vpop.permute.xlu0 %1089  ;;  %v1944_v4 = vpop.permute.xlu1 %1943 }
 0x918   :  { %v1098_v40 = vmul.f32 %v1090_v47, %v5905_v50  ;;  %v1116_v50 = vrot.slane %v1115_v5, 2 }
 0x91a   :  { %v1148_v30 = vsel %vm420_vm9, %v1098_v40, 0.0  ;;  %v1117_v36 = vadd.f32 %v1116_v50, %v1115_v5  ;;  %v1105_v40 = vadd.f32 %v1104_v29, %v1103_v49  ;;  %v1146_v5 = vrot.slane %v1145_v13, 1 }
 0x91b   :  { %v1149_v6 = vrot.slane %v1148_v30, 4  ;;  %v1951_v33 = vpop.permute.xlu1 %1950  ;;  %v1980_v29 = vmul.f32 %v6292_v24, %v6257_v22  ;;  %v1982_v22 = vmul.f32 %v6311_v19, %v1944_v4 }
 0x91c   :  { %v1118_v32 = vrot.slane %v1117_v36, 1  ;;  %v1166_v44 = vsel %vm487_vm10, %v1112_v27, %v1105_v40  ;;  %v1147_v42 = vadd.f32 %v1146_v5, %v1145_v13  ;;  %v5404_v13 = vpack.c.bf16 %v2142_v10, %v2141_v48 }
 0x91d   :  { %v1150_v23 = vadd.f32 %v1149_v6, %v1148_v30  ;;  %v1126_v30 = vadd.f32 %v1125_v51, %v1124_v0  ;;  %v6299_v0 = vld [vmem:[%s7067_s3 + $0x8] sm:$0xff]  ;;  %v1988_v41 = vsel %vm420_vm9, %v1980_v29, 0.0 }
 0x91e   :  { %v1119_v52 = vadd.f32 %v1118_v32, %v1117_v36  ;;  %v2143_v32 = vld [vmem:[%s7069_s5 + $0x10] sm:$0xff]  ;;  %5405 = vmatprep.subr.bf16.mxu1 %v5404_v13 }
 0x91f   :  { %v1151_v47 = vrot.slane %v1150_v23, 2  ;;  %v1958_v6 = vpop.permute.xlu1 %1957  ;;  %v5408_v4 = vpack.c.bf16 %v2144_v45, %v2143_v32  ;;  %5407 = vmatpush3.bf16.msra.mxu1 %v5404_v13 }
 0x920   :  { %v1167_v56 = vsel %vm489_vm11, %v1119_v52, %v1166_v44 }
 0x921   :  { %v1152_v38 = vadd.f32 %v1151_v47, %v1150_v23  ;;  %v1168_v62 = vsel %vm491_vm12, %v1126_v30, %v1167_v56  ;;  %v1981_v47 = vmul.f32 %v6299_v0, %v1937_v21  ;;  %v6317_v21 = vld [vmem:[%s7067_s3 + $0x18] sm:$0xff]  ;;  %v2002_v30 = vsel %vm420_vm9, %v1982_v22, 0.0  ;;  %5409 = vmatprep.subr.bf16.mxu1 %v5408_v4 }
 0x922   :  { %v1169_v53 = vsel %vm493_vm13, %v1133_v46, %v1168_v62  ;;  %v1983_v27 = vmul.f32 %v6317_v21, %v1951_v33  ;;  %v6333_v33 = vld [vmem:[%s7067_s3 + $0x28] sm:$0xff]  ;;  %v2003_v62 = vrot.slane %v2002_v30, 4 }
 0x923   :  { %v1153_v55 = vrot.slane %v1152_v38, 1  ;;  %v1170_v14 = vsel %vm495_vm14, %v1140_v59, %v1169_v53  ;;  %v1965_v57 = vpop.permute.xlu1 %1964  ;;  %v1995_v5 = vsel %vm420_vm9, %v1981_v47, 0.0  ;;  %v1989_v59 = vrot.slane %v1988_v41, 4  ;;  %5411 = vmatpush3.bf16.msra.mxu1 %v5408_v4 }
 0x924   :  { %v1171_v58 = vsel %vm497_vm15, %v1147_v42, %v1170_v14  ;;  %v1985_v44 = vmul.f32 %v6333_v33, %v1965_v57  ;;  %v2009_v56 = vsel %vm420_vm9, %v1983_v27, 0.0  ;;  %v1996_v42 = vrot.slane %v1995_v5, 4 }
 0x925   :  { %v1154_v50 = vadd.f32 %v1153_v55, %v1152_v38  ;;  %v6325_v38 = vld [vmem:[%s7067_s3 + $0x20] sm:$0xff]  ;;  %v6340_v55 = vld [vmem:[%s7067_s3 + $0x30] sm:$0xff]  ;;  %v2010_v14 = vrot.slane %v2009_v56, 4  ;;  %v2004_v10 = vadd.f32 %v2003_v62, %v2002_v30 }
 0x926   :  { %v1984_v52 = vmul.f32 %v6325_v38, %v1958_v6  ;;  %v1979_v6 = vpop.permute.xlu0 %1978  ;;  %v2023_v53 = vsel %vm420_vm9, %v1985_v44, 0.0  ;;  %v1997_v57 = vadd.f32 %v1996_v42, %v1995_v5 }
 0x927   :  { %v1172_v49 = vsel %vm499_vm0, %v1154_v50, %v1171_v58  ;;  %v1972_v40 = vpop.permute.xlu1 %1971  ;;  %v2024_v48 = vrot.slane %v2023_v53, 4  ;;  %v2011_v47 = vadd.f32 %v2010_v14, %v2009_v56 }
 0x928   :  { %v1986_v46 = vmul.f32 %v6340_v55, %v1972_v40  ;;  %v2016_v50 = vsel %vm420_vm9, %v1984_v52, 0.0  ;;  %v1998_v13 = vrot.slane %v1997_v57, 2  ;;  %v2005_v40 = vrot.slane %v2004_v10, 2 }
 0x929   :  { %v2025_v27 = vadd.f32 %v2024_v48, %v2023_v53  ;;  %v2012_v4 = vrot.slane %v2011_v47, 2 }
 0x92a   :  { %v2030_v58 = vsel %vm420_vm9, %v1986_v46, 0.0 }
 0x92b   :  { %v2031_v29 = vrot.slane %v2030_v58, 4  ;;  %v2026_v17 = vrot.slane %v2025_v27, 2  ;;  %v2013_v30 = vadd.f32 %v2012_v4, %v2011_v47  ;;  %v602_v4 = vpop.permute.xlu0 %601 }
 0x92d   :  { %v2032_v52 = vadd.f32 %v2031_v29, %v2030_v58  ;;  %v2027_v14 = vadd.f32 %v2026_v17, %v2025_v27  ;;  %v2014_v53 = vrot.slane %v2013_v30, 1 }
 0x92f   :  { %v2033_v5 = vrot.slane %v2032_v52, 2  ;;  %v2028_v20 = vrot.slane %v2027_v14, 1 }
 0x931   :  { %v2029_v47 = vadd.f32 %v2028_v20, %v2027_v14  ;;  %v6362_v20 = vpop.permute.xlu0 %1515 }
 0x945   :  { %v1243_v15 = vpop.f32.mrb[2].mxu0 }
 0x946   :  { %v1244_v23 = vadd.f32 %v1243_v15, %v1172_v49  ;;  %v5204_v36 = vpop.f32.mrb[3].mxu0  ;;  %v6350_v49 = vld [vmem:[%s7067_s3 + $0x38] sm:$0xff] }
 0x947   :  { %v1987_v15 = vmul.f32 %v6350_v49, %v1979_v6  ;;  %v1990_v36 = vadd.f32 %v1989_v59, %v1988_v41  ;;  %v1999_v6 = vadd.f32 %v1998_v13, %v1997_v57  ;;  %v2006_v41 = vadd.f32 %v2005_v40, %v2004_v10 }
 0x948   :  { %1248 = vrot.lane.b32.xlu1 %v1244_v23, %s5662_s23  ;;  %v2017_v23 = vrot.slane %v2016_v50, 4 }
 0x949   :  { %v2037_v32 = vsel %vm420_vm9, %v1987_v15, 0.0  ;;  %v1991_v22 = vrot.slane %v1990_v36, 2  ;;  %v2000_v62 = vrot.slane %v1999_v6, 1  ;;  %v2034_v15 = vadd.f32 %v2033_v5, %v2032_v52 }
 0x94a   :  { %v2018_v45 = vadd.f32 %v2017_v23, %v2016_v50  ;;  %v2007_v50 = vrot.slane %v2006_v41, 1 }
 0x94b   :  { %v1992_v46 = vadd.f32 %v1991_v22, %v1990_v36  ;;  %v2001_v29 = vadd.f32 %v2000_v62, %v1999_v6  ;;  %v2035_v36 = vrot.slane %v2034_v15, 1  ;;  %v2015_v22 = vadd.f32 %v2014_v53, %v2013_v30 }
 0x94c   :  { %v2019_v44 = vrot.slane %v2018_v45, 2  ;;  %v2008_v63 = vadd.f32 %v2007_v50, %v2006_v41  ;;  %v646_v50 = vmul.f32 %v6299_v0, %v602_v4 }
 0x94d   :  { %v6320_v51 = vpop.f32.mrb[4].mxu0  ;;  %v1993_v56 = vrot.slane %v1992_v46, 1 }
 0x94e   :  { %v5214_v28 = vpop.f32.mrb[5].mxu0  ;;  %v2020_v42 = vadd.f32 %v2019_v44, %v2018_v45  ;;  %v2036_v45 = vadd.f32 %v2035_v36, %v2034_v15 }
 0x94f   :  { %v2038_v28 = vrot.slane %v2037_v32, 4  ;;  %v1994_v58 = vadd.f32 %v1993_v56, %v1992_v46 }
 0x950   :  { %v2021_v48 = vrot.slane %v2020_v42, 1 }
 0x951   :  { %v2039_v59 = vadd.f32 %v2038_v28, %v2037_v32  ;;  %v2055_v32 = vsel %vm487_vm10, %v2001_v29, %v1994_v58 }
 0x952   :  { %v2022_v10 = vadd.f32 %v2021_v48, %v2020_v42  ;;  %v2056_v13 = vsel %vm489_vm11, %v2008_v63, %v2055_v32  ;;  %v616_v63 = vpop.permute.xlu0 %615  ;;  %v660_v48 = vsel %vm420_vm9, %v646_v50, 0.0 }
 0x953   :  { %v2040_v23 = vrot.slane %v2039_v59, 2  ;;  %v2057_v27 = vsel %vm491_vm12, %v2015_v22, %v2056_v13  ;;  %v648_v58 = vmul.f32 %v6317_v21, %v616_v63 }
 0x954   :  { %v2058_v40 = vsel %vm493_vm13, %v2022_v10, %v2057_v27 }
 0x955   :  { %v2041_v57 = vadd.f32 %v2040_v23, %v2039_v59  ;;  %v2059_v52 = vsel %vm495_vm14, %v2029_v47, %v2058_v40  ;;  %v595_v59 = vpop.permute.xlu1 %594  ;;  %v674_v10 = vsel %vm420_vm9, %v648_v58, 0.0 }
 0x956   :  { %v2060_v28 = vsel %vm497_vm15, %v2036_v45, %v2059_v52  ;;  %v623_v30 = vpop.permute.xlu0 %622  ;;  %v645_v62 = vmul.f32 %v6292_v24, %v595_v59  ;;  %v675_v27 = vrot.slane %v674_v10, 4 }
 0x957   :  { %v2042_v17 = vrot.slane %v2041_v57, 1  ;;  %v649_v22 = vmul.f32 %v6325_v38, %v623_v30 }
 0x958   :  { %v653_v15 = vsel %vm420_vm9, %v645_v62, 0.0  ;;  %v676_v63 = vadd.f32 %v675_v27, %v674_v10 }
 0x959   :  { %v2043_v44 = vadd.f32 %v2042_v17, %v2041_v57  ;;  %v609_v42 = vpop.permute.xlu1 %608  ;;  %v654_v29 = vrot.slane %v653_v15, 4  ;;  %v661_v57 = vrot.slane %v660_v48, 4  ;;  %v681_v40 = vsel %vm420_vm9, %v649_v22, 0.0 }
 0x95a   :  { %v630_v56 = vpop.permute.xlu0 %629  ;;  %v647_v14 = vmul.f32 %v6311_v19, %v609_v42 }
 0x95b   :  { %v2061_v46 = vsel %vm499_vm0, %v2043_v44, %v2060_v28  ;;  %v655_v32 = vadd.f32 %v654_v29, %v653_v15  ;;  %v650_v45 = vmul.f32 %v6333_v33, %v630_v56  ;;  %v662_v17 = vadd.f32 %v661_v57, %v660_v48 }
 0x95c   :  { %v667_v23 = vsel %vm420_vm9, %v647_v14, 0.0 }
 0x95d   :  { %v668_v36 = vrot.slane %v667_v23, 4  ;;  %v656_v4 = vrot.slane %v655_v32, 2  ;;  %v1523_v44 = vpop.permute.xlu1 %1522 }
 0x95e   :  { %v637_v53 = vpop.permute.xlu0 %636 }
 0x95f   :  { %v669_v13 = vadd.f32 %v668_v36, %v667_v23  ;;  %v651_v52 = vmul.f32 %v6340_v55, %v637_v53  ;;  %v657_v42 = vadd.f32 %v656_v4, %v655_v32  ;;  %v677_v23 = vrot.slane %v676_v63, 2 }
 0x961   :  { %v695_v59 = vsel %vm420_vm9, %v651_v52, 0.0  ;;  %v1530_v48 = vpop.permute.xlu1 %1529  ;;  %v658_v58 = vrot.slane %v657_v42, 1  ;;  %v678_v10 = vadd.f32 %v677_v23, %v676_v63 }
 0x962   :  { %v644_v47 = vpop.permute.xlu0 %643  ;;  %v696_v50 = vrot.slane %v695_v59, 4 }
 0x963   :  { %v652_v28 = vmul.f32 %v6350_v49, %v644_v47  ;;  %v659_v27 = vadd.f32 %v658_v58, %v657_v42 }
 0x964   :  { %v697_v22 = vadd.f32 %v696_v50, %v695_v59 }
 0x965   :  { %v702_v30 = vsel %vm420_vm9, %v652_v28, 0.0  ;;  %v1537_v28 = vpop.permute.xlu1 %1536 }
 0x966   :  { %v703_v53 = vrot.slane %v702_v30, 4 }
 0x969   :  { %v1544_v63 = vpop.permute.xlu1 %1543 }
 0x96d   :  { %v1551_v58 = vpop.permute.xlu1 %1550 }
 0x972   :  { %v2132_v6 = vpop.f32.mrb[6].mxu0 }
 0x973   :  { %v2133_v41 = vadd.f32 %v2132_v6, %v2061_v46  ;;  %v5224_v5 = vpop.f32.mrb[7].mxu0  ;;  %v682_v46 = vrot.slane %v681_v40, 4  ;;  %v688_v6 = vsel %vm420_vm9, %v650_v45, 0.0  ;;  %v704_v45 = vadd.f32 %v703_v53, %v702_v30 }
 0x974   :  { %v663_v5 = vrot.slane %v662_v17, 2  ;;  %v689_v56 = vrot.slane %v688_v6, 4 }
 0x975   :  { %2137 = vrot.lane.b32.xlu0 %v2133_v41, %s5662_s23  ;;  %v670_v41 = vrot.slane %v669_v13, 2  ;;  %v683_v62 = vadd.f32 %v682_v46, %v681_v40  ;;  %v698_v40 = vrot.slane %v697_v22, 2  ;;  %v679_v46 = vrot.slane %v678_v10, 1 }
 0x976   :  { %v664_v15 = vadd.f32 %v663_v5, %v662_v17  ;;  %v690_v29 = vadd.f32 %v689_v56, %v688_v6  ;;  %v705_v17 = vrot.slane %v704_v45, 2 }
 0x977   :  { %v671_v14 = vadd.f32 %v670_v41, %v669_v13  ;;  %v684_v36 = vrot.slane %v683_v62, 2  ;;  %v699_v56 = vadd.f32 %v698_v40, %v697_v22  ;;  %v680_v59 = vadd.f32 %v679_v46, %v678_v10  ;;  %v1558_v22 = vpop.permute.xlu1 %1557 }
 0x978   :  { %v665_v47 = vrot.slane %v664_v15, 1  ;;  %v691_v52 = vrot.slane %v690_v29, 2  ;;  %v706_v50 = vadd.f32 %v705_v17, %v704_v45  ;;  %v1569_v40 = vmul.f32 %v6317_v21, %v1537_v28 }
 0x979   :  { %v672_v57 = vrot.slane %v671_v14, 1  ;;  %v685_v32 = vadd.f32 %v684_v36, %v683_v62  ;;  %v700_v62 = vrot.slane %v699_v56, 1 }
 0x97a   :  { %v666_v13 = vadd.f32 %v665_v47, %v664_v15  ;;  %v692_v5 = vadd.f32 %v691_v52, %v690_v29  ;;  %v1567_v52 = vmul.f32 %v6299_v0, %v1523_v44 }
 0x97b   :  { %v673_v4 = vadd.f32 %v672_v57, %v671_v14  ;;  %v686_v43 = vrot.slane %v685_v32, 1  ;;  %v707_v14 = vrot.slane %v706_v50, 1  ;;  %v701_v36 = vadd.f32 %v700_v62, %v699_v56 }
 0x97c   :  { %v720_v41 = vsel %vm487_vm10, %v666_v13, %v659_v27  ;;  %v693_v30 = vrot.slane %v692_v5, 1  ;;  %v1570_v13 = vmul.f32 %v6325_v38, %v1544_v63  ;;  %v1581_v46 = vsel %vm420_vm9, %v1567_v52, 0.0 }
 0x97d   :  { %v721_v6 = vsel %vm489_vm11, %v673_v4, %v720_v41  ;;  %v687_v23 = vadd.f32 %v686_v43, %v685_v32  ;;  %v708_v57 = vadd.f32 %v707_v14, %v706_v50  ;;  %v1568_v32 = vmul.f32 %v6311_v19, %v1530_v48 }
 0x97e   :  { %v722_v42 = vsel %vm491_vm12, %v680_v59, %v721_v6  ;;  %v694_v53 = vadd.f32 %v693_v30, %v692_v5  ;;  %v1566_v4 = vmul.f32 %v6292_v24, %v6362_v20  ;;  %v1572_v41 = vmul.f32 %v6340_v55, %v1558_v22  ;;  %v1565_v6 = vpop.permute.xlu0 %1564 }
 0x97f   :  { %v723_v15 = vsel %vm493_vm13, %v687_v23, %v722_v42  ;;  %v1588_v17 = vsel %vm420_vm9, %v1568_v32, 0.0  ;;  %v1595_v5 = vsel %vm420_vm9, %v1569_v40, 0.0  ;;  %v1582_v48 = vrot.slane %v1581_v46, 4 }
 0x980   :  { %v724_v29 = vsel %vm495_vm14, %v694_v53, %v723_v15  ;;  %v1574_v44 = vsel %vm420_vm9, %v1566_v4, 0.0  ;;  %v1602_v20 = vsel %vm420_vm9, %v1570_v13, 0.0  ;;  %v1589_v56 = vrot.slane %v1588_v17, 4 }
 0x981   :  { %v725_v47 = vsel %vm497_vm15, %v701_v36, %v724_v29  ;;  %v1575_v38 = vrot.slane %v1574_v44, 4  ;;  %v1596_v59 = vrot.slane %v1595_v5, 4  ;;  %v1616_v50 = vsel %vm420_vm9, %v1572_v41, 0.0 }
 0x982   :  { %v726_v10 = vsel %vm499_vm0, %v708_v57, %v725_v47  ;;  %v1573_v63 = vmul.f32 %v6350_v49, %v1565_v6  ;;  %v1603_v30 = vrot.slane %v1602_v20, 4  ;;  %v1583_v42 = vadd.f32 %v1582_v48, %v1581_v46 }
 0x983   :  { %v798_v45 = vadd.f32 %v6104_v37, %v726_v10  ;;  %v1571_v37 = vmul.f32 %v6333_v33, %v1551_v58  ;;  %v1590_v23 = vadd.f32 %v1589_v56, %v1588_v17  ;;  %v1617_v62 = vrot.slane %v1616_v50, 4 }
 0x984   :  { %v1576_v14 = vadd.f32 %v1575_v38, %v1574_v44  ;;  %v1597_v15 = vadd.f32 %v1596_v59, %v1595_v5  ;;  %v1623_v53 = vsel %vm420_vm9, %v1573_v63, 0.0  ;;  %v1604_v58 = vadd.f32 %v1603_v30, %v1602_v20 }
 0x985   :  { %v1609_v28 = vsel %vm420_vm9, %v1571_v37, 0.0  ;;  %v1584_v36 = vrot.slane %v1583_v42, 2  ;;  %v1591_v29 = vrot.slane %v1590_v23, 2  ;;  %v1618_v47 = vadd.f32 %v1617_v62, %v1616_v50 }
 0x986   :  { %v1610_v55 = vrot.slane %v1609_v28, 4  ;;  %v1577_v22 = vrot.slane %v1576_v14, 2  ;;  %v1624_v10 = vrot.slane %v1623_v53, 4 }
 0x987   :  { %v1592_v52 = vadd.f32 %v1591_v29, %v1590_v23  ;;  %v1619_v32 = vrot.slane %v1618_v47, 2 }
 0x988   :  { %v1611_v57 = vadd.f32 %v1610_v55, %v1609_v28  ;;  %v1578_v4 = vadd.f32 %v1577_v22, %v1576_v14  ;;  %v1625_v40 = vadd.f32 %v1624_v10, %v1623_v53 }
 0x989   :  { %v1593_v41 = vrot.slane %v1592_v52, 1  ;;  %v1620_v44 = vadd.f32 %v1619_v32, %v1618_v47 }
 0x98a   :  { %v1612_v49 = vrot.slane %v1611_v57, 2  ;;  %v1579_v5 = vrot.slane %v1578_v4, 1  ;;  %v1626_v48 = vrot.slane %v1625_v40, 2 }
 0x98b   :  { %v1594_v38 = vadd.f32 %v1593_v41, %v1592_v52  ;;  %v1621_v59 = vrot.slane %v1620_v44, 1 }
 0x98c   :  { %v1613_v17 = vadd.f32 %v1612_v49, %v1611_v57  ;;  %v1580_v50 = vadd.f32 %v1579_v5, %v1578_v4  ;;  %v1627_v63 = vadd.f32 %v1626_v48, %v1625_v40 }
 0x98d   :  { %v1622_v62 = vadd.f32 %v1621_v59, %v1620_v44  ;;  %v2273_v59 = vld [vmem:[%s7070_s6 + $0x18] sm:$0xff] }
 0x98e   :  { %v1614_v28 = vrot.slane %v1613_v17, 1 }
 0x990   :  { %v1615_v23 = vadd.f32 %v1614_v28, %v1613_v17  ;;  %v2272_v28 = vld [vmem:[%s7070_s6 + $0x10] sm:$0xff] }
 0x9ba   :  { %v1249_v27 = vpop.permute.xlu1 %1248 }
 0x9bb   :  { %v1251_v43 = vsel %vm420_vm9, %v798_v45, %v1249_v27  ;;  %v1598_v45 = vrot.slane %v1597_v15, 2  ;;  %v1605_v27 = vrot.slane %v1604_v58, 2 }
 0x9bc   :  { %5233 = vmatprep.mubr.msk.f32.mxu1 %vm166_vm7, %v1251_v43  ;;  %v1585_v43 = vadd.f32 %v1584_v36, %v1583_v42 }
 0x9bd   :  { %v1599_v13 = vadd.f32 %v1598_v45, %v1597_v15  ;;  %v1606_v46 = vadd.f32 %v1605_v27, %v1604_v58  ;;  %v1628_v15 = vrot.slane %v1627_v63, 1  ;;  %v4979_v27 = vld [vmem:[#allocation2 + $0x3] ss:$0 sm:$0xff] }
 0x9be   :  { %v1586_v37 = vrot.slane %v1585_v43, 1 }
 0x9bf   :  { %v1600_v6 = vrot.slane %v1599_v13, 1  ;;  %v1607_v20 = vrot.slane %v1606_v46, 1  ;;  %v1629_v29 = vadd.f32 %v1628_v15, %v1627_v63  ;;  %v4982_v15 = vld [vmem:[#allocation2 + $0x4] ss:$0 sm:$0xff] }
 0x9c0   :  { %v1587_v56 = vadd.f32 %v1586_v37, %v1585_v43 }
 0x9c1   :  { %v1601_v30 = vadd.f32 %v1600_v6, %v1599_v13  ;;  %v1608_v42 = vadd.f32 %v1607_v20, %v1606_v46 }
 0x9c2   :  { %v1641_v55 = vsel %vm487_vm10, %v1587_v56, %v1580_v50  ;;  %v2271_v56 = vld [vmem:[%s7070_s6 + $0x8] sm:$0xff]  ;;  %v5416_v50 = vpack.c.bf16 %v2273_v59, %v2272_v28 }
 0x9c3   :  { %v1642_v14 = vsel %vm489_vm11, %v1594_v38, %v1641_v55 }
 0x9c4   :  { %v1643_v53 = vsel %vm491_vm12, %v1601_v30, %v1642_v14 }
 0x9c5   :  { %v1644_v58 = vsel %vm493_vm13, %v1608_v42, %v1643_v53 }
 0x9c6   :  { %v1645_v36 = vsel %vm495_vm14, %v1615_v23, %v1644_v58  ;;  %v4983_v58 = vld [vmem:[#allocation2 + $0x5] ss:$0 sm:$0xff] }
 0x9c7   :  { %v1646_v57 = vsel %vm497_vm15, %v1622_v62, %v1645_v36 }
 0x9c8   :  { %v1647_v47 = vsel %vm499_vm0, %v1629_v29, %v1646_v57 }
 0x9c9   :  { %v1719_v22 = vadd.f32 %v6320_v51, %v1647_v47 }
 0x9e7   :  { %v2138_v10 = vpop.permute.xlu0 %2137 }
 0x9e8   :  { %v2140_v45 = vsel %vm420_vm9, %v1719_v22, %v2138_v10 }
 0x9e9   :  { %5234 = vmatmul.mubr.msk.f32.vlgmr.msra.gmra.mrb[12].mxu1 %vm166_vm7, %v2140_v45  ;;  %v2377_v45 = vld [vmem:[%s7071_s7] sm:$0xff] }
 0xabc   :  { %v5235_v43 = vpop.f32.mrb[12].mxu1 }
 0xabd   :  { %v2227_v49 = vadd.f32 %v5235_v43, %v4979_v27  ;;  %v2221_v52 = vpop.f32.mrb[13].mxu1  ;;  %v2379_v43 = vld [vmem:[%s7071_s7 + $0x10] sm:$0xff] }
 0xabe   :  { %v2222_v32 = vadd.f32 %v4979_v27, %v2221_v52  ;;  %v2378_v27 = vld [vmem:[%s7071_s7 + $0x8] sm:$0xff]  ;;  %v2380_v52 = vld [vmem:[%s7071_s7 + $0x18] sm:$0xff] }
 0xabf   :  { %v2231_v4 = vadd.f32 %v2227_v49, %v5792_v61  ;;  %v5420_v49 = vpack.c.bf16 %v2378_v27, %v2377_v45 }
 0xac0   :  { %v2230_v40 = vadd.f32 %v2222_v32, %v5790_v60  ;;  %v2270_v60 = vld [vmem:[%s7070_s6] sm:$0xff]  ;;  %v5424_v32 = vpack.c.bf16 %v2380_v52, %v2379_v43 }
 0xac1   :  { %v2235_v13 = vsel %vm166_vm7, %v2231_v4, 0.0  ;;  %v5412_v38 = vpack.c.bf16 %v2271_v56, %v2270_v60  ;;  %5421 = vmatprep.subr.bf16.mxu1 %v5420_v49 }
 0xac2   :  { %2236 = vadd.xlane.f32.xlu0 %v2235_v13  ;;  %v2232_v46 = vsel %vm166_vm7, %v2230_v40, 0.0  ;;  %5423 = vmatpush3.bf16.msra.mxu1 %v5420_v49 }
 0xac3   :  { %2233 = vadd.xlane.f32.xlu1 %v2232_v46  ;;  %5413 = vmatprep.subr.bf16.mxu0 %v5412_v38  ;;  %v2383_v46 = vld [vmem:[%s7071_s7 + $0x30] sm:$0xff] }
 0xac4   :  { %5415 = vmatpush3.bf16.msra.mxu0 %v5412_v38  ;;  %5425 = vmatprep.subr.bf16.mxu1 %v5424_v32 }
 0xac5   :  { %5417 = vmatprep.subr.bf16.mxu0 %v5416_v50 }
 0xac6   :  { %5427 = vmatpush3.bf16.msra.mxu1 %v5424_v32 }
 0xac8   :  { %5419 = vmatpush3.bf16.msra.mxu0 %v5416_v50 }
 0xb4f   :  { %v2237_v51 = vpop.xlane.xlu0 %2236 }
 0xb50   :  { %v2239_v37 = vmul.f32 0.03125, %v2237_v51  ;;  %v2234_v17 = vpop.xlane.xlu1 %2233  ;;  %v2384_v51 = vld [vmem:[%s7071_s7 + $0x38] sm:$0xff] }
 0xb51   :  { %v2238_v41 = vmul.f32 0.03125, %v2234_v17  ;;  %v7085_v17 = vmov 0.0  }
 0xb52   :  { %v2241_v44 = vsub.f32 %v2231_v4, %v2239_v37  ;;  %v2381_v4 = vld [vmem:[%s7071_s7 + $0x20] sm:$0xff]  ;;  %v5432_v37 = vpack.c.bf16 %v2384_v51, %v2383_v46 }
 0xb53   :  { %v2240_v5 = vsub.f32 %v2230_v40, %v2238_v41  ;;  %v2382_v40 = vld [vmem:[%s7071_s7 + $0x28] sm:$0xff]  ;;  %v4984_v41 = vld [vmem:[#allocation2 + $0x6] ss:$0 sm:$0xff] }
 0xb54   :  { %v2243_v20 = vmul.f32 %v2241_v44, %v2241_v44  ;;  %v5428_v13 = vpack.c.bf16 %v2382_v40, %v2381_v4 }
 0xb55   :  { %v2242_v48 = vmul.f32 %v2240_v5, %v2240_v5 }
 0xb56   :  { %v2247_v61 = vsel %vm166_vm7, %v2243_v20, 0.0  ;;  %5429 = vmatprep.subr.bf16.mxu1 %v5428_v13 }
 0xb57   :  { %v2244_v6 = vsel %vm166_vm7, %v2242_v48, 0.0  ;;  %5431 = vmatpush3.bf16.msra.mxu1 %v5428_v13 }
 0xb58   :  { %2245 = vadd.xlane.f32.xlu0 %v2244_v6  ;;  %5433 = vmatprep.subr.bf16.mxu1 %v5432_v37 }
 0xb5b   :  { %5435 = vmatpush3.bf16.msra.mxu1 %v5432_v37 }
 0xb5c   :  { %2248 = vadd.xlane.f32.xlu0 %v2247_v61  ;;  %5287 = vmatprep.subr.mxu1 %v7085_v17 }
 0xbe5   :  { %v2246_v63 = vpop.xlane.xlu0 %2245 }
 0xbe6   :  { %v2250_v30 = vmul.f32 0.03125, %v2246_v63 }
 0xbe8   :  { %v2252_v42 = vadd.f32 1e-12, %v2250_v30 }
 0xbe9   :  { %v2249_v55 = vpop.xlane.xlu0 %2248 }
 0xbea   :  { %5538 = vrsqrt.f32 %v2252_v42  ;;  %v2251_v23 = vmul.f32 0.03125, %v2249_v55 }
 0xbec   :  { %v2253_v62 = vadd.f32 1e-12, %v2251_v23 }
 0xbee   :  { %5540 = vrsqrt.f32 %v2253_v62 }
 0xbf4   :  { %v5539_v14 = vpop.eup %5538 }
 0xbf5   :  { %v2256_v53 = vmul.f32 %v5539_v14, %v2240_v5 }
 0xbf7   :  { %v2262_v36 = vmul.f32 %v4982_v15, %v2256_v53 }
 0xbf8   :  { %v5541_v57 = vpop.eup %5540 }
 0xbf9   :  { %v2257_v29 = vmul.f32 %v5541_v57, %v2241_v44  ;;  %v2268_v47 = vadd.f32 %v4983_v58, %v2262_v36  ;;  %v4987_v36 = vld [vmem:[#allocation2 + $0x7] ss:$0 sm:$0xff] }
 0xbfb   :  { %v2263_v22 = vmul.f32 %v4982_v15, %v2257_v29  ;;  %5244 = vmatprep.mubr.msk.f32.mxu0 %vm166_vm7, %v2268_v47 }
 0xbfd   :  { %v2269_v10 = vadd.f32 %v4983_v58, %v2263_v22 }
 0xbff   :  { %5245 = vmatmul.mubr.msk.f32.vlgmr.msra.gmra.mrb[8].mxu0 %vm166_vm7, %v2269_v10 }
 0xcd2   :  { %v5246_v44 = vpop.f32.mrb[8].mxu0 }
 0xcd3   :  { %v2356_v5 = vadd.f32 %v5246_v44, %v4984_v41  ;;  %v2350_v48 = vpop.f32.mrb[9].mxu0 }
 0xcd4   :  { %v2351_v6 = vadd.f32 %v4984_v41, %v2350_v48  ;;  %v4994_v48 = vld [vmem:[%s7068_s4 + $0x30] sm:$0xff] }
 0xcd5   :  { %v2362_v20 = vmul.f32 0.044715, %v2356_v5  ;;  %v2360_v15 = vmul.f32 0.5, %v2356_v5 }
 0xcd6   :  { %v2361_v61 = vmul.f32 0.044715, %v2351_v6  ;;  %v2359_v62 = vmul.f32 0.5, %v2351_v6 }
 0xcd7   :  { %v2364_v60 = vmul.f32 %v2362_v20, %v2356_v5  ;;  %v4995_v20 = vld [vmem:[%s7068_s4 + $0x38] sm:$0xff] }
 0xcd8   :  { %v2363_v56 = vmul.f32 %v2361_v61, %v2351_v6  ;;  %v5440_v61 = vpack.c.bf16 %v4995_v20, %v4994_v48 }
 0xcd9   :  { %v2366_v28 = vmul.f32 %v2364_v60, %v2356_v5 }
 0xcda   :  { %v2365_v38 = vmul.f32 %v2363_v56, %v2351_v6 }
 0xcdb   :  { %v2368_v59 = vadd.f32 %v2366_v28, %v2356_v5  ;;  %v4993_v5 = vld [vmem:[%s7068_s4 + $0x28] sm:$0xff] }
 0xcdc   :  { %v2367_v50 = vadd.f32 %v2365_v38, %v2351_v6 }
 0xcdd   :  { %v2370_v63 = vmul.f32 0.7978846, %v2368_v59 }
 0xcde   :  { %v2369_v30 = vmul.f32 0.7978846, %v2367_v50 }
 0xcdf   :  { %5542 = vtanh.f32 %v2370_v63 }
 0xce0   :  { %5544 = vtanh.f32 %v2369_v30  ;;  %v4990_v30 = vld [vmem:[#allocation2 + $0x8] ss:$0 sm:$0xff] }
 0xce9   :  { %v5543_v42 = vpop.eup %5542 }
 0xcea   :  { %v5545_v55 = vpop.eup %5544  ;;  %v2374_v23 = vadd.f32 1.0, %v5543_v42 }
 0xceb   :  { %v2373_v14 = vadd.f32 1.0, %v5545_v55 }
 0xcec   :  { %v2376_v58 = vmul.f32 %v2374_v23, %v2360_v15 }
 0xced   :  { %v2375_v53 = vmul.f32 %v2373_v14, %v2359_v62  ;;  %v4991_v62 = vld [vmem:[#allocation2 + $0x9] ss:$0 sm:$0xff] }
 0xcef   :  { %5263 = vmatprep.mubr.msk.f32.mxu1 %vm2389_vm2, %v2375_v53 }
 0xcf0   :  { %5264 = vmatmul.mubr.msk.f32.vlgmr.msra.gmra.mrb[14].mxu1 %vm2389_vm2, %v2376_v58 }
 0xcf1   :  { %5289 = vmatprep.mubr.msk.f32.mxu1 %vm5659_vm8, %v7085_v17 }
 0xdc3   :  { %v5265_v57 = vpop.f32.mrb[14].mxu1 }
 0xdc4   :  { %v2468_v29 = vadd.f32 %v5265_v57, %v4987_v36  ;;  %v2462_v22 = vpop.f32.mrb[15].mxu1 }
 0xdc5   :  { %v2463_v45 = vadd.f32 %v4987_v36, %v2462_v22  ;;  %v4996_v36 = vld [vmem:[#allocation2 + $0xa] ss:$0 sm:$0xff] }
 0xdc6   :  { %v2472_v27 = vadd.f32 %v2468_v29, %v2269_v10 }
 0xdc7   :  { %v2471_v43 = vadd.f32 %v2463_v45, %v2268_v47  ;;  %v4992_v47 = vld [vmem:[%s7068_s4 + $0x20] sm:$0xff] }
 0xdc8   :  { %v2476_v49 = vsel %vm166_vm7, %v2472_v27, 0.0  ;;  %v5436_v6 = vpack.c.bf16 %v4993_v5, %v4992_v47 }
 0xdc9   :  { %2477 = vadd.xlane.f32.xlu0 %v2476_v49  ;;  %v2473_v52 = vsel %vm166_vm7, %v2471_v43, 0.0 }
 0xdca   :  { %2474 = vadd.xlane.f32.xlu1 %v2473_v52  ;;  %5437 = vmatprep.subr.bf16.mxu0 %v5436_v6 }
 0xdcb   :  { %5439 = vmatpush3.bf16.msra.mxu0 %v5436_v6 }
 0xdcc   :  { %5441 = vmatprep.subr.bf16.mxu0 %v5440_v61 }
 0xdcf   :  { %5443 = vmatpush3.bf16.msra.mxu0 %v5440_v61 }
 0xdd0   :  { %5277 = vmatprep.subr.mxu0 %v7085_v17 }
 0xe56   :  { %v2478_v32 = vpop.xlane.xlu0 %2477 }
 0xe57   :  { %v2480_v4 = vmul.f32 0.03125, %v2478_v32  ;;  %v2475_v40 = vpop.xlane.xlu1 %2474 }
 0xe58   :  { %v2479_v13 = vmul.f32 0.03125, %v2475_v40 }
 0xe59   :  { %v2482_v46 = vsub.f32 %v2472_v27, %v2480_v4 }
 0xe5a   :  { %v2481_v51 = vsub.f32 %v2471_v43, %v2479_v13 }
 0xe5b   :  { %v2484_v37 = vmul.f32 %v2482_v46, %v2482_v46 }
 0xe5c   :  { %v2483_v41 = vmul.f32 %v2481_v51, %v2481_v51 }
 0xe5d   :  { %v2488_v44 = vsel %vm166_vm7, %v2484_v37, 0.0 }
 0xe5e   :  { %2489 = vadd.xlane.f32.xlu0 %v2488_v44  ;;  %v2485_v10 = vsel %vm166_vm7, %v2483_v41, 0.0 }
 0xe5f   :  { %2486 = vadd.xlane.f32.xlu1 %v2485_v10 }
 0xeeb   :  { %v2490_v60 = vpop.xlane.xlu0 %2489 }
 0xeec   :  { %v2492_v56 = vmul.f32 0.03125, %v2490_v60  ;;  %v2487_v28 = vpop.xlane.xlu1 %2486 }
 0xeed   :  { %v2491_v38 = vmul.f32 0.03125, %v2487_v28 }
 0xeee   :  { %v2494_v59 = vadd.f32 1e-12, %v2492_v56 }
 0xeef   :  { %v2493_v50 = vadd.f32 1e-12, %v2491_v38 }
 0xef0   :  { %5546 = vrsqrt.f32 %v2494_v59 }
 0xef1   :  { %5548 = vrsqrt.f32 %v2493_v50 }
 0xefa   :  { %v5547_v63 = vpop.eup %5546 }
 0xefb   :  { %v5549_v42 = vpop.eup %5548  ;;  %v2498_v55 = vmul.f32 %v5547_v63, %v2482_v46 }
 0xefc   :  { %v2497_v23 = vmul.f32 %v5549_v42, %v2481_v51 }
 0xefd   :  { %v2504_v14 = vmul.f32 %v4990_v30, %v2498_v55 }
 0xefe   :  { %v2503_v15 = vmul.f32 %v4990_v30, %v2497_v23 }
 0xeff   :  { %v6485_v58 = vadd.f32 %v4991_v62, %v2504_v14 }
 0xf00   :  { %v6483_v53 = vadd.f32 %v4991_v62, %v2503_v15 }
 0xf02   :  { %5274 = vmatprep.mubr.msk.f32.mxu0 %vm166_vm7, %v6483_v53 }
 0xf03   :  { %5275 = vmatmul.mubr.msk.f32.vlgmr.msra.gmra.mrb[10].mxu0 %vm166_vm7, %v6485_v58 }
 0xf04   :  { %5279 = vmatprep.mubr.msk.f32.mxu0 %vm5659_vm8, %v7085_v17 }
 0xfd6   :  { %v5276_v57 = vpop.f32.mrb[10].mxu0 }
 0xfd7   :  { %v6493_v29 = vadd.f32 %v5276_v57, %v4996_v36  ;;  %v2600_v22 = vpop.f32.mrb[11].mxu0 }
 0xfd8   :  { %v6495_v45 = vadd.f32 %v4996_v36, %v2600_v22 }
 0xfd9   :  { %v3506_v27 = vrot.slane %v6493_v29, %v5806_v3  ;;  %v3499_v43 = vcombine.high %v6493_v29, %v6493_v29 }
 0xfda   :  { %3145 = vrot.lane.b32.xlu0 %v6495_v45, %s5661_s22  ;;  %2731 = vrot.lane.b32.xlu1 %v6495_v45, %s5660_s8  ;;  %v2617_v49 = vrot.slane %v6495_v45, %v5806_v3  ;;  %v2610_v22 = vcombine.high %v6495_v45, %v6495_v45 }
 0xfdb   :  { %v3514_v52 = vcombine.high %v3506_v27, %v3506_v27  ;;  %v3513_v40 = vrot.slane %v3499_v43, %v5806_v3  ;;  %v3522_v51 = vrot.slane %v3506_v27, %v5806_v3 }
 0xfdc   :  { %v2625_v32 = vcombine.high %v2617_v49, %v2617_v49  ;;  %v2633_v5 = vrot.slane %v2617_v49, %v5806_v3 }
 0xfdd   :  { %v3536_v4 = vrot.slane %v3514_v52, %v5806_v3  ;;  %v3515_v10 = vcombine.high %v3513_v40, %v3513_v40  ;;  %v6525_v47 = vrot.slane %v3522_v51, %v5813_v8  ;;  %v3544_v56 = vcombine.high %v3522_v51, %v3522_v51 }
 0xfde   :  { %4032 = vrot.lane.b32.xlu0 %v6493_v29, %s5664_s26  ;;  %3143 = vrot.lane.b32.xlu1 %v6495_v45, %s5664_s26  ;;  %v2647_v13 = vrot.slane %v2625_v32, %v5806_v3  ;;  %v2662_v60 = vrot.slane %v2633_v5, %v5813_v8  ;;  %v3529_v50 = vrot.slane %v3513_v40, %v5806_v3 }
 0xfdf   :  { %v6515_v46 = vrot.slane %v3536_v4, %v5813_v8  ;;  %v3546_v44 = vcombine.high %v3536_v4, %v3536_v4  ;;  %v3543_v20 = vrot.slane %v3515_v10, %v5806_v3  ;;  %v3968_v61 = vmul.f32 %v6525_v47, %v5984_v9 }
 0xfe0   :  { %v2666_v41 = vrot.slane %v2647_v13, %v5813_v8  ;;  %v3079_v38 = vmul.f32 %v2662_v60, %v5984_v9  ;;  %v6548_v59 = vrot.slane %v3544_v56, %v5813_v8  ;;  %v6558_v42 = vrot.slane %v3529_v50, %v5813_v8 }
 0xfe1   :  { %v3969_v37 = vmul.f32 %v6515_v46, %v5994_v12  ;;  %v6530_v6 = vrot.slane %v3546_v44, %v5813_v8  ;;  %v2655_v55 = vcombine.high %v2633_v5, %v2633_v5  ;;  %v2699_v57 = vmul.f32 %v6292_v24, %v2662_v60 }
 0xfe2   :  { %3620 = vrot.lane.b32.xlu1 %v6493_v29, %s5660_s8  ;;  %v3080_v48 = vmul.f32 %v2666_v41, %v5994_v12  ;;  %v6542_v12 = vrot.slane %v3543_v20, %v5813_v8  ;;  %v3970_v30 = vmul.f32 %v6548_v59, %v5980_v2  ;;  %v3972_v9 = vmul.f32 %v6558_v42, %v5992_v11 }
 0xfe3   :  { %3986 = vrot.lane.b32.xlu0 %v3969_v37, %s5664_s26  ;;  %v3971_v28 = vmul.f32 %v6530_v6, %v6009_v16  ;;  %v2700_v23 = vmul.f32 %v6299_v0, %v2666_v41  ;;  %v2670_v62 = vrot.slane %v2655_v55, %v5813_v8  ;;  %v2707_v27 = vsel %vm420_vm9, %v2699_v57, 0.0 }
 0xfe4   :  { %v3973_v63 = vmul.f32 %v6542_v12, %v6028_v31  ;;  %v2624_v0 = vrot.slane %v2610_v22, %v5806_v3  ;;  %v2657_v43 = vcombine.high %v2647_v13, %v2647_v13  ;;  %v3547_v40 = vcombine.high %v3543_v20, %v3543_v20 }
 0xfe5   :  { %v2710_v14 = vsel %vm420_vm9, %v2700_v23, 0.0  ;;  %v2701_v15 = vmul.f32 %v6311_v19, %v2670_v62  ;;  %v3081_v51 = vmul.f32 %v2670_v62, %v5980_v2  ;;  %v3545_v37 = vcombine.high %v3529_v50, %v3529_v50  ;;  %v6640_v62 = vld [vmem:[%s7067_s3 + $0x30] sm:$0xff] }
 0xfe6   :  { %4034 = vrot.lane.b32.xlu1 %v6493_v29, %s5661_s22  ;;  %v2626_v49 = vcombine.high %v2624_v0, %v2624_v0  ;;  %v2674_v52 = vrot.slane %v2657_v43, %v5813_v8  ;;  %v2640_v32 = vrot.slane %v2624_v0, %v5806_v3  ;;  %v3579_v44 = vrot.slane %v3547_v40, %v5813_v8 }
 0xfe7   :  { %3097 = vrot.lane.b32.xlu0 %v3080_v48, %s5664_s26  ;;  %v2713_v36 = vsel %vm420_vm9, %v2701_v15, 0.0 }
 0xfe8   :  { %v6576_v19 = vrot.slane %v2626_v49, %v5806_v3  ;;  %v3082_v4 = vmul.f32 %v2674_v52, %v6009_v16  ;;  %v2678_v13 = vrot.slane %v2640_v32, %v5813_v8  ;;  %v3575_v16 = vrot.slane %v3545_v37, %v5813_v8  ;;  %v6657_v49 = vld [vmem:[%s7067_s3 + $0x38] sm:$0xff] }
 0xfe9   :  { %v2656_v10 = vcombine.high %v2640_v32, %v2640_v32  ;;  %v3975_v5 = vmul.f32 %v3579_v44, %v6041_v34 }
 0xfea   :  { %3984 = vrot.lane.b32.xlu1 %v3968_v61, %s5664_s26  ;;  %v2682_v24 = vrot.slane %v6576_v19, %v5813_v8  ;;  %v3083_v3 = vmul.f32 %v2678_v13, %v5992_v11  ;;  %v3974_v2 = vmul.f32 %v3575_v16, %v6018_v18  ;;  %v2702_v11 = vmul.f32 %v6317_v21, %v2674_v52 }
 0xfeb   :  { %3990 = vrot.lane.b32.xlu0 %v3971_v28, %s5664_s26  ;;  %v6619_v28 = vld [vmem:[%s7067_s3 + $0x20] sm:$0xff]  ;;  %v2658_v15 = vcombine.high %v6576_v19, %v6576_v19 }
 0xfec   :  { %v3084_v41 = vmul.f32 %v2682_v24, %v6028_v31  ;;  %v2686_v31 = vrot.slane %v2656_v10, %v5813_v8  ;;  %v2716_v60 = vsel %vm420_vm9, %v2702_v11, 0.0  ;;  %v2704_v56 = vmul.f32 %v6333_v33, %v2682_v24  ;;  %v6684_v10 = vld [vmem:[%s7067_s3 + $0x18] sm:$0xff] }
 0xfed   :  { %v2690_v57 = vrot.slane %v2658_v15, %v5813_v8 }
 0xfee   :  { %3095 = vrot.lane.b32.xlu1 %v3079_v38, %s5664_s26  ;;  %v3085_v48 = vmul.f32 %v2686_v31, %v6018_v18  ;;  %v2722_v21 = vsel %vm420_vm9, %v2704_v56, 0.0  ;;  %v2703_v38 = vmul.f32 %v6619_v28, %v2678_v13 }
 0xfef   :  { %3994 = vrot.lane.b32.xlu0 %v3973_v63, %s5664_s26  ;;  %v3086_v0 = vmul.f32 %v2690_v57, %v6041_v34  ;;  %v2706_v19 = vmul.f32 %v6657_v49, %v2690_v57 }
 0xff0   :  { %v2719_v63 = vsel %vm420_vm9, %v2703_v38, 0.0 }
 0xff1   :  { %v2728_v34 = vsel %vm420_vm9, %v2706_v19, 0.0 }
 0xff2   :  { %3988 = vrot.lane.b32.xlu1 %v3970_v30, %s5664_s26  ;;  %v6631_v30 = vld [vmem:[%s7067_s3] sm:$0xff] }
 0xff6   :  { %3992 = vrot.lane.b32.xlu1 %v3972_v9, %s5664_s26  ;;  %v3588_v9 = vmul.f32 %v6631_v30, %v6525_v47  ;;  %v3592_v47 = vmul.f32 %v6619_v28, %v6558_v42  ;;  %v3595_v42 = vmul.f32 %v6657_v49, %v3579_v44 }
 0xff8   :  { %v3596_v23 = vsel %vm420_vm9, %v3588_v9, 0.0  ;;  %v3608_v22 = vsel %vm420_vm9, %v3592_v47, 0.0  ;;  %v3617_v52 = vsel %vm420_vm9, %v3595_v42, 0.0 }
0x100e   :  { %2711 = vadd.xlane.f32.xlu0 %v2710_v14  ;;  %v2705_v14 = vmul.f32 %v6640_v62, %v2686_v31 }
0x1012   :  { %2714 = vadd.xlane.f32.xlu0 %v2713_v36  ;;  %v2725_v36 = vsel %vm420_vm9, %v2705_v14, 0.0 }
0x101a   :  { %2708 = vadd.xlane.f32.xlu1 %v2707_v27  ;;  %v3594_v27 = vmul.f32 %v6640_v62, %v3575_v16 }
0x101c   :  { %v3614_v43 = vsel %vm420_vm9, %v3594_v27, 0.0 }
0x1028   :  { %3101 = vrot.lane.b32.xlu0 %v3082_v4, %s5664_s26 }
0x102b   :  { %3099 = vrot.lane.b32.xlu1 %v3081_v51, %s5664_s26  ;;  %v6668_v51 = vld [vmem:[%s7067_s3 + $0x8] sm:$0xff] }
0x102c   :  { %3105 = vrot.lane.b32.xlu0 %v3084_v41, %s5664_s26  ;;  %v3589_v13 = vmul.f32 %v6668_v51, %v6515_v46  ;;  %v6676_v41 = vld [vmem:[%s7067_s3 + $0x10] sm:$0xff]  ;;  %v3591_v46 = vmul.f32 %v6684_v10, %v6530_v6 }
0x102d   :  { %v3590_v44 = vmul.f32 %v6676_v41, %v6548_v59  ;;  %v6692_v59 = vld [vmem:[%s7067_s3 + $0x28] sm:$0xff] }
0x102e   :  { %v3599_v37 = vsel %vm420_vm9, %v3589_v13, 0.0  ;;  %v3593_v31 = vmul.f32 %v6692_v59, %v6542_v12 }
0x102f   :  { %3103 = vrot.lane.b32.xlu1 %v3083_v3, %s5664_s26  ;;  %v3602_v16 = vsel %vm420_vm9, %v3590_v44, 0.0 }
0x1030   :  { %3998 = vrot.lane.b32.xlu0 %v3975_v5, %s5664_s26 }
0x1033   :  { %3996 = vrot.lane.b32.xlu1 %v3974_v2, %s5664_s26  ;;  %v3605_v2 = vsel %vm420_vm9, %v3591_v46, 0.0 }
0x1037   :  { %3107 = vrot.lane.b32.xlu1 %v3085_v48, %s5664_s26  ;;  %v3611_v48 = vsel %vm420_vm9, %v3593_v31, 0.0 }
0x104c   :  { %v3146_v20 = vpop.permute.xlu0 %3145  ;;  %v2732_v61 = vpop.permute.xlu1 %2731 }
0x104d   :  { %5278 = vmatpush3.xpose.msk.msra.mxu0 %vm420_vm9, %v2732_v61  ;;  %5288 = vmatpush3.xpose.msk.msra.mxu1 %vm420_vm9, %v3146_v20 }
0x104e   :  { %5297 = vmatprep.subr.mxu1 %v7085_v17  ;;  %5282 = vmatprep.subr.mxu0 %v7085_v17 }
0x104f   :  { %2717 = vadd.xlane.f32.xlu0 %v2716_v60 }
0x1050   :  { %5280 = vmatmul.mubr.msk.f32.vlgmr.msra.gmra.mrb[12].mxu0 %vm420_vm9, %v6495_v45  ;;  %v3144_v18 = vpop.permute.xlu1 %3143  ;;  %v4033_v55 = vpop.permute.xlu0 %4032 }
0x1051   :  { %5290 = vmatmul.mubr.msk.f32.vlgmr.msra.gmra.mrb[16].mxu1 %vm420_vm9, %v3144_v18  ;;  %5284 = vmatprep.mubr.msk.f32.mxu0 %vm5659_vm8, %v7085_v17 }
0x1052   :  { %5299 = vmatprep.mubr.msk.f32.mxu1 %vm5659_vm8, %v7085_v17 }
0x1053   :  { %2723 = vadd.xlane.f32.xlu0 %v2722_v21 }
0x1054   :  { %v3621_v33 = vpop.permute.xlu1 %3620 }
0x1055   :  { %5298 = vmatpush3.xpose.msk.msra.mxu1 %vm420_vm9, %v3621_v33  ;;  %v3987_v3 = vpop.permute.xlu0 %3986 }
0x1056   :  { %5307 = vmatprep.subr.mxu1 %v7085_v17  ;;  %v4011_v20 = vsel %vm420_vm9, %v3987_v3, 0.0 }
0x1058   :  { %5300 = vmatmul.mubr.msk.f32.vlgmr.msra.gmra.mrb[18].mxu1 %vm420_vm9, %v6493_v29  ;;  %v4035_v50 = vpop.permute.xlu1 %4034 }
0x1059   :  { %5308 = vmatpush3.xpose.msk.msra.mxu1 %vm420_vm9, %v4035_v50  ;;  %5309 = vmatprep.mubr.msk.f32.mxu1 %vm5659_vm8, %v7085_v17  ;;  %v3098_v5 = vpop.permute.xlu0 %3097 }
0x105a   :  { %v3122_v18 = vsel %vm420_vm9, %v3098_v5, 0.0 }
0x105b   :  { %2720 = vadd.xlane.f32.xlu1 %v2719_v63 }
0x105c   :  { %5310 = vmatmul.mubr.msk.f32.vlgmr.msra.gmra.mrb[20].mxu1 %vm420_vm9, %v4033_v55  ;;  %v3985_v32 = vpop.permute.xlu1 %3984 }
0x105d   :  { %v4008_v4 = vsel %vm420_vm9, %v3985_v32, 0.0  ;;  %v3991_v11 = vpop.permute.xlu0 %3990 }
0x105f   :  { %3597 = vadd.xlane.f32.xlu1 %v3596_v23 }
0x1060   :  { %v3096_v24 = vpop.permute.xlu1 %3095 }
0x1061   :  { %v3119_v40 = vsel %vm420_vm9, %v3096_v24, 0.0  ;;  %v3995_v61 = vpop.permute.xlu0 %3994 }
0x1062   :  { %v4023_v19 = vsel %vm420_vm9, %v3995_v61, 0.0 }
0x1063   :  { %2726 = vadd.xlane.f32.xlu1 %v2725_v36 }
0x1064   :  { %v3989_v6 = vpop.permute.xlu1 %3988 }
0x1065   :  { %v4014_v60 = vsel %vm420_vm9, %v3989_v6, 0.0 }
0x1067   :  { %3609 = vadd.xlane.f32.xlu1 %v3608_v22 }
0x1068   :  { %v3993_v21 = vpop.permute.xlu1 %3992 }
0x1069   :  { %3109 = vrot.lane.b32.xlu0 %v3086_v0, %s5664_s26  ;;  %v4020_v3 = vsel %vm420_vm9, %v3993_v21, 0.0 }
0x106b   :  { %3615 = vadd.xlane.f32.xlu1 %v3614_v43 }
0x106f   :  { %3618 = vadd.xlane.f32.xlu1 %v3617_v52  ;;  %v4017_v52 = vsel %vm420_vm9, %v3991_v11, 0.0 }
0x1073   :  { %2729 = vadd.xlane.f32.xlu1 %v2728_v34 }
0x1077   :  { %4009 = vadd.xlane.f32.xlu1 %v4008_v4 }
0x107b   :  { %3120 = vadd.xlane.f32.xlu1 %v3119_v40 }
0x1088   :  { %3600 = vadd.xlane.f32.xlu0 %v3599_v37 }
0x108c   :  { %3603 = vadd.xlane.f32.xlu0 %v3602_v16 }
0x1090   :  { %3606 = vadd.xlane.f32.xlu0 %v3605_v2 }
0x1094   :  { %3612 = vadd.xlane.f32.xlu0 %v3611_v48 }
0x1098   :  { %4012 = vadd.xlane.f32.xlu0 %v4011_v20 }
0x109b   :  { %v2712_v56 = vpop.xlane.xlu0 %2711 }
0x109c   :  { %4015 = vadd.xlane.f32.xlu0 %v4014_v60  ;;  %v2748_v38 = vrot.slane %v2712_v56, %v5930_v1 }
0x109f   :  { %v2715_v33 = vpop.xlane.xlu0 %2714 }
0x10a0   :  { %3123 = vadd.xlane.f32.xlu0 %v3122_v18  ;;  %v2752_v63 = vrot.slane %v2715_v33, %v5930_v1 }
0x10a3   :  { %v3102_v55 = vpop.permute.xlu0 %3101 }
0x10a4   :  { %v3128_v47 = vsel %vm420_vm9, %v3102_v55, 0.0 }
0x10a7   :  { %v2709_v12 = vpop.xlane.xlu1 %2708  ;;  %v3106_v22 = vpop.permute.xlu0 %3105 }
0x10a8   :  { %v2744_v50 = vrot.slane %v2709_v12, %v5930_v1  ;;  %v3134_v0 = vsel %vm420_vm9, %v3106_v22, 0.0 }
0x10aa   :  { %v2773_v9 = vsel %vm487_vm10, %v2748_v38, %v2744_v50 }
0x10ab   :  { %v3100_v23 = vpop.permute.xlu1 %3099  ;;  %v2774_v14 = vsel %vm489_vm11, %v2752_v63, %v2773_v9  ;;  %v3999_v32 = vpop.permute.xlu0 %3998 }
0x10ac   :  { %v3125_v15 = vsel %vm420_vm9, %v3100_v23, 0.0  ;;  %v4029_v34 = vsel %vm420_vm9, %v3999_v32, 0.0 }
0x10ad   :  { %3126 = vadd.xlane.f32.xlu0 %v3125_v15 }
0x10af   :  { %v3104_v36 = vpop.permute.xlu1 %3103 }
0x10b0   :  { %v3131_v57 = vsel %vm420_vm9, %v3104_v36, 0.0 }
0x10b1   :  { %3129 = vadd.xlane.f32.xlu0 %v3128_v47  ;;  %3132 = vadd.xlane.f32.xlu1 %v3131_v57 }
0x10b3   :  { %v3997_v27 = vpop.permute.xlu1 %3996 }
0x10b4   :  { %v4026_v16 = vsel %vm420_vm9, %v3997_v27, 0.0 }
0x10b5   :  { %3135 = vadd.xlane.f32.xlu0 %v3134_v0 }
0x10b7   :  { %v3108_v43 = vpop.permute.xlu1 %3107 }
0x10b8   :  { %v3137_v42 = vsel %vm420_vm9, %v3108_v43, 0.0 }
0x10b9   :  { %4018 = vadd.xlane.f32.xlu0 %v4017_v52  ;;  %3138 = vadd.xlane.f32.xlu1 %v3137_v42 }
0x10bd   :  { %4024 = vadd.xlane.f32.xlu0 %v4023_v19 }
0x10c1   :  { %4030 = vadd.xlane.f32.xlu0 %v4029_v34 }
0x10dc   :  { %v2718_v4 = vpop.xlane.xlu0 %2717 }
0x10dd   :  { %v2756_v24 = vrot.slane %v2718_v4, %v5930_v1 }
0x10df   :  { %v2775_v40 = vsel %vm491_vm12, %v2756_v24, %v2774_v14 }
0x10e0   :  { %v2724_v13 = vpop.xlane.xlu0 %2723 }
0x10e1   :  { %v2764_v63 = vrot.slane %v2724_v13, %v5930_v1 }
0x10e4   :  { %v3110_v37 = vpop.permute.xlu0 %3109 }
0x10e5   :  { %v3140_v44 = vsel %vm420_vm9, %v3110_v37, 0.0 }
0x10e6   :  { %3141 = vadd.xlane.f32.xlu1 %v3140_v44 }
0x10e8   :  { %v2721_v46 = vpop.xlane.xlu1 %2720 }
0x10e9   :  { %v2760_v61 = vrot.slane %v2721_v46, %v5930_v1 }
0x10ea   :  { %4021 = vadd.xlane.f32.xlu1 %v4020_v3 }
0x10eb   :  { %v2776_v12 = vsel %vm493_vm13, %v2760_v61, %v2775_v40 }
0x10ec   :  { %v3598_v5 = vpop.xlane.xlu1 %3597  ;;  %v2777_v36 = vsel %vm495_vm14, %v2764_v63, %v2776_v12 }
0x10ed   :  { %v3633_v21 = vrot.slane %v3598_v5, %v5930_v1 }
0x10ee   :  { %4027 = vadd.xlane.f32.xlu1 %v4026_v16 }
0x10f0   :  { %v2727_v2 = vpop.xlane.xlu1 %2726 }
0x10f1   :  { %v2768_v38 = vrot.slane %v2727_v2, %v5930_v1 }
0x10f3   :  { %v2778_v22 = vsel %vm497_vm15, %v2768_v38, %v2777_v36 }
0x10f4   :  { %v3610_v31 = vpop.xlane.xlu1 %3609 }
0x10f5   :  { %v3649_v47 = vrot.slane %v3610_v31, %v5930_v1 }
0x10f8   :  { %v3616_v48 = vpop.xlane.xlu1 %3615 }
0x10f9   :  { %v3657_v4 = vrot.slane %v3616_v48, %v5930_v1 }
0x10fc   :  { %v3619_v20 = vpop.xlane.xlu1 %3618 }
0x10fd   :  { %v3661_v37 = vrot.slane %v3619_v20, %v5930_v1 }
0x1100   :  { %v2730_v56 = vpop.xlane.xlu1 %2729 }
0x1101   :  { %v2772_v9 = vrot.slane %v2730_v56, %v5930_v1 }
0x1103   :  { %v2779_v27 = vsel %vm499_vm0, %v2772_v9, %v2778_v22 }
0x1115   :  { %v3601_v11 = vpop.xlane.xlu0 %3600 }
0x1116   :  { %v3637_v60 = vrot.slane %v3601_v11, %v5930_v1 }
0x1118   :  { %v3662_v55 = vsel %vm487_vm10, %v3637_v60, %v3633_v21  ;;  %v4010_v60 = vpop.xlane.xlu1 %4009 }
0x1119   :  { %v3604_v6 = vpop.xlane.xlu0 %3603 }
0x111a   :  { %v3641_v18 = vrot.slane %v3604_v6, %v5930_v1 }
0x111c   :  { %v3663_v23 = vsel %vm489_vm11, %v3641_v18, %v3662_v55  ;;  %v3121_v18 = vpop.xlane.xlu1 %3120 }
0x111d   :  { %v3607_v33 = vpop.xlane.xlu0 %3606 }
0x111e   :  { %v3645_v50 = vrot.slane %v3607_v33, %v5930_v1 }
0x1120   :  { %v3664_v14 = vsel %vm491_vm12, %v3645_v50, %v3663_v23  ;;  %v3158_v50 = vrot.slane %v3121_v18, %v5930_v1 }
0x1121   :  { %v3613_v15 = vpop.xlane.xlu0 %3612  ;;  %v3665_v43 = vsel %vm493_vm13, %v3649_v47, %v3664_v14 }
0x1122   :  { %v3653_v57 = vrot.slane %v3613_v15, %v5930_v1 }
0x1123   :  { %v2851_v0 = vpop.f32.mrb[12].mxu0 }
0x1124   :  { %v2852_v42 = vadd.f32 %v2851_v0, %v2779_v27  ;;  %v5281_v52 = vpop.f32.mrb[13].mxu0  ;;  %v3265_v19 = vpop.f32.mrb[16].mxu1  ;;  %v3666_v32 = vsel %vm495_vm14, %v3653_v57, %v3665_v43 }
0x1125   :  { %v5291_v34 = vpop.f32.mrb[17].mxu1  ;;  %v3667_v13 = vsel %vm497_vm15, %v3657_v4, %v3666_v32  ;;  %v4013_v11 = vpop.xlane.xlu0 %4012 }
0x1126   :  { %v6739_v24 = vadd.f32 %v2852_v42, %v5953_v35  ;;  %v3668_v44 = vsel %vm499_vm0, %v3661_v37, %v3667_v13  ;;  %v4051_v22 = vrot.slane %v4013_v11, %v5930_v1  ;;  %v4047_v34 = vrot.slane %v4010_v60, %v5930_v1 }
0x1128   :  { %v2856_v40 = vsel %vm577_vm1, %v6739_v24, -inf  ;;  %v4076_v37 = vsel %vm487_vm10, %v4051_v22, %v4047_v34 }
0x1129   :  { %2857 = vmax.xlane.f32.xlu1 %v2856_v40  ;;  %v4016_v20 = vpop.xlane.xlu0 %4015 }
0x112a   :  { %v4055_v43 = vrot.slane %v4016_v20, %v5930_v1 }
0x112b   :  { %v3740_v3 = vpop.f32.mrb[18].mxu1 }
0x112c   :  { %v3741_v16 = vadd.f32 %v3740_v3, %v3668_v44  ;;  %v5301_v46 = vpop.f32.mrb[19].mxu1 }
0x112d   :  { %v3124_v6 = vpop.xlane.xlu0 %3123 }
0x112e   :  { %v6747_v5 = vadd.f32 %v3741_v16, %v6150_v26  ;;  %v3162_v33 = vrot.slane %v3124_v6, %v5930_v1  ;;  %v4077_v16 = vsel %vm489_vm11, %v4055_v43, %v4076_v37 }
0x112f   :  { %v4154_v2 = vpop.f32.mrb[20].mxu1 }
0x1130   :  { %v5311_v31 = vpop.f32.mrb[21].mxu1  ;;  %v3745_v48 = vsel %vm577_vm1, %v6747_v5, -inf  ;;  %v3187_v9 = vsel %vm487_vm10, %v3162_v33, %v3158_v50 }
0x1131   :  { %3746 = vmax.xlane.f32.xlu1 %v3745_v48 }
0x113a   :  { %v3127_v61 = vpop.xlane.xlu0 %3126 }
0x113b   :  { %v3166_v38 = vrot.slane %v3127_v61, %v5930_v1 }
0x113d   :  { %v3188_v14 = vsel %vm489_vm11, %v3166_v38, %v3187_v9 }
0x113e   :  { %v3130_v56 = vpop.xlane.xlu0 %3129  ;;  %v3133_v12 = vpop.xlane.xlu1 %3132 }
0x113f   :  { %v3170_v63 = vrot.slane %v3130_v56, %v5930_v1  ;;  %v3174_v15 = vrot.slane %v3133_v12, %v5930_v1 }
0x1141   :  { %v3189_v36 = vsel %vm491_vm12, %v3170_v63, %v3188_v14 }
0x1142   :  { %2987 = vrot.lane.b32.xlu1 %v6495_v45, %s5663_s1  ;;  %v3136_v21 = vpop.xlane.xlu0 %3135  ;;  %v3190_v27 = vsel %vm493_vm13, %v3174_v15, %v3189_v36 }
0x1143   :  { %v3178_v47 = vrot.slane %v3136_v21, %v5930_v1 }
0x1145   :  { %v3191_v42 = vsel %vm495_vm14, %v3178_v47, %v3190_v27 }
0x1146   :  { %v4019_v55 = vpop.xlane.xlu0 %4018  ;;  %v3139_v23 = vpop.xlane.xlu1 %3138 }
0x1147   :  { %v3182_v57 = vrot.slane %v3139_v23, %v5930_v1  ;;  %v4059_v4 = vrot.slane %v4019_v55, %v5930_v1 }
0x1149   :  { %v3192_v40 = vsel %vm497_vm15, %v3182_v57, %v3191_v42  ;;  %v4078_v31 = vsel %vm491_vm12, %v4059_v4, %v4077_v16 }
0x114a   :  { %v4025_v52 = vpop.xlane.xlu0 %4024 }
0x114b   :  { %v4067_v6 = vrot.slane %v4025_v52, %v5930_v1 }
0x114e   :  { %v4031_v11 = vpop.xlane.xlu0 %4030 }
0x1173   :  { %v3142_v0 = vpop.xlane.xlu1 %3141 }
0x1174   :  { %v3186_v32 = vrot.slane %v3142_v0, %v5930_v1 }
0x1176   :  { %v3193_v13 = vsel %vm499_vm0, %v3186_v32, %v3192_v40 }
0x1177   :  { %v4022_v44 = vpop.xlane.xlu1 %4021  ;;  %v3266_v3 = vadd.f32 %v3265_v19, %v3193_v13  ;;  %v4075_v19 = vrot.slane %v4031_v11, %v5930_v1 }
0x1178   :  { %v4063_v46 = vrot.slane %v4022_v44, %v5930_v1 }
0x1179   :  { %v3269_v48 = vadd.f32 %v3266_v3, %v5953_v35 }
0x117a   :  { %v4079_v20 = vsel %vm493_vm13, %v4063_v46, %v4078_v31 }
0x117b   :  { %v4028_v61 = vpop.xlane.xlu1 %4027  ;;  %v3270_v60 = vsel %vm577_vm1, %v3269_v48, -inf  ;;  %v4080_v18 = vsel %vm495_vm14, %v4067_v6, %v4079_v20 }
0x117c   :  { %v4071_v56 = vrot.slane %v4028_v61, %v5930_v1  ;;  %3271 = vmax.xlane.f32.xlu0 %v3270_v60 }
0x117e   :  { %v4081_v21 = vsel %vm497_vm15, %v4071_v56, %v4080_v18  ;;  %v7086_v18 = vld [vmem:[#allocation8_spill] sm:$0xff] }
0x117f   :  { %v4082_v33 = vsel %vm499_vm0, %v4075_v19, %v4081_v21 }
0x1180   :  { %v4155_v35 = vadd.f32 %v4154_v2, %v4082_v33 }
0x1182   :  { %v4158_v12 = vadd.f32 %v4155_v35, %v6150_v26  ;;  %v7087_v35 = vld [vmem:[#allocation9_spill] sm:$0xff] }
0x1184   :  { %v4159_v38 = vsel %vm577_vm1, %v4158_v12, -inf }
0x1185   :  { %4160 = vmax.xlane.f32.xlu0 %v4159_v38 }
0x11b6   :  { %v2858_v50 = vpop.xlane.xlu1 %2857 }
0x11b7   :  { %v2859_v63 = vsub.f32 %v6739_v24, %v2858_v50 }
0x11b9   :  { %v2860_v9 = vmul.f32 1.442695, %v2859_v63 }
0x11bb   :  { %5550 = vpow2.f32 %v2860_v9  ;;  %v7088_v9 = vld [vmem:[#allocation10_spill] sm:$0xff] }
0x11be   :  { %v3747_v55 = vpop.xlane.xlu1 %3746 }
0x11bf   :  { %v3748_v1 = vsub.f32 %v6747_v5, %v3747_v55 }
0x11c1   :  { %v3749_v23 = vmul.f32 1.442695, %v3748_v1 }
0x11c2   :  { %v2988_v14 = vpop.permute.xlu1 %2987 }
0x11c3   :  { %5552 = vpow2.f32 %v3749_v23  ;;  %5283 = vmatpush3.msra.mxu0 %v2988_v14 }
0x11c4   :  { %5292 = vmatprep.subr.mxu0 %v7085_v17 }
0x11c5   :  { %v5551_v2 = vpop.eup %5550 }
0x11c6   :  { %v2862_v26 = vsel %vm577_vm1, %v5551_v2, 0.0 }
0x11c7   :  { %2863 = vadd.xlane.f32.xlu1 %v2862_v26 }
0x11cd   :  { %v5553_v15 = vpop.eup %5552 }
0x11ce   :  { %v3751_v36 = vsel %vm577_vm1, %v5553_v15, 0.0 }
0x11cf   :  { %3752 = vadd.xlane.f32.xlu1 %v3751_v36 }
0x11e0   :  { %3876 = vrot.lane.b32.xlu1 %v6493_v29, %s5663_s1 }
0x11e4   :  { %4290 = vrot.lane.b32.xlu1 %v6493_v29, %s5665_s27 }
0x1209   :  { %v3272_v24 = vpop.xlane.xlu0 %3271 }
0x120a   :  { %v3273_v5 = vsub.f32 %v3269_v48, %v3272_v24 }
0x120c   :  { %v3274_v47 = vmul.f32 1.442695, %v3273_v5 }
0x120e   :  { %5554 = vpow2.f32 %v3274_v47 }
0x1212   :  { %v4161_v57 = vpop.xlane.xlu0 %4160 }
0x1213   :  { %v4162_v22 = vsub.f32 %v4158_v12, %v4161_v57 }
0x1215   :  { %v4163_v27 = vmul.f32 1.442695, %v4162_v22 }
0x1217   :  { %5556 = vpow2.f32 %v4163_v27 }
0x1218   :  { %v5555_v0 = vpop.eup %5554 }
0x1219   :  { %v3276_v43 = vsel %vm577_vm1, %v5555_v0, 0.0 }
0x121a   :  { %3277 = vadd.xlane.f32.xlu0 %v3276_v43 }
0x1221   :  { %v5557_v42 = vpop.eup %5556 }
0x1222   :  { %v4165_v52 = vsel %vm577_vm1, %v5557_v42, 0.0 }
0x1223   :  { %4166 = vadd.xlane.f32.xlu0 %v4165_v52 }
0x1239   :  { %3401 = vrot.lane.b32.xlu0 %v6495_v45, %s5665_s27 }
0x1254   :  { %v2864_v29 = vpop.xlane.xlu1 %2863 }
0x1255   :  { %5558 = vrcp.f32 %v2864_v29 }
0x125c   :  { %v3753_v40 = vpop.xlane.xlu1 %3752 }
0x125f   :  { %v5559_v32 = vpop.eup %5558 }
0x1260   :  { %v6800_v34 = vmul.f32 %v5559_v32, %v5551_v2  ;;  %v3877_v45 = vpop.permute.xlu1 %3876 }
0x1262   :  { %5285 = vmatmul.mubr.msk.f32.vlgmr.msra.gmra.mrb[14].mxu0 %vm577_vm1, %v6800_v34  ;;  %v2877_v2 = vrot.slane %v6800_v34, %v6141_v25  ;;  %v2870_v26 = vrot.slane %v6800_v34, %v5813_v8  ;;  %v2884_v36 = vrot.slane %v6800_v34, %v6185_v54  ;;  %v2891_v24 = vrot.slane %v6800_v34, %v6182_v7 }
0x1263   :  { %5294 = vmatprep.mubr.msk.f32.mxu0 %vm5659_vm8, %v7085_v17  ;;  %v2898_v47 = vrot.slane %v6800_v34, %v6190_v39 }
0x1264   :  { %v4291_v20 = vpop.permute.xlu1 %4290 }
0x12a7   :  { %v3278_v4 = vpop.xlane.xlu0 %3277 }
0x12a8   :  { %5560 = vrcp.f32 %v3278_v4 }
0x12a9   :  { %5562 = vrcp.f32 %v3753_v40 }
0x12b0   :  { %v4167_v13 = vpop.xlane.xlu0 %4166 }
0x12b1   :  { %5564 = vrcp.f32 %v4167_v13 }
0x12b2   :  { %v5561_v37 = vpop.eup %5560 }
0x12b3   :  { %v3280_v44 = vmul.f32 %v5561_v37, %v5555_v0  ;;  %v5563_v16 = vpop.eup %5562 }
0x12b4   :  { %v3402_v3 = vpop.permute.xlu0 %3401  ;;  %v6810_v48 = vmul.f32 %v5563_v16, %v5553_v15 }
0x12b5   :  { %5293 = vmatpush3.msra.mxu0 %v3402_v3  ;;  %v3291_v46 = vrot.slane %v3280_v44, %v6141_v25  ;;  %v3284_v31 = vrot.slane %v3280_v44, %v5813_v8  ;;  %v3305_v11 = vrot.slane %v3280_v44, %v6182_v7  ;;  %v3298_v6 = vrot.slane %v3280_v44, %v6185_v54 }
0x12b6   :  { %5295 = vmatmul.mubr.msk.f32.vlgmr.msra.gmra.mrb[16].mxu0 %vm577_vm1, %v3280_v44  ;;  %5302 = vmatprep.subr.mxu0 %v7085_v17  ;;  %v3312_v56 = vrot.slane %v3280_v44, %v6190_v39  ;;  %v3319_v21 = vrot.slane %v3280_v44, %v7086_v18  ;;  %v3326_v12 = vrot.slane %v3280_v44, %v7087_v35 }
0x12b7   :  { %3293 = vbcast.lane.b32.xlu0 %v3291_v46, 256  ;;  %3286 = vbcast.lane.b32.xlu1 %v3284_v31, 256  ;;  %v3333_v55 = vrot.slane %v3280_v44, %v7088_v9  ;;  %v3759_v15 = vrot.slane %v6810_v48, %v5813_v8  ;;  %v3766_v5 = vrot.slane %v6810_v48, %v6141_v25 }
0x12b8   :  { %5303 = vmatpush3.msra.mxu0 %v3877_v45  ;;  %5304 = vmatprep.mubr.msk.f32.mxu0 %vm5659_vm8, %v7085_v17  ;;  %v3773_v57 = vrot.slane %v6810_v48, %v6185_v54  ;;  %v3780_v22 = vrot.slane %v6810_v48, %v6182_v7  ;;  %v3787_v27 = vrot.slane %v6810_v48, %v6190_v39 }
0x12b9   :  { %5312 = vmatprep.subr.mxu0 %v7085_v17  ;;  %v3794_v0 = vrot.slane %v6810_v48, %v7086_v18  ;;  %v3801_v43 = vrot.slane %v6810_v48, %v7087_v35 }
0x12ba   :  { %5305 = vmatmul.mubr.msk.f32.vlgmr.msra.gmra.mrb[18].mxu0 %vm577_vm1, %v6810_v48 }
0x12bb   :  { %v5565_v61 = vpop.eup %5564  ;;  %5313 = vmatpush3.msra.mxu0 %v4291_v20  ;;  %3307 = vbcast.lane.b32.xlu0 %v3305_v11, 256 }
0x12bc   :  { %v4169_v60 = vmul.f32 %v5565_v61, %v5557_v42  ;;  %3300 = vbcast.lane.b32.xlu1 %v3298_v6, 256  ;;  %5314 = vmatprep.mubr.msk.f32.mxu0 %vm5659_vm8, %v7085_v17 }
0x12be   :  { %5315 = vmatmul.mubr.msk.f32.vlgmr.msra.gmra.mrb[20].mxu0 %vm577_vm1, %v4169_v60  ;;  %v4180_v19 = vrot.slane %v4169_v60, %v6141_v25  ;;  %v4187_v33 = vrot.slane %v4169_v60, %v6185_v54  ;;  %v4194_v38 = vrot.slane %v4169_v60, %v6182_v7  ;;  %v4173_v50 = vrot.slane %v4169_v60, %v5813_v8 }
0x12bf   :  { %3314 = vbcast.lane.b32.xlu0 %v3312_v56, 256  ;;  %v4201_v63 = vrot.slane %v4169_v60, %v6190_v39  ;;  %v4208_v1 = vrot.slane %v4169_v60, %v7086_v18  ;;  %v4222_v23 = vrot.slane %v4169_v60, %v7088_v9  ;;  %v4215_v14 = vrot.slane %v4169_v60, %v7087_v35 }
0x12c0   :  { %4182 = vbcast.lane.b32.xlu1 %v4180_v19, 256  ;;  %v2905_v8 = vrot.slane %v6800_v34, %v7086_v18  ;;  %v2912_v25 = vrot.slane %v6800_v34, %v7087_v35  ;;  %v2919_v54 = vrot.slane %v6800_v34, %v7088_v9  ;;  %v3808_v7 = vrot.slane %v6810_v48, %v7088_v9 }
0x12c3   :  { %3321 = vbcast.lane.b32.xlu0 %v3319_v21, 256 }
0x12c4   :  { %4189 = vbcast.lane.b32.xlu1 %v4187_v33, 256 }
0x12c7   :  { %3328 = vbcast.lane.b32.xlu0 %v3326_v12, 256 }
0x12c8   :  { %4196 = vbcast.lane.b32.xlu1 %v4194_v38, 256 }
0x12cb   :  { %4175 = vbcast.lane.b32.xlu0 %v4173_v50, 256 }
0x12cc   :  { %4203 = vbcast.lane.b32.xlu1 %v4201_v63, 256 }
0x12cf   :  { %3335 = vbcast.lane.b32.xlu0 %v3333_v55, 256 }
0x12d0   :  { %4210 = vbcast.lane.b32.xlu1 %v4208_v1, 256 }
0x12d3   :  { %4224 = vbcast.lane.b32.xlu0 %v4222_v23, 256 }
0x12d4   :  { %4217 = vbcast.lane.b32.xlu1 %v4215_v14, 256 }
0x12d7   :  { %2879 = vbcast.lane.b32.xlu0 %v2877_v2, 256 }
0x12d8   :  { %2872 = vbcast.lane.b32.xlu1 %v2870_v26, 256 }
0x12db   :  { %3761 = vbcast.lane.b32.xlu0 %v3759_v15, 256 }
0x12dc   :  { %2886 = vbcast.lane.b32.xlu1 %v2884_v36, 256 }
0x12df   :  { %2893 = vbcast.lane.b32.xlu0 %v2891_v24, 256 }
0x12e0   :  { %3768 = vbcast.lane.b32.xlu1 %v3766_v5, 256 }
0x12e3   :  { %2900 = vbcast.lane.b32.xlu0 %v2898_v47, 256 }
0x12e4   :  { %3775 = vbcast.lane.b32.xlu1 %v3773_v57, 256 }
0x12e7   :  { %2907 = vbcast.lane.b32.xlu0 %v2905_v8, 256 }
0x12e8   :  { %3782 = vbcast.lane.b32.xlu1 %v3780_v22, 256 }
0x12eb   :  { %2914 = vbcast.lane.b32.xlu0 %v2912_v25, 256 }
0x12ec   :  { %3789 = vbcast.lane.b32.xlu1 %v3787_v27, 256 }
0x12ef   :  { %2921 = vbcast.lane.b32.xlu0 %v2919_v54, 256 }
0x12f0   :  { %3796 = vbcast.lane.b32.xlu1 %v3794_v0, 256 }
0x12f3   :  { %3810 = vbcast.lane.b32.xlu0 %v3808_v7, 256 }
0x12f4   :  { %3803 = vbcast.lane.b32.xlu1 %v3801_v43, 256 }
0x1329   :  { %v3294_v52 = vpop.permute.xlu0 %3293  ;;  %v3287_v29 = vpop.permute.xlu1 %3286 }
0x132a   :  { %v3338_v44 = vmul.f32 %v6668_v51, %v3294_v52  ;;  %v3337_v16 = vmul.f32 %v6631_v30, %v3287_v29 }
0x132c   :  { %v3352_v46 = vsel %vm420_vm9, %v3338_v44, 0.0  ;;  %v3345_v11 = vsel %vm420_vm9, %v3337_v16, 0.0 }
0x132d   :  { %v3308_v32 = vpop.permute.xlu0 %3307  ;;  %v3353_v48 = vrot.slane %v3352_v46, 4  ;;  %v3346_v60 = vrot.slane %v3345_v11, 4 }
0x132e   :  { %v3301_v34 = vpop.permute.xlu1 %3300  ;;  %v3340_v56 = vmul.f32 %v6684_v10, %v3308_v32 }
0x132f   :  { %v3339_v6 = vmul.f32 %v6676_v41, %v3301_v34  ;;  %v3354_v19 = vadd.f32 %v3353_v48, %v3352_v46  ;;  %v3347_v12 = vadd.f32 %v3346_v60, %v3345_v11 }
0x1330   :  { %v3366_v38 = vsel %vm420_vm9, %v3340_v56, 0.0 }
0x1331   :  { %v3315_v4 = vpop.permute.xlu0 %3314  ;;  %v3359_v21 = vsel %vm420_vm9, %v3339_v6, 0.0  ;;  %v3367_v36 = vrot.slane %v3366_v38, 4  ;;  %v3348_v8 = vrot.slane %v3347_v12, 2 }
0x1332   :  { %v4183_v40 = vpop.permute.xlu1 %4182  ;;  %v3341_v50 = vmul.f32 %v6619_v28, %v3315_v4  ;;  %v3360_v55 = vrot.slane %v3359_v21, 4 }
0x1333   :  { %v4227_v18 = vmul.f32 %v6668_v51, %v4183_v40  ;;  %v3368_v34 = vadd.f32 %v3367_v36, %v3366_v38 }
0x1334   :  { %v3373_v24 = vsel %vm420_vm9, %v3341_v50, 0.0  ;;  %v3361_v22 = vadd.f32 %v3360_v55, %v3359_v21 }
0x1335   :  { %v6866_v42 = vpop.f32.mrb[14].mxu0  ;;  %v3322_v13 = vpop.permute.xlu0 %3321  ;;  %v4241_v1 = vsel %vm420_vm9, %v4227_v18, 0.0 }
0x1336   :  { %v5286_v39 = vpop.f32.mrb[15].mxu0  ;;  %v4190_v37 = vpop.permute.xlu1 %4189  ;;  %v3342_v23 = vmul.f32 %v6692_v59, %v3322_v13  ;;  %v4242_v5 = vrot.slane %v4241_v1, 4  ;;  %v3362_v48 = vrot.slane %v3361_v22, 2 }
0x1337   :  { %v4228_v63 = vmul.f32 %v6676_v41, %v4190_v37  ;;  %v3374_v39 = vrot.slane %v3373_v24, 4  ;;  %v3349_v37 = vadd.f32 %v3348_v8, %v3347_v12 }
0x1338   :  { %v3380_v25 = vsel %vm420_vm9, %v3342_v23, 0.0  ;;  %v4243_v4 = vadd.f32 %v4242_v5, %v4241_v1 }
0x1339   :  { %v3329_v45 = vpop.permute.xlu0 %3328  ;;  %v4248_v47 = vsel %vm420_vm9, %v4228_v63, 0.0  ;;  %v3381_v40 = vrot.slane %v3380_v25, 4  ;;  %v3375_v11 = vadd.f32 %v3374_v39, %v3373_v24  ;;  %v3363_v63 = vadd.f32 %v3362_v48, %v3361_v22  ;;  %v5012_v48 = vld [vmem:[%s7069_s5 + $0x28] sm:$0xff] }
0x133a   :  { %v4197_v3 = vpop.permute.xlu1 %4196  ;;  %v3343_v14 = vmul.f32 %v6640_v62, %v3329_v45  ;;  %v4249_v52 = vrot.slane %v4248_v47, 4  ;;  %v4244_v60 = vrot.slane %v4243_v4, 2 }
0x133b   :  { %v4229_v2 = vmul.f32 %v6684_v10, %v4197_v3  ;;  %v3382_v56 = vadd.f32 %v3381_v40, %v3380_v25  ;;  %v3364_v25 = vrot.slane %v3363_v63, 1 }
0x133c   :  { %v3387_v54 = vsel %vm420_vm9, %v3343_v14, 0.0  ;;  %v4245_v14 = vadd.f32 %v4244_v60, %v4243_v4  ;;  %v5013_v60 = vld [vmem:[%s7069_s5 + $0x30] sm:$0xff] }
0x133d   :  { %v4176_v31 = vpop.permute.xlu0 %4175  ;;  %v4255_v0 = vsel %vm420_vm9, %v4229_v2, 0.0  ;;  %v3388_v44 = vrot.slane %v3387_v54, 4  ;;  %v3383_v2 = vrot.slane %v3382_v56, 2 }
0x133e   :  { %v4204_v20 = vpop.permute.xlu1 %4203  ;;  %v4226_v61 = vmul.f32 %v6631_v30, %v4176_v31  ;;  %v3355_v30 = vrot.slane %v3354_v19, 2  ;;  %v4256_v45 = vrot.slane %v4255_v0, 4 }
0x133f   :  { %v4230_v43 = vmul.f32 %v6619_v28, %v4204_v20  ;;  %v4250_v20 = vadd.f32 %v4249_v52, %v4248_v47 }
0x1340   :  { %v4234_v33 = vsel %vm420_vm9, %v4226_v61, 0.0  ;;  %v3356_v57 = vadd.f32 %v3355_v30, %v3354_v19  ;;  %v3369_v61 = vrot.slane %v3368_v34, 2  ;;  %v4257_v18 = vadd.f32 %v4256_v45, %v4255_v0 }
0x1341   :  { %v3336_v9 = vpop.permute.xlu0 %3335  ;;  %v4235_v26 = vrot.slane %v4234_v33, 4  ;;  %v4262_v46 = vsel %vm420_vm9, %v4230_v43, 0.0  ;;  %v4251_v30 = vrot.slane %v4250_v20, 2  ;;  %v3384_v43 = vadd.f32 %v3383_v2, %v3382_v56  ;;  %v5014_v56 = vld [vmem:[%s7069_s5 + $0x38] sm:$0xff] }
0x1342   :  { %v4211_v35 = vpop.permute.xlu1 %4210  ;;  %v3344_v15 = vmul.f32 %v6657_v49, %v3336_v9  ;;  %v3357_v3 = vrot.slane %v3356_v57, 1  ;;  %v4263_v21 = vrot.slane %v4262_v46, 4  ;;  %v3376_v9 = vrot.slane %v3375_v11, 2 }
0x1343   :  { %v4236_v7 = vadd.f32 %v4235_v26, %v4234_v33  ;;  %v4231_v32 = vmul.f32 %v6692_v59, %v4211_v35  ;;  %v3350_v35 = vrot.slane %v3349_v37, 1  ;;  %v3370_v23 = vadd.f32 %v3369_v61, %v3368_v34 }
0x1344   :  { %v3394_v29 = vsel %vm420_vm9, %v3344_v15, 0.0  ;;  %v3358_v1 = vadd.f32 %v3357_v3, %v3356_v57  ;;  %v4258_v15 = vrot.slane %v4257_v18, 2  ;;  %v4264_v36 = vadd.f32 %v4263_v21, %v4262_v46 }
0x1345   :  { %v4237_v16 = vrot.slane %v4236_v7, 2  ;;  %v3395_v31 = vrot.slane %v3394_v29, 4  ;;  %v4225_v28 = vpop.permute.xlu0 %4224  ;;  %v4269_v6 = vsel %vm420_vm9, %v4231_v32, 0.0  ;;  %v3351_v5 = vadd.f32 %v3350_v35, %v3349_v37 }
0x1346   :  { %v4218_v27 = vpop.permute.xlu1 %4217  ;;  %v4233_v33 = vmul.f32 %v6657_v49, %v4225_v28  ;;  %v4270_v50 = vrot.slane %v4269_v6, 4  ;;  %v3371_v0 = vrot.slane %v3370_v23, 1  ;;  %v4259_v52 = vadd.f32 %v4258_v15, %v4257_v18  ;;  %v5011_v28 = vld [vmem:[%s7069_s5 + $0x20] sm:$0xff] }
0x1347   :  { %v4232_v13 = vmul.f32 %v6640_v62, %v4218_v27  ;;  %v3389_v62 = vadd.f32 %v3388_v44, %v3387_v54  ;;  %v4238_v12 = vadd.f32 %v4237_v16, %v4236_v7  ;;  %v3396_v38 = vadd.f32 %v3395_v31, %v3394_v29 }
0x1348   :  { %v4283_v24 = vsel %vm420_vm9, %v4233_v33, 0.0  ;;  %v4271_v8 = vadd.f32 %v4270_v50, %v4269_v6  ;;  %v3377_v27 = vadd.f32 %v3376_v9, %v3375_v11  ;;  %v4252_v54 = vadd.f32 %v4251_v30, %v4250_v20 }
0x1349   :  { %v4276_v19 = vsel %vm420_vm9, %v4232_v13, 0.0  ;;  %v3390_v26 = vrot.slane %v3389_v62, 2  ;;  %v4239_v47 = vrot.slane %v4238_v12, 1  ;;  %v3397_v49 = vrot.slane %v3396_v38, 2 }
0x134a   :  { %v4277_v55 = vrot.slane %v4276_v19, 4  ;;  %v4246_v7 = vrot.slane %v4245_v14, 1  ;;  %v4284_v57 = vrot.slane %v4283_v24, 4  ;;  %v4265_v29 = vrot.slane %v4264_v36, 2 }
0x134b   :  { %v3391_v39 = vadd.f32 %v3390_v26, %v3389_v62  ;;  %v3412_v32 = vsel %vm487_vm10, %v3358_v1, %v3351_v5  ;;  %v4240_v34 = vadd.f32 %v4239_v47, %v4238_v12  ;;  %v3398_v4 = vadd.f32 %v3397_v49, %v3396_v38 }
0x134c   :  { %v4278_v22 = vadd.f32 %v4277_v55, %v4276_v19  ;;  %v4272_v40 = vrot.slane %v4271_v8, 2  ;;  %v3365_v13 = vadd.f32 %v3364_v25, %v3363_v63  ;;  %v3378_v37 = vrot.slane %v3377_v27, 1 }
0x134d   :  { %v4253_v44 = vrot.slane %v4252_v54, 1  ;;  %v3372_v3 = vadd.f32 %v3371_v0, %v3370_v23  ;;  %v4247_v16 = vadd.f32 %v4246_v7, %v4245_v14  ;;  %v3385_v46 = vrot.slane %v3384_v43, 1 }
0x134e   :  { %v4279_v45 = vrot.slane %v4278_v22, 2  ;;  %v4285_v31 = vadd.f32 %v4284_v57, %v4283_v24  ;;  %v3392_v11 = vrot.slane %v3391_v39, 1  ;;  %v4260_v20 = vrot.slane %v4259_v52, 1 }
0x134f   :  { %v4266_v6 = vadd.f32 %v4265_v29, %v4264_v36  ;;  %v5444_v61 = vpack.c.bf16 %v5012_v48, %v5011_v28  ;;  %v4301_v19 = vsel %vm487_vm10, %v4247_v16, %v4240_v34  ;;  %v3399_v62 = vrot.slane %v3398_v4, 1 }
0x1350   :  { %v4273_v18 = vadd.f32 %v4272_v40, %v4271_v8  ;;  %v5448_v21 = vpack.c.bf16 %v5014_v56, %v5013_v60  ;;  %v3413_v33 = vsel %vm489_vm11, %v3365_v13, %v3412_v32  ;;  %v3379_v35 = vadd.f32 %v3378_v37, %v3377_v27  ;;  %v2880_v37 = vpop.permute.xlu0 %2879  ;;  %v5596_v60 = vld [vmem:[%s7067_s3] sm:$0xff] }
0x1351   :  { %v4254_v12 = vadd.f32 %v4253_v44, %v4252_v54  ;;  %v4280_v38 = vadd.f32 %v4279_v45, %v4278_v22  ;;  %5445 = vmatprep.subr.bf16.mxu1 %v5444_v61  ;;  %v3386_v50 = vadd.f32 %v3385_v46, %v3384_v43  ;;  %v4286_v63 = vrot.slane %v4285_v31, 2  ;;  %v2873_v44 = vpop.permute.xlu1 %2872 }
0x1352   :  { %5447 = vmatpush3.bf16.msra.mxu1 %v5444_v61  ;;  %v3393_v9 = vadd.f32 %v3392_v11, %v3391_v39  ;;  %v4267_v30 = vrot.slane %v4266_v6, 1  ;;  %v4261_v1 = vadd.f32 %v4260_v20, %v4259_v52  ;;  %v4274_v23 = vrot.slane %v4273_v18, 1 }
0x1353   :  { %v4302_v55 = vsel %vm489_vm11, %v4254_v12, %v4301_v19  ;;  %5449 = vmatprep.subr.bf16.mxu1 %v5448_v21  ;;  %v3400_v14 = vadd.f32 %v3399_v62, %v3398_v4  ;;  %v3414_v2 = vsel %vm491_vm12, %v3372_v3, %v3413_v33  ;;  %v4281_v26 = vrot.slane %v4280_v38, 1 }
0x1354   :  { %v3415_v15 = vsel %vm493_vm13, %v3379_v35, %v3414_v2  ;;  %v4287_v36 = vadd.f32 %v4286_v63, %v4285_v31  ;;  %v4303_v5 = vsel %vm491_vm12, %v4261_v1, %v4302_v55  ;;  %v4268_v47 = vadd.f32 %v4267_v30, %v4266_v6  ;;  %v3762_v45 = vpop.permute.xlu0 %3761  ;;  %v5599_v55 = vld [vmem:[%s7067_s3 + $0x38] sm:$0xff] }
0x1355   :  { %v3416_v24 = vsel %vm495_vm14, %v3386_v50, %v3415_v15  ;;  %v4275_v8 = vadd.f32 %v4274_v23, %v4273_v18  ;;  %v4282_v54 = vadd.f32 %v4281_v26, %v4280_v38  ;;  %v2887_v3 = vpop.permute.xlu1 %2886  ;;  %v2924_v20 = vmul.f32 %v6668_v51, %v2880_v37  ;;  %v5597_v51 = vld [vmem:[%s7067_s3 + $0x20] sm:$0xff]  ;;  %v5600_v26 = vld [vmem:[%s7067_s3 + $0x8] sm:$0xff] }
0x1356   :  { %5451 = vmatpush3.bf16.msra.mxu1 %v5448_v21  ;;  %v3417_v49 = vsel %vm497_vm15, %v3393_v9, %v3416_v24  ;;  %v4304_v7 = vsel %vm493_vm13, %v4268_v47, %v4303_v5  ;;  %v4288_v43 = vrot.slane %v4287_v36, 1  ;;  %v2923_v56 = vmul.f32 %v5596_v60, %v2873_v44  ;;  %v5601_v5 = vld [vmem:[%s7067_s3 + $0x10] sm:$0xff] }
0x1357   :  { %v3418_v25 = vsel %vm499_vm0, %v3400_v14, %v3417_v49  ;;  %v4305_v39 = vsel %vm495_vm14, %v4275_v8, %v4304_v7  ;;  %v2938_v19 = vsel %vm420_vm9, %v2924_v20, 0.0  ;;  %v2925_v62 = vmul.f32 %v6676_v41, %v2887_v3  ;;  %v5598_v41 = vld [vmem:[%s7067_s3 + $0x30] sm:$0xff] }
0x1358   :  { %v4306_v29 = vsel %vm497_vm15, %v4282_v54, %v4305_v39  ;;  %v4289_v32 = vadd.f32 %v4288_v43, %v4287_v36  ;;  %v2894_v16 = vpop.permute.xlu0 %2893  ;;  %v2939_v21 = vrot.slane %v2938_v19, 4  ;;  %v2931_v33 = vsel %vm420_vm9, %v2923_v56, 0.0 }
0x1359   :  { %v3769_v46 = vpop.permute.xlu1 %3768  ;;  %v2926_v18 = vmul.f32 %v6684_v10, %v2894_v16  ;;  %v2945_v63 = vsel %vm420_vm9, %v2925_v62, 0.0  ;;  %v2932_v10 = vrot.slane %v2931_v33, 4  ;;  %v3812_v14 = vmul.f32 %v5596_v60, %v3762_v45 }
0x135a   :  { %v4307_v34 = vsel %vm499_vm0, %v4289_v32, %v4306_v29  ;;  %v2940_v23 = vadd.f32 %v2939_v21, %v2938_v19  ;;  %v2946_v2 = vrot.slane %v2945_v63, 4  ;;  %v3813_v15 = vmul.f32 %v5600_v26, %v3769_v46 }
0x135b   :  { %v2952_v30 = vsel %vm420_vm9, %v2926_v18, 0.0  ;;  %v2933_v8 = vadd.f32 %v2932_v10, %v2931_v33  ;;  %v3820_v43 = vsel %vm420_vm9, %v3812_v14, 0.0 }
0x135c   :  { %v2901_v31 = vpop.permute.xlu0 %2900  ;;  %v2953_v24 = vrot.slane %v2952_v30, 4  ;;  %v2941_v7 = vrot.slane %v2940_v23, 2  ;;  %v2947_v29 = vadd.f32 %v2946_v2, %v2945_v63  ;;  %v3827_v32 = vsel %vm420_vm9, %v3813_v15, 0.0 }
0x135d   :  { %v3776_v28 = vpop.permute.xlu1 %3775  ;;  %v2927_v35 = vmul.f32 %v5597_v51, %v2901_v31  ;;  %v2934_v3 = vrot.slane %v2933_v8, 2  ;;  %v3821_v16 = vrot.slane %v3820_v43, 4 }
0x135e   :  { %v3814_v47 = vmul.f32 %v5601_v5, %v3776_v28  ;;  %v2942_v28 = vadd.f32 %v2941_v7, %v2940_v23 }
0x1360   :  { %v2908_v48 = vpop.permute.xlu0 %2907  ;;  %v3834_v37 = vsel %vm420_vm9, %v3814_v47, 0.0  ;;  %v2943_v14 = vrot.slane %v2942_v28, 1 }
0x1361   :  { %v3783_v11 = vpop.permute.xlu1 %3782  ;;  %v2928_v38 = vmul.f32 %v6692_v59, %v2908_v48  ;;  %v2959_v59 = vsel %vm420_vm9, %v2927_v35, 0.0  ;;  %v3828_v48 = vrot.slane %v3827_v32, 4  ;;  %v3835_v60 = vrot.slane %v3834_v37, 4 }
0x1363   :  { %v2966_v36 = vsel %vm420_vm9, %v2928_v38, 0.0  ;;  %v3829_v63 = vadd.f32 %v3828_v48, %v3827_v32 }
0x1364   :  { %v2915_v6 = vpop.permute.xlu0 %2914  ;;  %v2967_v39 = vrot.slane %v2966_v36, 4 }
0x1365   :  { %v3790_v61 = vpop.permute.xlu1 %3789  ;;  %v2929_v9 = vmul.f32 %v5598_v41, %v2915_v6 }
0x1367   :  { %v2973_v49 = vsel %vm420_vm9, %v2929_v9, 0.0 }
0x1368   :  { %v2922_v12 = vpop.permute.xlu0 %2921 }
0x1369   :  { %v3797_v50 = vpop.permute.xlu1 %3796  ;;  %v2930_v1 = vmul.f32 %v5599_v55, %v2922_v12 }
0x136c   :  { %v3811_v6 = vpop.permute.xlu0 %3810 }
0x136d   :  { %v3819_v38 = vmul.f32 %v5599_v55, %v3811_v6 }
0x136f   :  { %v3869_v5 = vsel %vm420_vm9, %v3819_v38, 0.0 }
0x1389   :  { %v3489_v27 = vpop.f32.mrb[16].mxu0 }
0x138a   :  { %v3490_v22 = vadd.f32 %v3489_v27, %v3418_v25  ;;  %v5296_v0 = vpop.f32.mrb[17].mxu0  ;;  %v2960_v25 = vrot.slane %v2959_v59, 4  ;;  %v5602_v27 = vld [vmem:[%s7067_s3 + $0x18] sm:$0xff] }
0x138b   :  { %v3815_v54 = vmul.f32 %v5602_v27, %v3783_v11  ;;  %v3804_v0 = vpop.permute.xlu1 %3803  ;;  %v2968_v11 = vadd.f32 %v2967_v39, %v2966_v36  ;;  %v3870_v39 = vrot.slane %v3869_v5, 4 }
0x138c   :  { %3494 = vrot.lane.b32.xlu1 %v3490_v22, %s5662_s23  ;;  %v2980_v22 = vsel %vm420_vm9, %v2930_v1, 0.0  ;;  %v3818_v45 = vmul.f32 %v5598_v41, %v3804_v0  ;;  %v2961_v46 = vadd.f32 %v2960_v25, %v2959_v59 }
0x138d   :  { %v6924_v57 = vpop.f32.mrb[18].mxu0  ;;  %v2981_v44 = vrot.slane %v2980_v22, 4  ;;  %v3841_v31 = vsel %vm420_vm9, %v3815_v54, 0.0  ;;  %v2969_v41 = vrot.slane %v2968_v11, 2 }
0x138e   :  { %v5306_v52 = vpop.f32.mrb[19].mxu0  ;;  %v3842_v18 = vrot.slane %v3841_v31, 4  ;;  %v3862_v33 = vsel %vm420_vm9, %v3818_v45, 0.0  ;;  %v2962_v35 = vrot.slane %v2961_v46, 2 }
0x138f   :  { %v3816_v52 = vmul.f32 %v5597_v51, %v3790_v61  ;;  %v2948_v61 = vrot.slane %v2947_v29, 2  ;;  %v2982_v21 = vadd.f32 %v2981_v44, %v2980_v22  ;;  %v3822_v51 = vadd.f32 %v3821_v16, %v3820_v43 }
0x1390   :  { %v3863_v23 = vrot.slane %v3862_v33, 4  ;;  %v3843_v2 = vadd.f32 %v3842_v18, %v3841_v31  ;;  %v2963_v36 = vadd.f32 %v2962_v35, %v2961_v46  ;;  %v2970_v55 = vadd.f32 %v2969_v41, %v2968_v11 }
0x1391   :  { %v4378_v4 = vpop.f32.mrb[20].mxu0  ;;  %v3848_v20 = vsel %vm420_vm9, %v3816_v52, 0.0  ;;  %v2949_v10 = vadd.f32 %v2948_v61, %v2947_v29  ;;  %v2983_v26 = vrot.slane %v2982_v21, 2  ;;  %v3823_v15 = vrot.slane %v3822_v51, 2 }
0x1392   :  { %v4379_v40 = vadd.f32 %v4378_v4, %v4307_v34  ;;  %v5316_v13 = vpop.f32.mrb[21].mxu0  ;;  %v2974_v34 = vrot.slane %v2973_v49, 4  ;;  %v5603_v4 = vld [vmem:[%s7067_s3 + $0x28] sm:$0xff]  ;;  %v3849_v12 = vrot.slane %v3848_v20, 4  ;;  %v3864_v22 = vadd.f32 %v3863_v23, %v3862_v33 }
0x1393   :  { %v2954_v13 = vadd.f32 %v2953_v24, %v2952_v30  ;;  %v3836_v30 = vadd.f32 %v3835_v60, %v3834_v37  ;;  %v2950_v25 = vrot.slane %v2949_v10, 1  ;;  %v3844_v7 = vrot.slane %v3843_v2, 2 }
0x1394   :  { %4383 = vrot.lane.b32.xlu0 %v4379_v40, %s5662_s23  ;;  %v3817_v40 = vmul.f32 %v5603_v4, %v3797_v50  ;;  %v2975_v56 = vadd.f32 %v2974_v34, %v2973_v49  ;;  %v2935_v50 = vadd.f32 %v2934_v3, %v2933_v8  ;;  %v3850_v24 = vadd.f32 %v3849_v12, %v3848_v20 }
0x1395   :  { %v2955_v62 = vrot.slane %v2954_v13, 2  ;;  %v3830_v49 = vrot.slane %v3829_v63, 2  ;;  %v3837_v27 = vrot.slane %v3836_v30, 2  ;;  %v2984_v43 = vadd.f32 %v2983_v26, %v2982_v21 }
0x1396   :  { %v3855_v19 = vsel %vm420_vm9, %v3817_v40, 0.0  ;;  %v2976_v1 = vrot.slane %v2975_v56, 2  ;;  %v2936_v47 = vrot.slane %v2935_v50, 1  ;;  %v2944_v52 = vadd.f32 %v2943_v14, %v2942_v28 }
0x1397   :  { %v3856_v9 = vrot.slane %v3855_v19, 4  ;;  %v2956_v59 = vadd.f32 %v2955_v62, %v2954_v13  ;;  %v3824_v29 = vadd.f32 %v3823_v15, %v3822_v51  ;;  %v2964_v32 = vrot.slane %v2963_v36, 1 }
0x1398   :  { %v2977_v54 = vadd.f32 %v2976_v1, %v2975_v56  ;;  %v3851_v34 = vrot.slane %v3850_v24, 2  ;;  %v2937_v4 = vadd.f32 %v2936_v47, %v2935_v50  ;;  %v3831_v40 = vadd.f32 %v3830_v49, %v3829_v63 }
0x1399   :  { %v3857_v8 = vadd.f32 %v3856_v9, %v3855_v19  ;;  %v2957_v0 = vrot.slane %v2956_v59, 1  ;;  %v2971_v13 = vrot.slane %v2970_v55, 1  ;;  %v2951_v44 = vadd.f32 %v2950_v25, %v2949_v10 }
0x139a   :  { %v3838_v45 = vadd.f32 %v3837_v27, %v3836_v30  ;;  %v2978_v3 = vrot.slane %v2977_v54, 1  ;;  %v3865_v16 = vrot.slane %v3864_v22, 2  ;;  %v3845_v31 = vadd.f32 %v3844_v7, %v3843_v2 }
0x139b   :  { %v3858_v37 = vrot.slane %v3857_v8, 2  ;;  %v2958_v46 = vadd.f32 %v2957_v0, %v2956_v59  ;;  %v2985_v48 = vrot.slane %v2984_v43, 1  ;;  %v3871_v11 = vadd.f32 %v3870_v39, %v3869_v5 }
0x139c   :  { %v3825_v20 = vrot.slane %v3824_v29, 1  ;;  %v2965_v6 = vadd.f32 %v2964_v32, %v2963_v36  ;;  %v3852_v61 = vadd.f32 %v3851_v34, %v3850_v24  ;;  %v2998_v28 = vsel %vm487_vm10, %v2944_v52, %v2937_v4 }
0x139d   :  { %v3832_v60 = vrot.slane %v3831_v40, 1  ;;  %v2972_v56 = vadd.f32 %v2971_v13, %v2970_v55  ;;  %v3859_v19 = vadd.f32 %v3858_v37, %v3857_v8  ;;  %v2999_v62 = vsel %vm489_vm11, %v2951_v44, %v2998_v28  ;;  %v5022_v28 = vld [vmem:[%s7070_s6 + $0x30] sm:$0xff] }
0x139e   :  { %v3839_v18 = vrot.slane %v3838_v45, 1  ;;  %v2979_v21 = vadd.f32 %v2978_v3, %v2977_v54  ;;  %v3866_v33 = vadd.f32 %v3865_v16, %v3864_v22  ;;  %v3000_v51 = vsel %vm491_vm12, %v2958_v46, %v2999_v62 }
0x139f   :  { %v3846_v35 = vrot.slane %v3845_v31, 1  ;;  %v2986_v12 = vadd.f32 %v2985_v48, %v2984_v43  ;;  %v3872_v38 = vrot.slane %v3871_v11, 2  ;;  %v3001_v50 = vsel %vm493_vm13, %v2965_v6, %v3000_v51 }
0x13a0   :  { %v3853_v63 = vrot.slane %v3852_v61, 1  ;;  %v3833_v41 = vadd.f32 %v3832_v60, %v3831_v40  ;;  %v3860_v9 = vrot.slane %v3859_v19, 1  ;;  %v3002_v10 = vsel %vm495_vm14, %v2972_v56, %v3001_v50  ;;  %v5023_v56 = vld [vmem:[%s7070_s6 + $0x38] sm:$0xff] }
0x13a1   :  { %v3840_v30 = vadd.f32 %v3839_v18, %v3838_v45  ;;  %v3867_v1 = vrot.slane %v3866_v33, 1  ;;  %v3003_v23 = vsel %vm497_vm15, %v2979_v21, %v3002_v10  ;;  %v3826_v14 = vadd.f32 %v3825_v20, %v3824_v29  ;;  %v5015_v29 = vld [vmem:[#allocation2 + $0xb] ss:$0 sm:$0xff] }
0x13a2   :  { %v3847_v59 = vadd.f32 %v3846_v35, %v3845_v31  ;;  %v3873_v2 = vadd.f32 %v3872_v38, %v3871_v11  ;;  %v3004_v26 = vsel %vm499_vm0, %v2986_v12, %v3003_v23  ;;  %v3854_v15 = vadd.f32 %v3853_v63, %v3852_v61  ;;  %v5021_v61 = vld [vmem:[%s7070_s6 + $0x28] sm:$0xff] }
0x13a3   :  { %v3887_v36 = vsel %vm487_vm10, %v3833_v41, %v3826_v14  ;;  %v3861_v24 = vadd.f32 %v3860_v9, %v3859_v19  ;;  %v3868_v47 = vadd.f32 %v3867_v1, %v3866_v33  ;;  %v3076_v49 = vadd.f32 %v6866_v42, %v3004_v26  ;;  %v5018_v38 = vld [vmem:[#allocation2 + $0xc] ss:$0 sm:$0xff]  ;;  %v5019_v63 = vld [vmem:[#allocation2 + $0xd] ss:$0 sm:$0xff]  ;;  %v5027_v14 = vld [vmem:[%s7071_s7 + $0x40] sm:$0xff] }
0x13a4   :  { %v3888_v5 = vsel %vm489_vm11, %v3840_v30, %v3887_v36  ;;  %v3874_v55 = vrot.slane %v3873_v2, 1  ;;  %v5456_v19 = vpack.c.bf16 %v5023_v56, %v5022_v28 }
0x13a5   :  { %v3889_v8 = vsel %vm491_vm12, %v3847_v59, %v3888_v5  ;;  %v5028_v59 = vld [vmem:[%s7071_s7 + $0x48] sm:$0xff] }
0x13a6   :  { %v3890_v27 = vsel %vm493_vm13, %v3854_v15, %v3889_v8  ;;  %v3875_v7 = vadd.f32 %v3874_v55, %v3873_v2  ;;  %v5029_v2 = vld [vmem:[%s7071_s7 + $0x50] sm:$0xff]  ;;  %v5460_v26 = vpack.c.bf16 %v5028_v59, %v5027_v14  ;;  %v5030_v15 = vld [vmem:[%s7071_s7 + $0x58] sm:$0xff]  ;;  %v5032_v5 = vld [vmem:[%s7071_s7 + $0x68] sm:$0xff] }
0x13a7   :  { %v3891_v22 = vsel %vm495_vm14, %v3861_v24, %v3890_v27  ;;  %v5464_v36 = vpack.c.bf16 %v5030_v15, %v5029_v2  ;;  %v5031_v24 = vld [vmem:[%s7071_s7 + $0x60] sm:$0xff]  ;;  %v5034_v55 = vld [vmem:[%s7071_s7 + $0x78] sm:$0xff] }
0x13a8   :  { %v3892_v0 = vsel %vm497_vm15, %v3868_v47, %v3891_v22  ;;  %5461 = vmatprep.subr.bf16.mxu1 %v5460_v26  ;;  %v5468_v47 = vpack.c.bf16 %v5032_v5, %v5031_v24  ;;  %v5038_v5 = vld [vmem:[#allocation2 + $0x10] ss:$0 sm:$0xff] }
0x13a9   :  { %v3893_v43 = vsel %vm499_vm0, %v3875_v7, %v3892_v0 }
0x13aa   :  { %v3965_v39 = vadd.f32 %v6924_v57, %v3893_v43 }
0x13fe   :  { %v3495_v25 = vpop.permute.xlu1 %3494 }
0x13ff   :  { %v3497_v54 = vsel %vm420_vm9, %v3076_v49, %v3495_v25  ;;  %v5033_v49 = vld [vmem:[%s7071_s7 + $0x70] sm:$0xff]  ;;  %v5024_v25 = vld [vmem:[#allocation2 + $0xe] ss:$0 sm:$0xff]  ;;  %s5667_s7 = smov [#allocation5]  }
0x1400   :  { %5325 = vmatprep.mubr.msk.f32.mxu1 %vm166_vm7, %v3497_v54  ;;  %v5472_v8 = vpack.c.bf16 %v5034_v55, %v5033_v49 }
0x1406   :  { %v4384_v42 = vpop.permute.xlu0 %4383 }
0x1407   :  { %v4386_v52 = vsel %vm420_vm9, %v3965_v39, %v4384_v42 }
0x1408   :  { %5326 = vmatmul.mubr.msk.f32.vlgmr.msra.gmra.mrb[22].mxu1 %vm166_vm7, %v4386_v52 }
0x1409   :  { %5463 = vmatpush3.bf16.msra.mxu1 %v5460_v26 }
0x140a   :  { %5465 = vmatprep.subr.bf16.mxu1 %v5464_v36 }
0x140d   :  { %5467 = vmatpush3.bf16.msra.mxu1 %v5464_v36 }
0x140e   :  { %5469 = vmatprep.subr.bf16.mxu1 %v5468_v47 }
0x1411   :  { %5471 = vmatpush3.bf16.msra.mxu1 %v5468_v47 }
0x1412   :  { %5473 = vmatprep.subr.bf16.mxu1 %v5472_v8 }
0x1415   :  { %5475 = vmatpush3.bf16.msra.mxu1 %v5472_v8  ;;  %v5039_v8 = vld [vmem:[#allocation2 + $0x11] ss:$0 sm:$0xff] }
0x14db   :  { %v5327_v32 = vpop.f32.mrb[22].mxu1 }
0x14dc   :  { %v4474_v34 = vadd.f32 %v5327_v32, %v5015_v29  ;;  %v4468_v4 = vpop.f32.mrb[23].mxu1 }
0x14dd   :  { %v4469_v40 = vadd.f32 %v5015_v29, %v4468_v4 }
0x14de   :  { %v4478_v13 = vadd.f32 %v4474_v34, %v6485_v58 }
0x14df   :  { %v4477_v37 = vadd.f32 %v4469_v40, %v6483_v53  ;;  %v5020_v53 = vld [vmem:[%s7070_s6 + $0x20] sm:$0xff] }
0x14e0   :  { %v4482_v44 = vsel %vm166_vm7, %v4478_v13, 0.0  ;;  %v5452_v60 = vpack.c.bf16 %v5021_v61, %v5020_v53 }
0x14e1   :  { %4483 = vadd.xlane.f32.xlu0 %v4482_v44  ;;  %v4479_v45 = vsel %vm166_vm7, %v4477_v37, 0.0 }
0x14e2   :  { %4480 = vadd.xlane.f32.xlu1 %v4479_v45  ;;  %5453 = vmatprep.subr.bf16.mxu0 %v5452_v60 }
0x14e3   :  { %5455 = vmatpush3.bf16.msra.mxu0 %v5452_v60 }
0x14e4   :  { %5457 = vmatprep.subr.bf16.mxu0 %v5456_v19 }
0x14e7   :  { %5459 = vmatpush3.bf16.msra.mxu0 %v5456_v19 }
0x156e   :  { %v4484_v57 = vpop.xlane.xlu0 %4483 }
0x156f   :  { %v4486_v3 = vmul.f32 0.03125, %v4484_v57  ;;  %v4481_v16 = vpop.xlane.xlu1 %4480 }
0x1570   :  { %v4485_v46 = vmul.f32 0.03125, %v4481_v16 }
0x1571   :  { %v4488_v31 = vsub.f32 %v4478_v13, %v4486_v3 }
0x1572   :  { %v4487_v48 = vsub.f32 %v4477_v37, %v4485_v46 }
0x1573   :  { %v4490_v6 = vmul.f32 %v4488_v31, %v4488_v31 }
0x1574   :  { %v4489_v11 = vmul.f32 %v4487_v48, %v4487_v48 }
0x1575   :  { %v4494_v58 = vsel %vm166_vm7, %v4490_v6, 0.0 }
0x1576   :  { %v4491_v20 = vsel %vm166_vm7, %v4489_v11, 0.0 }
0x1577   :  { %4492 = vadd.xlane.f32.xlu0 %v4491_v20 }
0x157b   :  { %4495 = vadd.xlane.f32.xlu0 %v4494_v58 }
0x1604   :  { %v4493_v62 = vpop.xlane.xlu0 %4492 }
0x1605   :  { %v4497_v18 = vmul.f32 0.03125, %v4493_v62 }
0x1607   :  { %v4499_v21 = vadd.f32 1e-12, %v4497_v18 }
0x1608   :  { %v4496_v33 = vpop.xlane.xlu0 %4495 }
0x1609   :  { %5566 = vrsqrt.f32 %v4499_v21  ;;  %v4498_v51 = vmul.f32 0.03125, %v4496_v33 }
0x160b   :  { %v4500_v35 = vadd.f32 1e-12, %v4498_v51 }
0x160d   :  { %5568 = vrsqrt.f32 %v4500_v35 }
0x1613   :  { %v5567_v12 = vpop.eup %5566 }
0x1614   :  { %v4503_v50 = vmul.f32 %v5567_v12, %v4487_v48 }
0x1616   :  { %v4509_v41 = vmul.f32 %v5018_v38, %v4503_v50  ;;  %v4760_v50 = vld [vmem:[#allocation2 + $0x20] sm:$0xff] }
0x1617   :  { %v5569_v9 = vpop.eup %5568 }
0x1618   :  { %v4504_v10 = vmul.f32 %v5569_v9, %v4488_v31  ;;  %v4515_v30 = vadd.f32 %v5019_v63, %v4509_v41  ;;  %v5035_v31 = vld [vmem:[#allocation2 + $0xf] ss:$0 sm:$0xff]  ;;  %v5666_v41 = vmov 0.0|0.0  }
0x1619   :  { %5476 = vmatprep.subr.bf16.mxu0 %v5666_v41 }
0x161a   :  { %v4510_v1 = vmul.f32 %v5018_v38, %v4504_v10  ;;  %5336 = vmatprep.mubr.msk.f32.mxu0 %vm166_vm7, %v4515_v30  ;;  %v4759_v38 = vld [vmem:[#allocation2 + $0x18] sm:$0xff]  ;;  %v4762_v10 = vld [vmem:[#allocation2 + $0x30] sm:$0xff] }
0x161b   :  { %v5477_v9 = vpack.c.bf16 %v4760_v50, %v4759_v38 }
0x161c   :  { %v4516_v23 = vadd.f32 %v5019_v63, %v4510_v1  ;;  %v4761_v63 = vld [vmem:[#allocation2 + $0x28] sm:$0xff]  ;;  %v5508_v1 = vpack.i.bf16 %v4760_v50, %v4759_v38 }
0x161e   :  { %5337 = vmatmul.mubr.msk.f32.vlgmr.msra.gmra.mrb[22].mxu0 %vm166_vm7, %v4516_v23 }
0x161f   :  { %5366 = vmatprep.mubr.msk.f32.mxu0 %vm5659_vm8, %v7085_v17  ;;  %5478 = vmatpush3.bf16.msra.mxu0 %v5477_v9 }
0x1620   :  { %5479 = vmatprep.subr.bf16.mxu0 %v5666_v41 }
0x16f1   :  { %v5338_v27 = vpop.f32.mrb[22].mxu0 }
0x16f2   :  { %v4604_v54 = vadd.f32 %v5338_v27, %v5024_v25  ;;  %v4598_v22 = vpop.f32.mrb[23].mxu0 }
0x16f3   :  { %v4599_v0 = vadd.f32 %v5024_v25, %v4598_v22 }
0x16f4   :  { %v4610_v7 = vmul.f32 0.044715, %v4604_v54  ;;  %v4608_v3 = vmul.f32 0.5, %v4604_v54 }
0x16f5   :  { %v4609_v43 = vmul.f32 0.044715, %v4599_v0  ;;  %v4607_v45 = vmul.f32 0.5, %v4599_v0 }
0x16f6   :  { %v4612_v39 = vmul.f32 %v4610_v7, %v4604_v54 }
0x16f7   :  { %v4611_v42 = vmul.f32 %v4609_v43, %v4599_v0 }
0x16f8   :  { %v4614_v52 = vmul.f32 %v4612_v39, %v4604_v54 }
0x16f9   :  { %v4613_v29 = vmul.f32 %v4611_v42, %v4599_v0 }
0x16fa   :  { %v4616_v32 = vadd.f32 %v4614_v52, %v4604_v54 }
0x16fb   :  { %v4615_v34 = vadd.f32 %v4613_v29, %v4599_v0 }
0x16fc   :  { %v4618_v4 = vmul.f32 0.7978846, %v4616_v32 }
0x16fd   :  { %v4617_v40 = vmul.f32 0.7978846, %v4615_v34 }
0x16fe   :  { %5570 = vtanh.f32 %v4618_v4 }
0x16ff   :  { %5572 = vtanh.f32 %v4617_v40  ;;  %v5040_v40 = vld [vmem:[#allocation2 + $0x12] ss:$0 sm:$0xff] }
0x1708   :  { %v5571_v13 = vpop.eup %5570 }
0x1709   :  { %v5573_v37 = vpop.eup %5572  ;;  %v4622_v44 = vadd.f32 1.0, %v5571_v13 }
0x170a   :  { %v4621_v57 = vadd.f32 1.0, %v5573_v37 }
0x170b   :  { %v4624_v46 = vmul.f32 %v4622_v44, %v4608_v3 }
0x170c   :  { %v4623_v16 = vmul.f32 %v4621_v57, %v4607_v45 }
0x170e   :  { %5355 = vmatprep.mubr.msk.f32.mxu1 %vm2389_vm2, %v4623_v16 }
0x170f   :  { %5356 = vmatmul.mubr.msk.f32.vlgmr.msra.gmra.mrb[24].mxu1 %vm2389_vm2, %v4624_v46 }
0x17e2   :  { %v5357_v48 = vpop.f32.mrb[24].mxu1 }
0x17e3   :  { %v4716_v11 = vadd.f32 %v5357_v48, %v5035_v31  ;;  %v4710_v20 = vpop.f32.mrb[25].mxu1 }
0x17e4   :  { %v4711_v6 = vadd.f32 %v5035_v31, %v4710_v20 }
0x17e5   :  { %v4720_v58 = vadd.f32 %v4716_v11, %v4516_v23  ;;  %v5513_v23 = vpack.i.bf16 %v4762_v10, %v4761_v63 }
0x17e6   :  { %v4719_v53 = vadd.f32 %v4711_v6, %v4515_v30  ;;  %v5480_v30 = vpack.c.bf16 %v4762_v10, %v4761_v63 }
0x17e7   :  { %v4724_v61 = vsel %vm166_vm7, %v4720_v58, 0.0 }
0x17e8   :  { %4725 = vadd.xlane.f32.xlu1 %v4724_v61  ;;  %v4721_v28 = vsel %vm166_vm7, %v4719_v53, 0.0  ;;  %5481 = vmatpush3.bf16.msra.mxu0 %v5480_v30 }
0x17e9   :  { %4722 = vadd.xlane.f32.xlu0 %v4721_v28  ;;  %5482 = vmatprep.subr.bf16.mxu0 %v5666_v41 }
0x1875   :  { %v4726_v60 = vpop.xlane.xlu1 %4725 }
0x1876   :  { %v4728_v56 = vmul.f32 0.03125, %v4726_v60  ;;  %v4723_v19 = vpop.xlane.xlu0 %4722 }
0x1877   :  { %v4727_v62 = vmul.f32 0.03125, %v4723_v19 }
0x1878   :  { %v4730_v18 = vsub.f32 %v4720_v58, %v4728_v56 }
0x1879   :  { %v4729_v21 = vsub.f32 %v4719_v53, %v4727_v62 }
0x187a   :  { %v4732_v33 = vmul.f32 %v4730_v18, %v4730_v18 }
0x187b   :  { %v4731_v51 = vmul.f32 %v4729_v21, %v4729_v21 }
0x187c   :  { %v4736_v35 = vsel %vm166_vm7, %v4732_v33, 0.0 }
0x187d   :  { %4737 = vadd.xlane.f32.xlu1 %v4736_v35  ;;  %v4733_v12 = vsel %vm166_vm7, %v4731_v51, 0.0 }
0x187e   :  { %4734 = vadd.xlane.f32.xlu0 %v4733_v12 }
0x188e   :  { %5509 = vrot.lane.b32.xlu1 %v5508_v1, %s5660_s8 }
0x1894   :  { %5514 = vrot.lane.b32.xlu0 %v5513_v23, %s5660_s8  ;;  %s4949_s8 = sshll.u32 %s5667_s7, 4  ;;  %s4950_s8 = int_to_ptr.vmem [resolvable:$true] %s4949_s8 }
0x1895   :  { %s5626_s0 = scalar_lea.vmem %s4950_s8, 32  ;;  %p5631_p9 = scmp.lt.s32.totalorder %s4950_s8, %s4950_s8 }
0x1896   :  { %p5627_p8 = scmp.ne.s32.totalorder %s4950_s8, %s5626_s0  ;;  %p5632_p10 = scmp.lt.s32.totalorder %s5626_s0, %s5626_s0 }
0x1898   :  { %p5633_p11 = por %p5632_p10, %p5631_p9 }
0x189a   :  { %p5634_p12 = pnand %p5633_p11, %p5627_p8 }
0x190a   :  { %v4738_v14 = vpop.xlane.xlu1 %4737 }
0x190b   :  { %v4740_v59 = vmul.f32 0.03125, %v4738_v14  ;;  %v4735_v2 = vpop.xlane.xlu0 %4734 }
0x190c   :  { %v4739_v26 = vmul.f32 0.03125, %v4735_v2 }
0x190d   :  { %v4742_v15 = vadd.f32 1e-12, %v4740_v59 }
0x190e   :  { %v4741_v36 = vadd.f32 1e-12, %v4739_v26  ;;  %v5510_v43 = vpop.permute.xlu1 %5509 }
0x190f   :  { %5574 = vrsqrt.f32 %v4742_v15  ;;  %v5515_v39 = vpop.permute.xlu0 %5514  ;;  %v5512_v42 = vunpack.i.h.bf16 %v5510_v43  ;;  %v5511_v52 = vunpack.i.l.bf16 %v5510_v43 }
0x1910   :  { %5576 = vrsqrt.f32 %v4741_v36  ;;  %v5517_v29 = vunpack.i.h.bf16 %v5515_v39  ;;  %v5516_v32 = vunpack.i.l.bf16 %v5515_v39 }
0x1911   :  { %v5483_v34 = vpack.c.bf16 %v5512_v42, %v5511_v52 }
0x1912   :  { %v5486_v4 = vpack.c.bf16 %v5517_v29, %v5516_v32 }
0x1919   :  { %v5575_v24 = vpop.eup %5574 }
0x191a   :  { %v5577_v47 = vpop.eup %5576  ;;  %v4746_v49 = vmul.f32 %v5575_v24, %v4730_v18 }
0x191b   :  { %v4745_v55 = vmul.f32 %v5577_v47, %v4729_v21 }
0x191c   :  { %v4752_v25 = vmul.f32 %v5038_v5, %v4746_v49 }
0x191d   :  { %v4751_v27 = vmul.f32 %v5038_v5, %v4745_v55 }
0x191e   :  { %v4758_v54 = vadd.f32 %v5039_v8, %v4752_v25 }
0x191f   :  { %v4757_v22 = vadd.f32 %v5039_v8, %v4751_v27 }
0x1920   :  { %v4766_v0 = vrot.slane %v4758_v54, 7 }
0x1922   :  { %v4769_v7 = vsel %vm4768_vm3, %v4757_v22, %v4766_v0 }
0x1923   :  { %5367 = vmatmul.mubr.msk.f32.vlgmr.msra.gmra.mrb[24].mxu0 %vm166_vm7, %v4769_v7 }
0x1924   :  { %5377 = vmatprep.mubr.msk.f32.mxu0 %vm5659_vm8, %v7085_v17  ;;  %5484 = vmatpush3.bf16.msra.mxu0 %v5483_v34  ;;  %v5042_v17 = vld [vmem:[#allocation2 + $0x13] ss:$0 sm:$0xff] }
0x1925   :  { %5485 = vmatprep.subr.bf16.mxu0 %v5666_v41 }
0x1928   :  { %5487 = vmatpush3.bf16.msra.mxu0 %v5486_v4 }
0x19f6   :  { %v4843_v13 = vpop.f32.mrb[24].mxu0 }
0x19f7   :  { %v4844_v37 = vadd.f32 %v5040_v40, %v4843_v13  ;;  %v5368_v44 = vpop.f32.mrb[25].mxu0 }
0x19f9   :  { %5578 = vtanh.f32 %v4844_v37 }
0x1a03   :  { %v5579_v45 = vpop.eup %5578 }
0x1a04   :  { %5378 = vmatmul.mubr.msk.f32.vlgmr.msra.gmra.mrb[26].mxu0 %vm166_vm7, %v5579_v45 }
0x1ad7   :  { %v4937_v57 = vpop.f32.mrb[26].mxu0 }
0x1ad8   :  { %v4938_v3 = vadd.f32 %v5042_v17, %v4937_v57  ;;  %v5379_v16 = vpop.f32.mrb[27].mxu0 }
0x1ada   :  { %4942 = vst.msk [vmem:[#allocation5] sm:$0x3] %vm4941_vm4, %v4938_v3 }
0x1adb   :  { %5637 = shalt.err (!%p5634_p12)
}
0x1adc   :  { %s5638_s15 = scalar_lea.hbm %s7073_s9, 32 }
0x1add   :  { %p5639_p13 = scmp.ne.s32.totalorder %s7073_s9, %s5638_s15  ;;  %p5642_p0 = scmp.lt.u32.totalorder %s5638_s15, %s7073_s9 }
0x1adf   :  { %p5644_p1 = pnand %p5642_p0, %p5639_p13 }
0x1ae1   :  { %5647 = shalt.err (!%p5644_p1)
}
0x1ae2   :  { %4952 = dma.vmem_to_hbm [thread:$0]  %s4950_s8, 32, %s7073_s9, [#allocation4]  }
0x1ae3   :  { %5650 = dma.done.wait [#allocation4], 32  }
0x1ae4   :  { %5651 = vsyncadd [#allocation4], 4294967264 }
0x1ae5   :  { %4956 = vsyncpa [#allocation3], 1 }
0x1ae6   :  { %4957 = vsyncpa [#allocation4], 1 }

</bundles_post_ra>
